<compile_context>
chip_gen: v7x
topology: tpu7x:2x2x1
jax: 0.10.0
libtpu: 0.0.40
codegen_flags: <defaults>
</compile_context>

<pallas_src>
import math

import jax
import jax.numpy as jnp
from jax import lax
from jax.experimental import pallas as pl
from jax.experimental.pallas import tpu as pltpu

# ---------------- config (small shapes consistent with the module) ----------------
INPUT_DIM = 16        # mel features (input_dim)
ENCODER_DIM = 32      # encoder_dim
NUM_LAYERS = 2        # num_layers (small)
NUM_HEADS = 4         # num_attention_heads
FF_EXPANSION = 4      # feed_forward_expansion_factor
CONV_EXPANSION = 2    # conv_expansion_factor
CONV_KERNEL = 7       # conv_kernel_size (odd, as required)
BATCH = 2
TIME = 16
LN_EPS = 1e-5
BN_EPS = 1e-5


# =========================== shared in-kernel helpers ===========================

def _ln(x, g, b, eps=LN_EPS):
    mu = jnp.mean(x, axis=-1, keepdims=True)
    var = jnp.mean(jnp.square(x - mu), axis=-1, keepdims=True)
    return (x - mu) * lax.rsqrt(var + eps) * g + b


def _rep_spec(shape):
    """BlockSpec for an operand replicated across the (1-D) grid."""
    n = len(shape)
    return pl.BlockSpec(shape, lambda i: (0,) * n)


# =========================== fused feed-forward module ===========================

def _ff_body(x_ref, lng_ref, lnb_ref, w1_ref, b1_ref, w2_ref, b2_ref):
    x = x_ref[...]                                                     # (T, D)
    h = _ln(x, lng_ref[...], lnb_ref[...])
    h = jnp.dot(h, w1_ref[...], preferred_element_type=jnp.float32) + b1_ref[...]
    h = h * jax.nn.sigmoid(h)                                          # Swish
    y = jnp.dot(h, w2_ref[...], preferred_element_type=jnp.float32) + b2_ref[...]
    # TODO(synk): dropout is identity (inference mode).
    return x + 0.5 * y                                                 # half-step residual fused


def _ff_kernel(x_ref, lng_ref, lnb_ref, w1_ref, b1_ref, w2_ref, b2_ref, o_ref):
    o_ref[...] = _ff_body(x_ref, lng_ref, lnb_ref, w1_ref, b1_ref, w2_ref, b2_ref)


def _ff_final_ln_kernel(x_ref, lng_ref, lnb_ref, w1_ref, b1_ref, w2_ref, b2_ref,
                        fg_ref, fb_ref, o_ref):
    y = _ff_body(x_ref, lng_ref, lnb_ref, w1_ref, b1_ref, w2_ref, b2_ref)
    o_ref[...] = _ln(y, fg_ref[...], fb_ref[...])                      # block-final LayerNorm fused


def feed_forward_fused(x, p, final_ln=None):
    B, T, D = x.shape
    DF = p["w1"].shape[1]
    args = [x,
            p["ln_g"].reshape(1, D), p["ln_b"].reshape(1, D),
            p["w1"], p["b1"].reshape(1, DF),
            p["w2"], p["b2"].reshape(1, D)]
    in_specs = [pl.BlockSpec((None, T, D), lambda b: (b, 0, 0)),
                _rep_spec((1, D)), _rep_spec((1, D)),
                _rep_spec((D, DF)), _rep_spec((1, DF)),
                _rep_spec((DF, D)), _rep_spec((1, D))]
    kernel = _ff_kernel
    if final_ln is not None:
        fg, fb = final_ln
        args += [fg.reshape(1, D), fb.reshape(1, D)]
        in_specs += [_rep_spec((1, D)), _rep_spec((1, D))]
        kernel = _ff_final_ln_kernel
    return pl.pallas_call(
        kernel,
        out_shape=jax.ShapeDtypeStruct((B, T, D), jnp.float32),
        grid=(B,),
        in_specs=in_specs,
        out_specs=pl.BlockSpec((None, T, D), lambda b: (b, 0, 0)),
        input_output_aliases={0: 0},
        compiler_params=pltpu.CompilerParams(dimension_semantics=("parallel",)),
    )(*args)


# =========================== fused relative MHSA module ===========================

def _mhsa_kernel_factory(T, D, H):
    dh = D // H
    inv_sqrt_d = 1.0 / math.sqrt(D)                                    # module scales by sqrt(d_model)

    def kernel(x_ref, lng_ref, lnb_ref, wqkv_ref, bqkv_ref, pe_ref, wpos_ref,
               ub_ref, vb_ref, wo_ref, bo_ref, o_ref):
        x = x_ref[...]                                                 # (T, D)
        h = _ln(x, lng_ref[...], lnb_ref[...])
        qkv = jnp.dot(h, wqkv_ref[...],
                      preferred_element_type=jnp.float32) + bqkv_ref[...]   # (T, 3D)
        pos = jnp.dot(pe_ref[...], wpos_ref[...],
                      preferred_element_type=jnp.float32)              # (T, D), pos_proj has no bias

        # Constant 0/1 selection matrices for the Transformer-XL relative shift
        # (row-wise skew realised as tiny matmuls; no gathers / unaligned concats).
        c_idx = lax.broadcasted_iota(jnp.int32, (T, T), 0)
        j_idx = lax.broadcasted_iota(jnp.int32, (T, T), 1)
        a_mats = [((j_idx <= i) & (c_idx == j_idx + (T - 1 - i))).astype(jnp.float32)
                  for i in range(T)]
        b_mats = [((j_idx >= i + 2) & (c_idx == j_idx - (i + 2))).astype(jnp.float32)
                  for i in range(max(T - 2, 0))]
        row_masks = [c_idx == i for i in range(T)]

        nt = (((1,), (1,)), ((), ()))                                  # A @ B^T
        out_acc = jnp.zeros((T, D), jnp.float32)
        for hh in range(H):                                            # static head unroll
            q_h = qkv[:, hh * dh:(hh + 1) * dh]
            k_h = qkv[:, D + hh * dh:D + (hh + 1) * dh]
            v_h = qkv[:, 2 * D + hh * dh:2 * D + (hh + 1) * dh]
            p_h = pos[:, hh * dh:(hh + 1) * dh]
            qu = q_h + ub_ref[hh:hh + 1, :]                            # q + u_bias
            qv = q_h + vb_ref[hh:hh + 1, :]                            # q + v_bias
            content = lax.dot_general(qu, k_h, nt, preferred_element_type=jnp.float32)
            pos_raw = lax.dot_general(qv, p_h, nt, preferred_element_type=jnp.float32)

            # relative shift (matches zero-pad / reshape / slice trick of the reference)
            shifted = jnp.zeros((T, T), jnp.float32)
            for i in range(T):
                row = jnp.dot(pos_raw[i:i + 1, :], a_mats[i],
                              preferred_element_type=jnp.float32)
                if i < T - 2:
                    row = row + jnp.dot(pos_raw[i + 1:i + 2, :], b_mats[i],
                                        preferred_element_type=jnp.float32)
                shifted = shifted + jnp.where(row_masks[i], row, 0.0)

            scores = (content + shifted) * inv_sqrt_d
            m = jnp.max(scores, axis=-1, keepdims=True)
            e = jnp.exp(scores - m)
            probs = e * pl.reciprocal(jnp.sum(e, axis=-1, keepdims=True), approx=True)
            ctx_h = jnp.dot(probs, v_h, preferred_element_type=jnp.float32)      # (T, dh)
            # head-concat folded into the output projection (row-sliced wo)
            out_acc = out_acc + jnp.dot(ctx_h, wo_ref[hh * dh:(hh + 1) * dh, :],
                                        preferred_element_type=jnp.float32)
        # TODO(synk): attention dropout is identity (inference mode).
        o_ref[...] = x + out_acc + bo_ref[...]

    return kernel


def sinusoidal_pe(length, d_model):
    position = jnp.arange(length, dtype=jnp.float32)[:, None]
    div_term = jnp.exp(jnp.arange(0, d_model, 2, dtype=jnp.float32)
                       * -(math.log(10000.0) / d_model))
    pe = jnp.zeros((length, d_model), jnp.float32)
    pe = pe.at[:, 0::2].set(jnp.sin(position * div_term))
    pe = pe.at[:, 1::2].set(jnp.cos(position * div_term))
    return pe


def mhsa_fused(x, p, num_heads):
    B, T, D = x.shape
    H = num_heads
    dh = D // H
    w_qkv = jnp.concatenate([p["wq"], p["wk"], p["wv"]], axis=1)       # fused QKV weight (D, 3D)
    b_qkv = jnp.concatenate([p["bq"], p["bk"], p["bv"]]).reshape(1, 3 * D)
    pe = sinusoidal_pe(T, D)
    args = [x,
            p["ln_g"].reshape(1, D), p["ln_b"].reshape(1, D),
            w_qkv, b_qkv, pe, p["wpos"],
            p["u"], p["v"], p["wo"], p["bo"].reshape(1, D)]
    in_specs = [pl.BlockSpec((None, T, D), lambda b: (b, 0, 0)),
                _rep_spec((1, D)), _rep_spec((1, D)),
                _rep_spec((D, 3 * D)), _rep_spec((1, 3 * D)),
                _rep_spec((T, D)), _rep_spec((D, D)),     # pe / wpos: batch-invariant, no tiling
                _rep_spec((H, dh)), _rep_spec((H, dh)),
                _rep_spec((D, D)), _rep_spec((1, D))]
    return pl.pallas_call(
        _mhsa_kernel_factory(T, D, H),
        out_shape=jax.ShapeDtypeStruct((B, T, D), jnp.float32),
        grid=(B,),
        in_specs=in_specs,
        out_specs=pl.BlockSpec((None, T, D), lambda b: (b, 0, 0)),
        input_output_aliases={0: 0},
        compiler_params=pltpu.CompilerParams(dimension_semantics=("parallel",)),
    )(*args)


# =========================== fused conformer conv module ===========================

def _conv_kernel_factory(T, D, K):
    pad = (K - 1) // 2

    def kernel(x_ref, lng_ref, lnb_ref, pw1w_ref, pw1b_ref, dww_ref,
               bng_ref, bnb_ref, bnm_ref, bnv_ref, pw2w_ref, pw2b_ref,
               o_ref, upad_ref):
        x = x_ref[...]                                                 # (T, D)
        h = _ln(x, lng_ref[...], lnb_ref[...])
        h = jnp.dot(h, pw1w_ref[...], preferred_element_type=jnp.float32) + pw1b_ref[...]
        u = h[:, :D] * jax.nn.sigmoid(h[:, D:2 * D])                   # GLU over channels
        # zero-padded time halo kept in a VMEM scratch (no value-level concat)
        upad_ref[...] = jnp.zeros_like(upad_ref)
        upad_ref[pad:pad + T, :] = u
        acc = jnp.zeros((T, D), jnp.float32)
        for k in range(K):                                             # static depthwise taps
            acc = acc + upad_ref[k:k + T, :] * dww_ref[k:k + 1, :]
        # TODO(synk): BatchNorm1d uses eval-mode running stats (training batch stats not reproduced).
        scale = bng_ref[...] * lax.rsqrt(bnv_ref[...] + BN_EPS)
        shift = bnb_ref[...] - bnm_ref[...] * scale
        y = acc * scale + shift
        y = y * jax.nn.sigmoid(y)                                      # Swish
        out = jnp.dot(y, pw2w_ref[...], preferred_element_type=jnp.float32) + pw2b_ref[...]
        o_ref[...] = x + out                                           # residual fused

    return kernel


def conv_module_fused(x, p):
    B, T, D = x.shape
    K = p["dw_w"].shape[0]
    DE = p["pw1_w"].shape[1]                                           # 2*D
    pad = (K - 1) // 2
    args = [x,
            p["ln_g"].reshape(1, D), p["ln_b"].reshape(1, D),
            p["pw1_w"], p["pw1_b"].reshape(1, DE),
            p["dw_w"],
            p["bn_g"].reshape(1, D), p["bn_b"].reshape(1, D),
            p["bn_mean"].reshape(1, D), p["bn_var"].reshape(1, D),
            p["pw2_w"], p["pw2_b"].reshape(1, D)]
    in_specs = [pl.BlockSpec((None, T, D), lambda b: (b, 0, 0)),
                _rep_spec((1, D)), _rep_spec((1, D)),
                _rep_spec((D, DE)), _rep_spec((1, DE)),
                _rep_spec((K, D)),
                _rep_spec((1, D)), _rep_spec((1, D)),
                _rep_spec((1, D)), _rep_spec((1, D)),
                _rep_spec((D, D)), _rep_spec((1, D))]
    return pl.pallas_call(
        _conv_kernel_factory(T, D, K),
        out_shape=jax.ShapeDtypeStruct((B, T, D), jnp.float32),
        grid=(B,),
        in_specs=in_specs,
        out_specs=pl.BlockSpec((None, T, D), lambda b: (b, 0, 0)),
        scratch_shapes=[pltpu.VMEM((T + 2 * pad, D), jnp.float32)],
        input_output_aliases={0: 0},
        compiler_params=pltpu.CompilerParams(dimension_semantics=("parallel",)),
    )(*args)


# =========================== conv subsampling (2x Conv2d s=2 + Linear) ===========================

def _conv1_kernel(x_ref, w_ref, b_ref, o_ref):
    y = jnp.dot(x_ref[...], w_ref[...], preferred_element_type=jnp.float32) + b_ref[...]
    o_ref[...] = jnp.maximum(y, 0.0)                                   # Conv2d #1 + ReLU


def _conv2_linear_kernel(p_ref, w2_ref, b2_ref, wr_ref, bo_ref, o_ref):
    # grid axis = output frequency (reduction); output block resident in VMEM across it.
    f = pl.program_id(0)

    @pl.when(f == 0)
    def _():
        o_ref[...] = jnp.zeros_like(o_ref)

    h = jnp.dot(p_ref[...], w2_ref[...], preferred_element_type=jnp.float32) + b2_ref[...]
    h = jnp.maximum(h, 0.0)                                            # Conv2d #2 + ReLU
    o_ref[...] += jnp.dot(h, wr_ref[...], preferred_element_type=jnp.float32)

    @pl.when(f == pl.num_programs(0) - 1)
    def _():
        o_ref[...] += bo_ref[...]                                      # final Linear bias


def conv_subsampling(x, lengths, p, encoder_dim):
    B, T, F = x.shape
    C = p["c1_w"].shape[0]
    k, stride, pad = 3, 2, 1
    T1 = (T + 2 * pad - k) // stride + 1
    F1 = (F + 2 * pad - k) // stride + 1
    T2 = (T1 + 2 * pad - k) // stride + 1
    F2 = (F1 + 2 * pad - k) // stride + 1

    # ---- Conv2d #1 (Cin=1) + ReLU: thin im2col glue + row-tiled Pallas matmul ----
    xp = jnp.pad(x, ((0, 0), (pad, pad), (pad, pad)))
    taps = [xp[:, di:di + stride * T1:stride, dj:dj + stride * F1:stride]
            for di in range(k) for dj in range(k)]
    p1 = jnp.stack(taps, axis=-1).reshape(B * T1 * F1, k * k)
    w1 = p["c1_w"].reshape(C, k * k).T                                 # (9, C)
    M1 = B * T1 * F1
    TM = M1 // 2 if M1 % 16 == 0 else M1                               # >=2 parallel steps (v7x)
    y1 = pl.pallas_call(
        _conv1_kernel,
        out_shape=jax.ShapeDtypeStruct((M1, C), jnp.float32),
        grid=(M1 // TM,),
        in_specs=[pl.BlockSpec((TM, k * k), lambda i: (i, 0)),
                  _rep_spec((k * k, C)), _rep_spec((1, C))],
        out_specs=pl.BlockSpec((TM, C), lambda i: (i, 0)),
        compiler_params=pltpu.CompilerParams(dimension_semantics=("parallel",)),
    )(p1, w1, p["c1_b"].reshape(1, C))
    y1 = y1.reshape(B, T1, F1, C)

    # ---- Conv2d #2 + ReLU + final Linear fused (frequency reduction grid) ----
    yp = jnp.pad(y1, ((0, 0), (pad, pad), (pad, pad), (0, 0)))
    taps = [yp[:, di:di + stride * T2:stride, dj:dj + stride * F2:stride, :]
            for di in range(k) for dj in range(k)]
    p2 = jnp.stack(taps, axis=-1).reshape(B, T2, F2, C * k * k)        # cols ordered (cin, kh, kw)
    p2 = p2.transpose(2, 0, 1, 3).reshape(F2, B * T2, C * k * k)       # rows grouped by output freq
    w2 = p["c2_w"].reshape(C, C * k * k).T                             # (C*9, C)
    wr = p["out_w"].reshape(C, F2, encoder_dim).transpose(1, 0, 2)     # permute folded into weight
    out = pl.pallas_call(
        _conv2_linear_kernel,
        out_shape=jax.ShapeDtypeStruct((B * T2, encoder_dim), jnp.float32),
        grid=(F2,),
        in_specs=[pl.BlockSpec((None, B * T2, C * k * k), lambda f: (f, 0, 0)),
                  _rep_spec((C * k * k, C)), _rep_spec((1, C)),
                  pl.BlockSpec((None, C, encoder_dim), lambda f: (f, 0, 0)),
                  _rep_spec((1, encoder_dim))],
        out_specs=pl.BlockSpec((B * T2, encoder_dim), lambda f: (0, 0)),
        compiler_params=pltpu.CompilerParams(dimension_semantics=("arbitrary",)),
    )(p2, w2, p["c2_b"].reshape(1, C), wr, p["out_b"].reshape(1, encoder_dim))
    out = out.reshape(B, T2, encoder_dim)

    for _ in range(2):
        lengths = (lengths + 2 * pad - k) // stride + 1
    return out, lengths


# =========================== encoder forward ===========================

def conformer_block(x, p, num_heads):
    x = feed_forward_fused(x, p["ff1"])                                # +0.5*FF fused in-kernel
    x = mhsa_fused(x, p["mhsa"], num_heads)                            # +MHSA fused in-kernel
    x = conv_module_fused(x, p["conv"])                                # +Conv fused in-kernel
    x = feed_forward_fused(x, p["ff2"], final_ln=(p["ln_g"], p["ln_b"]))  # +0.5*FF + final LN fused
    return x


def conformer_encoder(params, inputs, input_lengths):
    x, out_lengths = conv_subsampling(inputs, input_lengths, params["subsample"], ENCODER_DIM)
    # TODO(synk): input_dropout is identity (inference mode).
    for layer_params in params["layers"]:
        x = conformer_block(x, layer_params, NUM_HEADS)
    return x, out_lengths


# =========================== deterministic parameter init ===========================

def init_params(key):
    keys = iter(jax.random.split(key, 256))

    def w(shape, scale=0.02):
        return scale * jax.random.normal(next(keys), shape, jnp.float32)

    def zeros(shape):
        return jnp.zeros(shape, jnp.float32)

    def ones(shape):
        return jnp.ones(shape, jnp.float32)

    D = ENCODER_DIM
    C = ENCODER_DIM
    F_out = INPUT_DIM
    for _ in range(2):
        F_out = (F_out + 2 - 3) // 2 + 1

    subsample = dict(c1_w=w((C, 1, 3, 3)), c1_b=zeros((C,)),
                     c2_w=w((C, C, 3, 3)), c2_b=zeros((C,)),
                     out_w=w((C * F_out, D)), out_b=zeros((D,)))

    def ff():
        return dict(ln_g=ones((D,)), ln_b=zeros((D,)),
                    w1=w((D, D * FF_EXPANSION)), b1=zeros((D * FF_EXPANSION,)),
                    w2=w((D * FF_EXPANSION, D)), b2=zeros((D,)))

    def mhsa():
        dh = D // NUM_HEADS
        return dict(ln_g=ones((D,)), ln_b=zeros((D,)),
                    wq=w((D, D)), bq=zeros((D,)),
                    wk=w((D, D)), bk=zeros((D,)),
                    wv=w((D, D)), bv=zeros((D,)),
                    wpos=w((D, D)),
                    u=w((NUM_HEADS, dh)), v=w((NUM_HEADS, dh)),
                    wo=w((D, D)), bo=zeros((D,)))

    def conv():
        return dict(ln_g=ones((D,)), ln_b=zeros((D,)),
                    pw1_w=w((D, D * CONV_EXPANSION)), pw1_b=zeros((D * CONV_EXPANSION,)),
                    dw_w=w((CONV_KERNEL, D)),
                    bn_g=ones((D,)), bn_b=zeros((D,)),
                    bn_mean=zeros((D,)), bn_var=ones((D,)),
                    pw2_w=w((D, D)), pw2_b=zeros((D,)))

    layers = [dict(ff1=ff(), mhsa=mhsa(), conv=conv(), ff2=ff(),
                   ln_g=ones((D,)), ln_b=zeros((D,)))
              for _ in range(NUM_LAYERS)]
    return dict(subsample=subsample, layers=layers)


# =========================== main ===========================

if __name__ == "__main__":
    key = jax.random.PRNGKey(0)
    pkey, xkey = jax.random.split(key)
    params = init_params(pkey)

    inputs = jax.random.normal(xkey, (BATCH, TIME, INPUT_DIM), jnp.float32)
    input_lengths = jnp.array([TIME, TIME - 4], dtype=jnp.int32)

    encoder = jax.jit(conformer_encoder)
    outputs, output_lengths = encoder(params, inputs, input_lengths)
    outputs = jax.block_until_ready(outputs)
    output_lengths = jax.block_until_ready(output_lengths)

    expected_t = TIME
    for _ in range(2):
        expected_t = (expected_t - 1) // 2 + 1
    assert outputs.shape == (BATCH, expected_t, ENCODER_DIM), outputs.shape
    assert output_lengths.shape == (BATCH,)
    assert bool(jnp.all(jnp.isfinite(outputs)))
    print("KERNEL_OK")
</pallas_src>

<mosaic_0001>
module attributes {stable_mosaic.version = 11 : i64} {
  func.func @_conv1_kernel(%arg0: i32, %arg1: memref<64x9xf32, #tpu.memory_space<vmem>>, %arg2: memref<9x32xf32, #tpu.memory_space<vmem>>, %arg3: memref<1x32xf32, #tpu.memory_space<vmem>>, %arg4: memref<64x32xf32, #tpu.memory_space<vmem>>) attributes {dimension_semantics = [#tpu.dimension_semantics<parallel>], iteration_bounds = array<i64: 2>, scalar_prefetch = 0 : i64, scratch_operands = 0 : i64, tpu.core_type = #tpu.core_type<tc>, window_params = [{transform_indices = @transform_0, window_bounds = array<i64: 64, 9>}, {pipeline_mode = #tpu.pipeline_mode<synchronous>, transform_indices = @transform_1, window_bounds = array<i64: 9, 32>}, {pipeline_mode = #tpu.pipeline_mode<synchronous>, transform_indices = @transform_2, window_bounds = array<i64: 1, 32>}, {transform_indices = @transform_3, window_bounds = array<i64: 64, 32>}]} {
    %c0 = arith.constant 0 : index
    %c0_0 = arith.constant 0 : index
    %0 = vector.load %arg1[%c0, %c0_0] : memref<64x9xf32, #tpu.memory_space<vmem>>, vector<64x9xf32>
    %c0_1 = arith.constant 0 : index
    %c0_2 = arith.constant 0 : index
    %1 = vector.load %arg2[%c0_1, %c0_2] : memref<9x32xf32, #tpu.memory_space<vmem>>, vector<9x32xf32>
    %cst = arith.constant dense<0.000000e+00> : vector<64x32xf32>
    %2 = tpu.matmul %0, %1, %cst {dimension_numbers = #tpu.dot_dimension_numbers<[1], [0], [0], [1], [0, 0, 1, 1], [], []>} : vector<64x9xf32>, vector<9x32xf32>, vector<64x32xf32> -> vector<64x32xf32>
    %c0_3 = arith.constant 0 : index
    %c0_4 = arith.constant 0 : index
    %3 = vector.load %arg3[%c0_3, %c0_4] : memref<1x32xf32, #tpu.memory_space<vmem>>, vector<1x32xf32>
    %4 = vector.broadcast %3 : vector<1x32xf32> to vector<64x32xf32>
    %5 = arith.addf %2, %4 : vector<64x32xf32>
    %cst_5 = arith.constant 0.000000e+00 : f32
    %6 = vector.broadcast %cst_5 : f32 to vector<64x32xf32>
    %7 = arith.maximumf %5, %6 : vector<64x32xf32>
    %c0_6 = arith.constant 0 : index
    %c0_7 = arith.constant 0 : index
    %8 = vector.load %arg4[%c0_6, %c0_7] : memref<64x32xf32, #tpu.memory_space<vmem>>, vector<64x32xf32>
    tpu.vector_store %arg4[%c0_6, %c0_7], %7 {strides = array<i32>} : memref<64x32xf32, #tpu.memory_space<vmem>>, vector<64x32xf32>,
    return
  }
  func.func @transform_0(%arg0: i32) -> (i32, i32) {
    %c0_i32 = arith.constant 0 : i32
    %c0_i32_0 = arith.constant 0 : i32
    return %arg0, %c0_i32 : i32, i32
  }
  func.func @transform_1(%arg0: i32) -> (i32, i32) {
    %c0_i32 = arith.constant 0 : i32
    %c0_i32_0 = arith.constant 0 : i32
    %c0_i32_1 = arith.constant 0 : i32
    return %c0_i32, %c0_i32_0 : i32, i32
  }
  func.func @transform_2(%arg0: i32) -> (i32, i32) {
    %c0_i32 = arith.constant 0 : i32
    %c0_i32_0 = arith.constant 0 : i32
    %c0_i32_1 = arith.constant 0 : i32
    return %c0_i32, %c0_i32_0 : i32, i32
  }
  func.func @transform_3(%arg0: i32) -> (i32, i32) {
    %c0_i32 = arith.constant 0 : i32
    %c0_i32_0 = arith.constant 0 : i32
    return %arg0, %c0_i32 : i32, i32
  }
}

module attributes {stable_mosaic.version = 11 : i64} {
  func.func @_conv2_linear_kernel(%arg0: i32, %arg1: memref<1x8x288xf32, #tpu.memory_space<vmem>>, %arg2: memref<288x32xf32, #tpu.memory_space<vmem>>, %arg3: memref<1x32xf32, #tpu.memory_space<vmem>>, %arg4: memref<1x32x32xf32, #tpu.memory_space<vmem>>, %arg5: memref<1x32xf32, #tpu.memory_space<vmem>>, %arg6: memref<8x32xf32, #tpu.memory_space<vmem>>) attributes {dimension_semantics = [#tpu.dimension_semantics<arbitrary>], iteration_bounds = array<i64: 4>, scalar_prefetch = 0 : i64, scratch_operands = 0 : i64, tpu.core_type = #tpu.core_type<tc>, window_params = [{transform_indices = @transform_0, window_bounds = array<i64: 1, 8, 288>}, {pipeline_mode = #tpu.pipeline_mode<synchronous>, transform_indices = @transform_1, window_bounds = array<i64: 288, 32>}, {pipeline_mode = #tpu.pipeline_mode<synchronous>, transform_indices = @transform_2, window_bounds = array<i64: 1, 32>}, {transform_indices = @transform_3, window_bounds = array<i64: 1, 32, 32>}, {pipeline_mode = #tpu.pipeline_mode<synchronous>, transform_indices = @transform_4, window_bounds = array<i64: 1, 32>}, {pipeline_mode = #tpu.pipeline_mode<synchronous>, transform_indices = @transform_5, window_bounds = array<i64: 8, 32>}]} {
    %c0_i32 = arith.constant 0 : i32
    %0 = arith.cmpi eq, %arg0, %c0_i32 : i32
    %1 = arith.extui %0 : i1 to i32
    %c0_i32_0 = arith.constant 0 : i32
    %2 = arith.cmpi ne, %1, %c0_i32_0 : i32
    scf.if %2 {
      %cst_17 = arith.constant 0.000000e+00 : f32
      %21 = vector.broadcast %cst_17 : f32 to vector<8x32xf32>
      %c0_18 = arith.constant 0 : index
      %c0_19 = arith.constant 0 : index
      %22 = vector.load %arg6[%c0_18, %c0_19] : memref<8x32xf32, #tpu.memory_space<vmem>>, vector<8x32xf32>
      tpu.vector_store %arg6[%c0_18, %c0_19], %21 {strides = array<i32>} : memref<8x32xf32, #tpu.memory_space<vmem>>, vector<8x32xf32>,
    } else {
    }
    %c0 = arith.constant 0 : index
    %c0_1 = arith.constant 0 : index
    %c0_2 = arith.constant 0 : index
    %3 = vector.load %arg1[%c0, %c0_1, %c0_2] : memref<1x8x288xf32, #tpu.memory_space<vmem>>, vector<1x8x288xf32>
    %4 = vector.shape_cast %3 : vector<1x8x288xf32> to vector<8x288xf32>
    %c0_3 = arith.constant 0 : index
    %c0_4 = arith.constant 0 : index
    %5 = vector.load %arg2[%c0_3, %c0_4] : memref<288x32xf32, #tpu.memory_space<vmem>>, vector<288x32xf32>
    %cst = arith.constant dense<0.000000e+00> : vector<8x32xf32>
    %6 = tpu.matmul %4, %5, %cst {dimension_numbers = #tpu.dot_dimension_numbers<[1], [0], [0], [1], [0, 0, 1, 1], [], []>} : vector<8x288xf32>, vector<288x32xf32>, vector<8x32xf32> -> vector<8x32xf32>
    %c0_5 = arith.constant 0 : index
    %c0_6 = arith.constant 0 : index
    %7 = vector.load %arg3[%c0_5, %c0_6] : memref<1x32xf32, #tpu.memory_space<vmem>>, vector<1x32xf32>
    %8 = vector.broadcast %7 : vector<1x32xf32> to vector<8x32xf32>
    %9 = arith.addf %6, %8 : vector<8x32xf32>
    %cst_7 = arith.constant 0.000000e+00 : f32
    %10 = vector.broadcast %cst_7 : f32 to vector<8x32xf32>
    %11 = arith.maximumf %9, %10 : vector<8x32xf32>
    %c0_8 = arith.constant 0 : index
    %c0_9 = arith.constant 0 : index
    %12 = vector.load %arg6[%c0_8, %c0_9] : memref<8x32xf32, #tpu.memory_space<vmem>>, vector<8x32xf32>
    %c0_10 = arith.constant 0 : index
    %c0_11 = arith.constant 0 : index
    %c0_12 = arith.constant 0 : index
    %13 = vector.load %arg4[%c0_10, %c0_11, %c0_12] : memref<1x32x32xf32, #tpu.memory_space<vmem>>, vector<1x32x32xf32>
    %14 = vector.shape_cast %13 : vector<1x32x32xf32> to vector<32x32xf32>
    %cst_13 = arith.constant dense<0.000000e+00> : vector<8x32xf32>
    %15 = tpu.matmul %11, %14, %cst_13 {dimension_numbers = #tpu.dot_dimension_numbers<[1], [0], [0], [1], [0, 0, 1, 1], [], []>} : vector<8x32xf32>, vector<32x32xf32>, vector<8x32xf32> -> vector<8x32xf32>
    %16 = arith.addf %12, %15 : vector<8x32xf32>
    %c0_14 = arith.constant 0 : index
    %c0_15 = arith.constant 0 : index
    %17 = vector.load %arg6[%c0_14, %c0_15] : memref<8x32xf32, #tpu.memory_space<vmem>>, vector<8x32xf32>
    tpu.vector_store %arg6[%c0_14, %c0_15], %16 {strides = array<i32>} : memref<8x32xf32, #tpu.memory_space<vmem>>, vector<8x32xf32>,
    %c3_i32 = arith.constant 3 : i32
    %18 = arith.cmpi eq, %arg0, %c3_i32 : i32
    %19 = arith.extui %18 : i1 to i32
    %c0_i32_16 = arith.constant 0 : i32
    %20 = arith.cmpi ne, %19, %c0_i32_16 : i32
    scf.if %20 {
      %c0_17 = arith.constant 0 : index
      %c0_18 = arith.constant 0 : index
      %21 = vector.load %arg6[%c0_17, %c0_18] : memref<8x32xf32, #tpu.memory_space<vmem>>, vector<8x32xf32>
      %c0_19 = arith.constant 0 : index
      %c0_20 = arith.constant 0 : index
      %22 = vector.load %arg5[%c0_19, %c0_20] : memref<1x32xf32, #tpu.memory_space<vmem>>, vector<1x32xf32>
      %23 = vector.broadcast %22 : vector<1x32xf32> to vector<8x32xf32>
      %24 = arith.addf %21, %23 : vector<8x32xf32>
      %c0_21 = arith.constant 0 : index
      %c0_22 = arith.constant 0 : index
      %25 = vector.load %arg6[%c0_21, %c0_22] : memref<8x32xf32, #tpu.memory_space<vmem>>, vector<8x32xf32>
      tpu.vector_store %arg6[%c0_21, %c0_22], %24 {strides = array<i32>} : memref<8x32xf32, #tpu.memory_space<vmem>>, vector<8x32xf32>,
    } else {
    }
    return
  }
  func.func @transform_0(%arg0: i32) -> (i32, i32, i32) {
    %c0_i32 = arith.constant 0 : i32
    %c0_i32_0 = arith.constant 0 : i32
    %c0_i32_1 = arith.constant 0 : i32
    return %arg0, %c0_i32, %c0_i32_0 : i32, i32, i32
  }
  func.func @transform_1(%arg0: i32) -> (i32, i32) {
    %c0_i32 = arith.constant 0 : i32
    %c0_i32_0 = arith.constant 0 : i32
    %c0_i32_1 = arith.constant 0 : i32
    return %c0_i32, %c0_i32_0 : i32, i32
  }
  func.func @transform_2(%arg0: i32) -> (i32, i32) {
    %c0_i32 = arith.constant 0 : i32
    %c0_i32_0 = arith.constant 0 : i32
    %c0_i32_1 = arith.constant 0 : i32
    return %c0_i32, %c0_i32_0 : i32, i32
  }
  func.func @transform_3(%arg0: i32) -> (i32, i32, i32) {
    %c0_i32 = arith.constant 0 : i32
    %c0_i32_0 = arith.constant 0 : i32
    %c0_i32_1 = arith.constant 0 : i32
    return %arg0, %c0_i32, %c0_i32_0 : i32, i32, i32
  }
  func.func @transform_4(%arg0: i32) -> (i32, i32) {
    %c0_i32 = arith.constant 0 : i32
    %c0_i32_0 = arith.constant 0 : i32
    %c0_i32_1 = arith.constant 0 : i32
    return %c0_i32, %c0_i32_0 : i32, i32
  }
  func.func @transform_5(%arg0: i32) -> (i32, i32) {
    %c0_i32 = arith.constant 0 : i32
    %c0_i32_0 = arith.constant 0 : i32
    %c0_i32_1 = arith.constant 0 : i32
    return %c0_i32, %c0_i32_0 : i32, i32
  }
}

module attributes {stable_mosaic.version = 11 : i64} {
  func.func @_ff_kernel(%arg0: i32, %arg1: memref<1x4x32xf32, #tpu.memory_space<vmem>>, %arg2: memref<1x32xf32, #tpu.memory_space<vmem>>, %arg3: memref<1x32xf32, #tpu.memory_space<vmem>>, %arg4: memref<32x128xf32, #tpu.memory_space<vmem>>, %arg5: memref<1x128xf32, #tpu.memory_space<vmem>>, %arg6: memref<128x32xf32, #tpu.memory_space<vmem>>, %arg7: memref<1x32xf32, #tpu.memory_space<vmem>>, %arg8: memref<1x4x32xf32, #tpu.memory_space<vmem>>) attributes {dimension_semantics = [#tpu.dimension_semantics<parallel>], iteration_bounds = array<i64: 2>, scalar_prefetch = 0 : i64, scratch_operands = 0 : i64, tpu.core_type = #tpu.core_type<tc>, window_params = [{transform_indices = @transform_0, window_bounds = array<i64: 1, 4, 32>}, {pipeline_mode = #tpu.pipeline_mode<synchronous>, transform_indices = @transform_1, window_bounds = array<i64: 1, 32>}, {pipeline_mode = #tpu.pipeline_mode<synchronous>, transform_indices = @transform_2, window_bounds = array<i64: 1, 32>}, {pipeline_mode = #tpu.pipeline_mode<synchronous>, transform_indices = @transform_3, window_bounds = array<i64: 32, 128>}, {pipeline_mode = #tpu.pipeline_mode<synchronous>, transform_indices = @transform_4, window_bounds = array<i64: 1, 128>}, {pipeline_mode = #tpu.pipeline_mode<synchronous>, transform_indices = @transform_5, window_bounds = array<i64: 128, 32>}, {pipeline_mode = #tpu.pipeline_mode<synchronous>, transform_indices = @transform_6, window_bounds = array<i64: 1, 32>}, {transform_indices = @transform_7, window_bounds = array<i64: 1, 4, 32>}]} {
    %c0 = arith.constant 0 : index
    %c0_0 = arith.constant 0 : index
    %c0_1 = arith.constant 0 : index
    %0 = vector.load %arg1[%c0, %c0_0, %c0_1] : memref<1x4x32xf32, #tpu.memory_space<vmem>>, vector<1x4x32xf32>
    %1 = vector.shape_cast %0 : vector<1x4x32xf32> to vector<4x32xf32>
    %c0_2 = arith.constant 0 : index
    %c0_3 = arith.constant 0 : index
    %2 = vector.load %arg2[%c0_2, %c0_3] : memref<1x32xf32, #tpu.memory_space<vmem>>, vector<1x32xf32>
    %c0_4 = arith.constant 0 : index
    %c0_5 = arith.constant 0 : index
    %3 = vector.load %arg3[%c0_4, %c0_5] : memref<1x32xf32, #tpu.memory_space<vmem>>, vector<1x32xf32>
    %cst = arith.constant dense<0.000000e+00> : vector<4xf32>
    %4 = vector.multi_reduction <add>, %1, %cst [1] : vector<4x32xf32> to vector<4xf32>
    %5 = vector.shape_cast %4 : vector<4xf32> to vector<4x1xf32>
    %cst_6 = arith.constant 3.200000e+01 : f32
    %6 = vector.broadcast %cst_6 : f32 to vector<4x1xf32>
    %7 = arith.divf %5, %6 : vector<4x1xf32>
    %8 = vector.broadcast %7 : vector<4x1xf32> to vector<4x32xf32>
    %9 = arith.subf %1, %8 : vector<4x32xf32>
    %10 = arith.mulf %9, %9 : vector<4x32xf32>
    %cst_7 = arith.constant dense<0.000000e+00> : vector<4xf32>
    %11 = vector.multi_reduction <add>, %10, %cst_7 [1] : vector<4x32xf32> to vector<4xf32>
    %12 = vector.shape_cast %11 : vector<4xf32> to vector<4x1xf32>
    %cst_8 = arith.constant 3.200000e+01 : f32
    %13 = vector.broadcast %cst_8 : f32 to vector<4x1xf32>
    %14 = arith.divf %12, %13 : vector<4x1xf32>
    %15 = vector.broadcast %7 : vector<4x1xf32> to vector<4x32xf32>
    %16 = arith.subf %1, %15 : vector<4x32xf32>
    %cst_9 = arith.constant 9.99999974E-6 : f32
    %17 = vector.broadcast %cst_9 : f32 to vector<4x1xf32>
    %18 = arith.addf %14, %17 : vector<4x1xf32>
    %19 = math.rsqrt %18 : vector<4x1xf32>
    %20 = vector.broadcast %19 : vector<4x1xf32> to vector<4x32xf32>
    %21 = arith.mulf %16, %20 : vector<4x32xf32>
    %22 = vector.broadcast %2 : vector<1x32xf32> to vector<4x32xf32>
    %23 = arith.mulf %21, %22 : vector<4x32xf32>
    %24 = vector.broadcast %3 : vector<1x32xf32> to vector<4x32xf32>
    %25 = arith.addf %23, %24 : vector<4x32xf32>
    %c0_10 = arith.constant 0 : index
    %c0_11 = arith.constant 0 : index
    %26 = vector.load %arg4[%c0_10, %c0_11] : memref<32x128xf32, #tpu.memory_space<vmem>>, vector<32x128xf32>
    %cst_12 = arith.constant dense<0.000000e+00> : vector<4x128xf32>
    %27 = tpu.matmul %25, %26, %cst_12 {dimension_numbers = #tpu.dot_dimension_numbers<[1], [0], [0], [1], [0, 0, 1, 1], [], []>} : vector<4x32xf32>, vector<32x128xf32>, vector<4x128xf32> -> vector<4x128xf32>
    %c0_13 = arith.constant 0 : index
    %c0_14 = arith.constant 0 : index
    %28 = vector.load %arg5[%c0_13, %c0_14] : memref<1x128xf32, #tpu.memory_space<vmem>>, vector<1x128xf32>
    %29 = vector.broadcast %28 : vector<1x128xf32> to vector<4x128xf32>
    %30 = arith.addf %27, %29 : vector<4x128xf32>
    %31 = arith.negf %30 : vector<4x128xf32>
    %32 = math.exp %31 : vector<4x128xf32>
    %cst_15 = arith.constant 1.000000e+00 : f32
    %33 = vector.broadcast %cst_15 : f32 to vector<4x128xf32>
    %34 = arith.addf %33, %32 : vector<4x128xf32>
    %35 = arith.divf %33, %34 : vector<4x128xf32>
    %36 = arith.mulf %30, %35 : vector<4x128xf32>
    %c0_16 = arith.constant 0 : index
    %c0_17 = arith.constant 0 : index
    %37 = vector.load %arg6[%c0_16, %c0_17] : memref<128x32xf32, #tpu.memory_space<vmem>>, vector<128x32xf32>
    %cst_18 = arith.constant dense<0.000000e+00> : vector<4x32xf32>
    %38 = tpu.matmul %36, %37, %cst_18 {dimension_numbers = #tpu.dot_dimension_numbers<[1], [0], [0], [1], [0, 0, 1, 1], [], []>} : vector<4x128xf32>, vector<128x32xf32>, vector<4x32xf32> -> vector<4x32xf32>
    %c0_19 = arith.constant 0 : index
    %c0_20 = arith.constant 0 : index
    %39 = vector.load %arg7[%c0_19, %c0_20] : memref<1x32xf32, #tpu.memory_space<vmem>>, vector<1x32xf32>
    %40 = vector.broadcast %39 : vector<1x32xf32> to vector<4x32xf32>
    %41 = arith.addf %38, %40 : vector<4x32xf32>
    %cst_21 = arith.constant 5.000000e-01 : f32
    %42 = vector.broadcast %cst_21 : f32 to vector<4x32xf32>
    %43 = arith.mulf %42, %41 : vector<4x32xf32>
    %44 = arith.addf %1, %43 : vector<4x32xf32>
    %c0_22 = arith.constant 0 : index
    %c0_23 = arith.constant 0 : index
    %c0_24 = arith.constant 0 : index
    %45 = vector.load %arg8[%c0_22, %c0_23, %c0_24] : memref<1x4x32xf32, #tpu.memory_space<vmem>>, vector<1x4x32xf32>
    %46 = vector.shape_cast %45 : vector<1x4x32xf32> to vector<4x32xf32>
    %47 = vector.shape_cast %44 : vector<4x32xf32> to vector<1x4x32xf32>
    tpu.vector_store %arg8[%c0_22, %c0_23, %c0_24], %47 {strides = array<i32>} : memref<1x4x32xf32, #tpu.memory_space<vmem>>, vector<1x4x32xf32>,
    return
  }
  func.func @transform_0(%arg0: i32) -> (i32, i32, i32) {
    %c0_i32 = arith.constant 0 : i32
    %c0_i32_0 = arith.constant 0 : i32
    %c0_i32_1 = arith.constant 0 : i32
    return %arg0, %c0_i32, %c0_i32_0 : i32, i32, i32
  }
  func.func @transform_1(%arg0: i32) -> (i32, i32) {
    %c0_i32 = arith.constant 0 : i32
    %c0_i32_0 = arith.constant 0 : i32
    %c0_i32_1 = arith.constant 0 : i32
    return %c0_i32, %c0_i32_0 : i32, i32
  }
  func.func @transform_2(%arg0: i32) -> (i32, i32) {
    %c0_i32 = arith.constant 0 : i32
    %c0_i32_0 = arith.constant 0 : i32
    %c0_i32_1 = arith.constant 0 : i32
    return %c0_i32, %c0_i32_0 : i32, i32
  }
  func.func @transform_3(%arg0: i32) -> (i32, i32) {
    %c0_i32 = arith.constant 0 : i32
    %c0_i32_0 = arith.constant 0 : i32
    %c0_i32_1 = arith.constant 0 : i32
    return %c0_i32, %c0_i32_0 : i32, i32
  }
  func.func @transform_4(%arg0: i32) -> (i32, i32) {
    %c0_i32 = arith.constant 0 : i32
    %c0_i32_0 = arith.constant 0 : i32
    %c0_i32_1 = arith.constant 0 : i32
    return %c0_i32, %c0_i32_0 : i32, i32
  }
  func.func @transform_5(%arg0: i32) -> (i32, i32) {
    %c0_i32 = arith.constant 0 : i32
    %c0_i32_0 = arith.constant 0 : i32
    %c0_i32_1 = arith.constant 0 : i32
    return %c0_i32, %c0_i32_0 : i32, i32
  }
  func.func @transform_6(%arg0: i32) -> (i32, i32) {
    %c0_i32 = arith.constant 0 : i32
    %c0_i32_0 = arith.constant 0 : i32
    %c0_i32_1 = arith.constant 0 : i32
    return %c0_i32, %c0_i32_0 : i32, i32
  }
  func.func @transform_7(%arg0: i32) -> (i32, i32, i32) {
    %c0_i32 = arith.constant 0 : i32
    %c0_i32_0 = arith.constant 0 : i32
    %c0_i32_1 = arith.constant 0 : i32
    return %arg0, %c0_i32, %c0_i32_0 : i32, i32, i32
  }
}

module attributes {stable_mosaic.version = 11 : i64} {
  func.func @kernel(%arg0: i32, %arg1: memref<1x4x32xf32, #tpu.memory_space<vmem>>, %arg2: memref<1x32xf32, #tpu.memory_space<vmem>>, %arg3: memref<1x32xf32, #tpu.memory_space<vmem>>, %arg4: memref<32x96xf32, #tpu.memory_space<vmem>>, %arg5: memref<1x96xf32, #tpu.memory_space<vmem>>, %arg6: memref<4x32xf32, #tpu.memory_space<vmem>>, %arg7: memref<32x32xf32, #tpu.memory_space<vmem>>, %arg8: memref<4x8xf32, #tpu.memory_space<vmem>>, %arg9: memref<4x8xf32, #tpu.memory_space<vmem>>, %arg10: memref<32x32xf32, #tpu.memory_space<vmem>>, %arg11: memref<1x32xf32, #tpu.memory_space<vmem>>, %arg12: memref<1x4x32xf32, #tpu.memory_space<vmem>>) attributes {dimension_semantics = [#tpu.dimension_semantics<parallel>], iteration_bounds = array<i64: 2>, scalar_prefetch = 0 : i64, scratch_operands = 0 : i64, tpu.core_type = #tpu.core_type<tc>, window_params = [{transform_indices = @transform_0, window_bounds = array<i64: 1, 4, 32>}, {pipeline_mode = #tpu.pipeline_mode<synchronous>, transform_indices = @transform_1, window_bounds = array<i64: 1, 32>}, {pipeline_mode = #tpu.pipeline_mode<synchronous>, transform_indices = @transform_2, window_bounds = array<i64: 1, 32>}, {pipeline_mode = #tpu.pipeline_mode<synchronous>, transform_indices = @transform_3, window_bounds = array<i64: 32, 96>}, {pipeline_mode = #tpu.pipeline_mode<synchronous>, transform_indices = @transform_4, window_bounds = array<i64: 1, 96>}, {pipeline_mode = #tpu.pipeline_mode<synchronous>, transform_indices = @transform_5, window_bounds = array<i64: 4, 32>}, {pipeline_mode = #tpu.pipeline_mode<synchronous>, transform_indices = @transform_6, window_bounds = array<i64: 32, 32>}, {pipeline_mode = #tpu.pipeline_mode<synchronous>, transform_indices = @transform_7, window_bounds = array<i64: 4, 8>}, {pipeline_mode = #tpu.pipeline_mode<synchronous>, transform_indices = @transform_8, window_bounds = array<i64: 4, 8>}, {pipeline_mode = #tpu.pipeline_mode<synchronous>, transform_indices = @transform_9, window_bounds = array<i64: 32, 32>}, {pipeline_mode = #tpu.pipeline_mode<synchronous>, transform_indices = @transform_10, window_bounds = array<i64: 1, 32>}, {transform_indices = @transform_11, window_bounds = array<i64: 1, 4, 32>}]} {
    %c0 = arith.constant 0 : index
    %c0_0 = arith.constant 0 : index
    %c0_1 = arith.constant 0 : index
    %0 = vector.load %arg1[%c0, %c0_0, %c0_1] : memref<1x4x32xf32, #tpu.memory_space<vmem>>, vector<1x4x32xf32>
    %1 = vector.shape_cast %0 : vector<1x4x32xf32> to vector<4x32xf32>
    %c0_2 = arith.constant 0 : index
    %c0_3 = arith.constant 0 : index
    %2 = vector.load %arg2[%c0_2, %c0_3] : memref<1x32xf32, #tpu.memory_space<vmem>>, vector<1x32xf32>
    %c0_4 = arith.constant 0 : index
    %c0_5 = arith.constant 0 : index
    %3 = vector.load %arg3[%c0_4, %c0_5] : memref<1x32xf32, #tpu.memory_space<vmem>>, vector<1x32xf32>
    %cst = arith.constant dense<0.000000e+00> : vector<4xf32>
    %4 = vector.multi_reduction <add>, %1, %cst [1] : vector<4x32xf32> to vector<4xf32>
    %5 = vector.shape_cast %4 : vector<4xf32> to vector<4x1xf32>
    %cst_6 = arith.constant 3.200000e+01 : f32
    %6 = vector.broadcast %cst_6 : f32 to vector<4x1xf32>
    %7 = arith.divf %5, %6 : vector<4x1xf32>
    %8 = vector.broadcast %7 : vector<4x1xf32> to vector<4x32xf32>
    %9 = arith.subf %1, %8 : vector<4x32xf32>
    %10 = arith.mulf %9, %9 : vector<4x32xf32>
    %cst_7 = arith.constant dense<0.000000e+00> : vector<4xf32>
    %11 = vector.multi_reduction <add>, %10, %cst_7 [1] : vector<4x32xf32> to vector<4xf32>
    %12 = vector.shape_cast %11 : vector<4xf32> to vector<4x1xf32>
    %cst_8 = arith.constant 3.200000e+01 : f32
    %13 = vector.broadcast %cst_8 : f32 to vector<4x1xf32>
    %14 = arith.divf %12, %13 : vector<4x1xf32>
    %15 = vector.broadcast %7 : vector<4x1xf32> to vector<4x32xf32>
    %16 = arith.subf %1, %15 : vector<4x32xf32>
    %cst_9 = arith.constant 9.99999974E-6 : f32
    %17 = vector.broadcast %cst_9 : f32 to vector<4x1xf32>
    %18 = arith.addf %14, %17 : vector<4x1xf32>
    %19 = math.rsqrt %18 : vector<4x1xf32>
    %20 = vector.broadcast %19 : vector<4x1xf32> to vector<4x32xf32>
    %21 = arith.mulf %16, %20 : vector<4x32xf32>
    %22 = vector.broadcast %2 : vector<1x32xf32> to vector<4x32xf32>
    %23 = arith.mulf %21, %22 : vector<4x32xf32>
    %24 = vector.broadcast %3 : vector<1x32xf32> to vector<4x32xf32>
    %25 = arith.addf %23, %24 : vector<4x32xf32>
    %c0_10 = arith.constant 0 : index
    %c0_11 = arith.constant 0 : index
    %26 = vector.load %arg4[%c0_10, %c0_11] : memref<32x96xf32, #tpu.memory_space<vmem>>, vector<32x96xf32>
    %cst_12 = arith.constant dense<0.000000e+00> : vector<4x96xf32>
    %27 = tpu.matmul %25, %26, %cst_12 {dimension_numbers = #tpu.dot_dimension_numbers<[1], [0], [0], [1], [0, 0, 1, 1], [], []>} : vector<4x32xf32>, vector<32x96xf32>, vector<4x96xf32> -> vector<4x96xf32>
    %c0_13 = arith.constant 0 : index
    %c0_14 = arith.constant 0 : index
    %28 = vector.load %arg5[%c0_13, %c0_14] : memref<1x96xf32, #tpu.memory_space<vmem>>, vector<1x96xf32>
    %29 = vector.broadcast %28 : vector<1x96xf32> to vector<4x96xf32>
    %30 = arith.addf %27, %29 : vector<4x96xf32>
    %c0_15 = arith.constant 0 : index
    %c0_16 = arith.constant 0 : index
    %31 = vector.load %arg6[%c0_15, %c0_16] : memref<4x32xf32, #tpu.memory_space<vmem>>, vector<4x32xf32>
    %c0_17 = arith.constant 0 : index
    %c0_18 = arith.constant 0 : index
    %32 = vector.load %arg7[%c0_17, %c0_18] : memref<32x32xf32, #tpu.memory_space<vmem>>, vector<32x32xf32>
    %cst_19 = arith.constant dense<0.000000e+00> : vector<4x32xf32>
    %33 = tpu.matmul %31, %32, %cst_19 {dimension_numbers = #tpu.dot_dimension_numbers<[1], [0], [0], [1], [0, 0, 1, 1], [], []>} : vector<4x32xf32>, vector<32x32xf32>, vector<4x32xf32> -> vector<4x32xf32>
    %34 = tpu.iota {dimensions = array<i32: 0>} : vector<4x4xi32>
    %35 = tpu.iota {dimensions = array<i32: 1>} : vector<4x4xi32>
    %c0_i32 = arith.constant 0 : i32
    %36 = vector.broadcast %c0_i32 : i32 to vector<4x4xi32>
    %37 = arith.cmpi sle, %35, %36 : vector<4x4xi32>
    %c3_i32 = arith.constant 3 : i32
    %38 = vector.broadcast %c3_i32 : i32 to vector<4x4xi32>
    %39 = arith.addi %35, %38 : vector<4x4xi32>
    %40 = arith.cmpi eq, %34, %39 : vector<4x4xi32>
    %41 = arith.andi %37, %40 : vector<4x4xi1>
    %42 = arith.extui %41 : vector<4x4xi1> to vector<4x4xi32>
    %43 = arith.sitofp %42 : vector<4x4xi32> to vector<4x4xf32>
    %c1_i32 = arith.constant 1 : i32
    %44 = vector.broadcast %c1_i32 : i32 to vector<4x4xi32>
    %45 = arith.cmpi sle, %35, %44 : vector<4x4xi32>
    %c2_i32 = arith.constant 2 : i32
    %46 = vector.broadcast %c2_i32 : i32 to vector<4x4xi32>
    %47 = arith.addi %35, %46 : vector<4x4xi32>
    %48 = arith.cmpi eq, %34, %47 : vector<4x4xi32>
    %49 = arith.andi %45, %48 : vector<4x4xi1>
    %50 = arith.extui %49 : vector<4x4xi1> to vector<4x4xi32>
    %51 = arith.sitofp %50 : vector<4x4xi32> to vector<4x4xf32>
    %c2_i32_20 = arith.constant 2 : i32
    %52 = vector.broadcast %c2_i32_20 : i32 to vector<4x4xi32>
    %53 = arith.cmpi sle, %35, %52 : vector<4x4xi32>
    %c1_i32_21 = arith.constant 1 : i32
    %54 = vector.broadcast %c1_i32_21 : i32 to vector<4x4xi32>
    %55 = arith.addi %35, %54 : vector<4x4xi32>
    %56 = arith.cmpi eq, %34, %55 : vector<4x4xi32>
    %57 = arith.andi %53, %56 : vector<4x4xi1>
    %58 = arith.extui %57 : vector<4x4xi1> to vector<4x4xi32>
    %59 = arith.sitofp %58 : vector<4x4xi32> to vector<4x4xf32>
    %c3_i32_22 = arith.constant 3 : i32
    %60 = vector.broadcast %c3_i32_22 : i32 to vector<4x4xi32>
    %61 = arith.cmpi sle, %35, %60 : vector<4x4xi32>
    %c0_i32_23 = arith.constant 0 : i32
    %62 = vector.broadcast %c0_i32_23 : i32 to vector<4x4xi32>
    %63 = arith.addi %35, %62 : vector<4x4xi32>
    %64 = arith.cmpi eq, %34, %63 : vector<4x4xi32>
    %65 = arith.andi %61, %64 : vector<4x4xi1>
    %66 = arith.extui %65 : vector<4x4xi1> to vector<4x4xi32>
    %67 = arith.sitofp %66 : vector<4x4xi32> to vector<4x4xf32>
    %c2_i32_24 = arith.constant 2 : i32
    %68 = vector.broadcast %c2_i32_24 : i32 to vector<4x4xi32>
    %69 = arith.cmpi sge, %35, %68 : vector<4x4xi32>
    %c2_i32_25 = arith.constant 2 : i32
    %70 = vector.broadcast %c2_i32_25 : i32 to vector<4x4xi32>
    %71 = arith.subi %35, %70 : vector<4x4xi32>
    %72 = arith.cmpi eq, %34, %71 : vector<4x4xi32>
    %73 = arith.andi %69, %72 : vector<4x4xi1>
    %74 = arith.extui %73 : vector<4x4xi1> to vector<4x4xi32>
    %75 = arith.sitofp %74 : vector<4x4xi32> to vector<4x4xf32>
    %c3_i32_26 = arith.constant 3 : i32
    %76 = vector.broadcast %c3_i32_26 : i32 to vector<4x4xi32>
    %77 = arith.cmpi sge, %35, %76 : vector<4x4xi32>
    %c3_i32_27 = arith.constant 3 : i32
    %78 = vector.broadcast %c3_i32_27 : i32 to vector<4x4xi32>
    %79 = arith.subi %35, %78 : vector<4x4xi32>
    %80 = arith.cmpi eq, %34, %79 : vector<4x4xi32>
    %81 = arith.andi %77, %80 : vector<4x4xi1>
    %82 = arith.extui %81 : vector<4x4xi1> to vector<4x4xi32>
    %83 = arith.sitofp %82 : vector<4x4xi32> to vector<4x4xf32>
    %c0_i32_28 = arith.constant 0 : i32
    %84 = vector.broadcast %c0_i32_28 : i32 to vector<4x4xi32>
    %85 = arith.cmpi eq, %34, %84 : vector<4x4xi32>
    %c1_i32_29 = arith.constant 1 : i32
    %86 = vector.broadcast %c1_i32_29 : i32 to vector<4x4xi32>
    %87 = arith.cmpi eq, %34, %86 : vector<4x4xi32>
    %c2_i32_30 = arith.constant 2 : i32
    %88 = vector.broadcast %c2_i32_30 : i32 to vector<4x4xi32>
    %89 = arith.cmpi eq, %34, %88 : vector<4x4xi32>
    %c3_i32_31 = arith.constant 3 : i32
    %90 = vector.broadcast %c3_i32_31 : i32 to vector<4x4xi32>
    %91 = arith.cmpi eq, %34, %90 : vector<4x4xi32>
    %cst_32 = arith.constant 0.000000e+00 : f32
    %92 = vector.broadcast %cst_32 : f32 to vector<4x32xf32>
    %93 = vector.extract_strided_slice %30 {offsets = [0, 0], sizes = [4, 8], strides = [1, 1]} : vector<4x96xf32> to vector<4x8xf32>
    %94 = vector.extract_strided_slice %30 {offsets = [0, 32], sizes = [4, 8], strides = [1, 1]} : vector<4x96xf32> to vector<4x8xf32>
    %95 = vector.extract_strided_slice %30 {offsets = [0, 64], sizes = [4, 8], strides = [1, 1]} : vector<4x96xf32> to vector<4x8xf32>
    %96 = vector.extract_strided_slice %33 {offsets = [0, 0], sizes = [4, 8], strides = [1, 1]} : vector<4x32xf32> to vector<4x8xf32>
    %c0_33 = arith.constant 0 : index
    %c0_34 = arith.constant 0 : index
    %97 = vector.load %arg8[%c0_33, %c0_34] : memref<4x8xf32, #tpu.memory_space<vmem>>, vector<1x8xf32>
    %98 = vector.broadcast %97 : vector<1x8xf32> to vector<4x8xf32>
    %99 = arith.addf %93, %98 : vector<4x8xf32>
    %c0_35 = arith.constant 0 : index
    %c0_36 = arith.constant 0 : index
    %100 = vector.load %arg9[%c0_35, %c0_36] : memref<4x8xf32, #tpu.memory_space<vmem>>, vector<1x8xf32>
    %101 = vector.broadcast %100 : vector<1x8xf32> to vector<4x8xf32>
    %102 = arith.addf %93, %101 : vector<4x8xf32>
    %cst_37 = arith.constant dense<0.000000e+00> : vector<4x4xf32>
    %103 = tpu.matmul %99, %94, %cst_37 {dimension_numbers = #tpu.dot_dimension_numbers<[1], [1], [0], [0], [0, 0, 1, 0], [], []>} : vector<4x8xf32>, vector<4x8xf32>, vector<4x4xf32> -> vector<4x4xf32>
    %cst_38 = arith.constant dense<0.000000e+00> : vector<4x4xf32>
    %104 = tpu.matmul %102, %96, %cst_38 {dimension_numbers = #tpu.dot_dimension_numbers<[1], [1], [0], [0], [0, 0, 1, 0], [], []>} : vector<4x8xf32>, vector<4x8xf32>, vector<4x4xf32> -> vector<4x4xf32>
    %cst_39 = arith.constant 0.000000e+00 : f32
    %105 = vector.broadcast %cst_39 : f32 to vector<4x4xf32>
    %106 = vector.extract_strided_slice %104 {offsets = [0, 0], sizes = [1, 4], strides = [1, 1]} : vector<4x4xf32> to vector<1x4xf32>
    %cst_40 = arith.constant dense<0.000000e+00> : vector<1x4xf32>
    %107 = tpu.matmul %106, %43, %cst_40 {dimension_numbers = #tpu.dot_dimension_numbers<[1], [0], [0], [1], [0, 0, 1, 1], [], []>} : vector<1x4xf32>, vector<4x4xf32>, vector<1x4xf32> -> vector<1x4xf32>
    %108 = vector.extract_strided_slice %104 {offsets = [1, 0], sizes = [1, 4], strides = [1, 1]} : vector<4x4xf32> to vector<1x4xf32>
    %cst_41 = arith.constant dense<0.000000e+00> : vector<1x4xf32>
    %109 = tpu.matmul %108, %75, %cst_41 {dimension_numbers = #tpu.dot_dimension_numbers<[1], [0], [0], [1], [0, 0, 1, 1], [], []>} : vector<1x4xf32>, vector<4x4xf32>, vector<1x4xf32> -> vector<1x4xf32>
    %110 = arith.addf %107, %109 : vector<1x4xf32>
    %cst_42 = arith.constant 0.000000e+00 : f32
    %111 = vector.shape_cast %110 : vector<1x4xf32> to vector<1x4xf32>
    %112 = vector.broadcast %111 : vector<1x4xf32> to vector<4x4xf32>
    %113 = vector.broadcast %cst_42 : f32 to vector<4x4xf32>
    %114 = arith.select %85, %112, %113 : vector<4x4xi1>, vector<4x4xf32>
    %115 = arith.addf %105, %114 : vector<4x4xf32>
    %116 = vector.extract_strided_slice %104 {offsets = [1, 0], sizes = [1, 4], strides = [1, 1]} : vector<4x4xf32> to vector<1x4xf32>
    %cst_43 = arith.constant dense<0.000000e+00> : vector<1x4xf32>
    %117 = tpu.matmul %116, %51, %cst_43 {dimension_numbers = #tpu.dot_dimension_numbers<[1], [0], [0], [1], [0, 0, 1, 1], [], []>} : vector<1x4xf32>, vector<4x4xf32>, vector<1x4xf32> -> vector<1x4xf32>
    %118 = vector.extract_strided_slice %104 {offsets = [2, 0], sizes = [1, 4], strides = [1, 1]} : vector<4x4xf32> to vector<1x4xf32>
    %cst_44 = arith.constant dense<0.000000e+00> : vector<1x4xf32>
    %119 = tpu.matmul %118, %83, %cst_44 {dimension_numbers = #tpu.dot_dimension_numbers<[1], [0], [0], [1], [0, 0, 1, 1], [], []>} : vector<1x4xf32>, vector<4x4xf32>, vector<1x4xf32> -> vector<1x4xf32>
    %120 = arith.addf %117, %119 : vector<1x4xf32>
    %cst_45 = arith.constant 0.000000e+00 : f32
    %121 = vector.shape_cast %120 : vector<1x4xf32> to vector<1x4xf32>
    %122 = vector.broadcast %121 : vector<1x4xf32> to vector<4x4xf32>
    %123 = vector.broadcast %cst_45 : f32 to vector<4x4xf32>
    %124 = arith.select %87, %122, %123 : vector<4x4xi1>, vector<4x4xf32>
    %125 = arith.addf %115, %124 : vector<4x4xf32>
    %126 = vector.extract_strided_slice %104 {offsets = [2, 0], sizes = [1, 4], strides = [1, 1]} : vector<4x4xf32> to vector<1x4xf32>
    %cst_46 = arith.constant dense<0.000000e+00> : vector<1x4xf32>
    %127 = tpu.matmul %126, %59, %cst_46 {dimension_numbers = #tpu.dot_dimension_numbers<[1], [0], [0], [1], [0, 0, 1, 1], [], []>} : vector<1x4xf32>, vector<4x4xf32>, vector<1x4xf32> -> vector<1x4xf32>
    %cst_47 = arith.constant 0.000000e+00 : f32
    %128 = vector.shape_cast %127 : vector<1x4xf32> to vector<1x4xf32>
    %129 = vector.broadcast %128 : vector<1x4xf32> to vector<4x4xf32>
    %130 = vector.broadcast %cst_47 : f32 to vector<4x4xf32>
    %131 = arith.select %89, %129, %130 : vector<4x4xi1>, vector<4x4xf32>
    %132 = arith.addf %125, %131 : vector<4x4xf32>
    %133 = vector.extract_strided_slice %104 {offsets = [3, 0], sizes = [1, 4], strides = [1, 1]} : vector<4x4xf32> to vector<1x4xf32>
    %cst_48 = arith.constant dense<0.000000e+00> : vector<1x4xf32>
    %134 = tpu.matmul %133, %67, %cst_48 {dimension_numbers = #tpu.dot_dimension_numbers<[1], [0], [0], [1], [0, 0, 1, 1], [], []>} : vector<1x4xf32>, vector<4x4xf32>, vector<1x4xf32> -> vector<1x4xf32>
    %cst_49 = arith.constant 0.000000e+00 : f32
    %135 = vector.shape_cast %134 : vector<1x4xf32> to vector<1x4xf32>
    %136 = vector.broadcast %135 : vector<1x4xf32> to vector<4x4xf32>
    %137 = vector.broadcast %cst_49 : f32 to vector<4x4xf32>
    %138 = arith.select %91, %136, %137 : vector<4x4xi1>, vector<4x4xf32>
    %139 = arith.addf %132, %138 : vector<4x4xf32>
    %140 = arith.addf %103, %139 : vector<4x4xf32>
    %cst_50 = arith.constant 0.176776692 : f32
    %141 = vector.broadcast %cst_50 : f32 to vector<4x4xf32>
    %142 = arith.mulf %140, %141 : vector<4x4xf32>
    %cst_51 = arith.constant dense<0xFF800000> : vector<4xf32>
    %143 = vector.multi_reduction <maximumf>, %142, %cst_51 [1] : vector<4x4xf32> to vector<4xf32>
    %144 = vector.shape_cast %143 : vector<4xf32> to vector<4x1xf32>
    %145 = vector.broadcast %144 : vector<4x1xf32> to vector<4x4xf32>
    %146 = arith.subf %142, %145 : vector<4x4xf32>
    %147 = math.exp %146 : vector<4x4xf32>
    %cst_52 = arith.constant dense<0.000000e+00> : vector<4xf32>
    %148 = vector.multi_reduction <add>, %147, %cst_52 [1] : vector<4x4xf32> to vector<4xf32>
    %149 = vector.shape_cast %148 : vector<4xf32> to vector<4x1xf32>
    %150 = tpu.reciprocal %149 {approx = true} : vector<4x1xf32> -> vector<4x1xf32>
    %151 = vector.broadcast %150 : vector<4x1xf32> to vector<4x4xf32>
    %152 = arith.mulf %147, %151 : vector<4x4xf32>
    %cst_53 = arith.constant dense<0.000000e+00> : vector<4x8xf32>
    %153 = tpu.matmul %152, %95, %cst_53 {dimension_numbers = #tpu.dot_dimension_numbers<[1], [0], [0], [1], [0, 0, 1, 1], [], []>} : vector<4x4xf32>, vector<4x8xf32>, vector<4x8xf32> -> vector<4x8xf32>
    %c0_54 = arith.constant 0 : index
    %c0_55 = arith.constant 0 : index
    %154 = vector.load %arg10[%c0_54, %c0_55] : memref<32x32xf32, #tpu.memory_space<vmem>>, vector<8x32xf32>
    %cst_56 = arith.constant dense<0.000000e+00> : vector<4x32xf32>
    %155 = tpu.matmul %153, %154, %cst_56 {dimension_numbers = #tpu.dot_dimension_numbers<[1], [0], [0], [1], [0, 0, 1, 1], [], []>} : vector<4x8xf32>, vector<8x32xf32>, vector<4x32xf32> -> vector<4x32xf32>
    %156 = arith.addf %92, %155 : vector<4x32xf32>
    %157 = vector.extract_strided_slice %30 {offsets = [0, 8], sizes = [4, 8], strides = [1, 1]} : vector<4x96xf32> to vector<4x8xf32>
    %158 = vector.extract_strided_slice %30 {offsets = [0, 40], sizes = [4, 8], strides = [1, 1]} : vector<4x96xf32> to vector<4x8xf32>
    %159 = vector.extract_strided_slice %30 {offsets = [0, 72], sizes = [4, 8], strides = [1, 1]} : vector<4x96xf32> to vector<4x8xf32>
    %160 = vector.extract_strided_slice %33 {offsets = [0, 8], sizes = [4, 8], strides = [1, 1]} : vector<4x32xf32> to vector<4x8xf32>
    %c1 = arith.constant 1 : index
    %c0_57 = arith.constant 0 : index
    %161 = vector.load %arg8[%c1, %c0_57] : memref<4x8xf32, #tpu.memory_space<vmem>>, vector<1x8xf32>
    %162 = vector.broadcast %161 : vector<1x8xf32> to vector<4x8xf32>
    %163 = arith.addf %157, %162 : vector<4x8xf32>
    %c1_58 = arith.constant 1 : index
    %c0_59 = arith.constant 0 : index
    %164 = vector.load %arg9[%c1_58, %c0_59] : memref<4x8xf32, #tpu.memory_space<vmem>>, vector<1x8xf32>
    %165 = vector.broadcast %164 : vector<1x8xf32> to vector<4x8xf32>
    %166 = arith.addf %157, %165 : vector<4x8xf32>
    %cst_60 = arith.constant dense<0.000000e+00> : vector<4x4xf32>
    %167 = tpu.matmul %163, %158, %cst_60 {dimension_numbers = #tpu.dot_dimension_numbers<[1], [1], [0], [0], [0, 0, 1, 0], [], []>} : vector<4x8xf32>, vector<4x8xf32>, vector<4x4xf32> -> vector<4x4xf32>
    %cst_61 = arith.constant dense<0.000000e+00> : vector<4x4xf32>
    %168 = tpu.matmul %166, %160, %cst_61 {dimension_numbers = #tpu.dot_dimension_numbers<[1], [1], [0], [0], [0, 0, 1, 0], [], []>} : vector<4x8xf32>, vector<4x8xf32>, vector<4x4xf32> -> vector<4x4xf32>
    %cst_62 = arith.constant 0.000000e+00 : f32
    %169 = vector.broadcast %cst_62 : f32 to vector<4x4xf32>
    %170 = vector.extract_strided_slice %168 {offsets = [0, 0], sizes = [1, 4], strides = [1, 1]} : vector<4x4xf32> to vector<1x4xf32>
    %cst_63 = arith.constant dense<0.000000e+00> : vector<1x4xf32>
    %171 = tpu.matmul %170, %43, %cst_63 {dimension_numbers = #tpu.dot_dimension_numbers<[1], [0], [0], [1], [0, 0, 1, 1], [], []>} : vector<1x4xf32>, vector<4x4xf32>, vector<1x4xf32> -> vector<1x4xf32>
    %172 = vector.extract_strided_slice %168 {offsets = [1, 0], sizes = [1, 4], strides = [1, 1]} : vector<4x4xf32> to vector<1x4xf32>
    %cst_64 = arith.constant dense<0.000000e+00> : vector<1x4xf32>
    %173 = tpu.matmul %172, %75, %cst_64 {dimension_numbers = #tpu.dot_dimension_numbers<[1], [0], [0], [1], [0, 0, 1, 1], [], []>} : vector<1x4xf32>, vector<4x4xf32>, vector<1x4xf32> -> vector<1x4xf32>
    %174 = arith.addf %171, %173 : vector<1x4xf32>
    %cst_65 = arith.constant 0.000000e+00 : f32
    %175 = vector.shape_cast %174 : vector<1x4xf32> to vector<1x4xf32>
    %176 = vector.broadcast %175 : vector<1x4xf32> to vector<4x4xf32>
    %177 = vector.broadcast %cst_65 : f32 to vector<4x4xf32>
    %178 = arith.select %85, %176, %177 : vector<4x4xi1>, vector<4x4xf32>
    %179 = arith.addf %169, %178 : vector<4x4xf32>
    %180 = vector.extract_strided_slice %168 {offsets = [1, 0], sizes = [1, 4], strides = [1, 1]} : vector<4x4xf32> to vector<1x4xf32>
    %cst_66 = arith.constant dense<0.000000e+00> : vector<1x4xf32>
    %181 = tpu.matmul %180, %51, %cst_66 {dimension_numbers = #tpu.dot_dimension_numbers<[1], [0], [0], [1], [0, 0, 1, 1], [], []>} : vector<1x4xf32>, vector<4x4xf32>, vector<1x4xf32> -> vector<1x4xf32>
    %182 = vector.extract_strided_slice %168 {offsets = [2, 0], sizes = [1, 4], strides = [1, 1]} : vector<4x4xf32> to vector<1x4xf32>
    %cst_67 = arith.constant dense<0.000000e+00> : vector<1x4xf32>
    %183 = tpu.matmul %182, %83, %cst_67 {dimension_numbers = #tpu.dot_dimension_numbers<[1], [0], [0], [1], [0, 0, 1, 1], [], []>} : vector<1x4xf32>, vector<4x4xf32>, vector<1x4xf32> -> vector<1x4xf32>
    %184 = arith.addf %181, %183 : vector<1x4xf32>
    %cst_68 = arith.constant 0.000000e+00 : f32
    %185 = vector.shape_cast %184 : vector<1x4xf32> to vector<1x4xf32>
    %186 = vector.broadcast %185 : vector<1x4xf32> to vector<4x4xf32>
    %187 = vector.broadcast %cst_68 : f32 to vector<4x4xf32>
    %188 = arith.select %87, %186, %187 : vector<4x4xi1>, vector<4x4xf32>
    %189 = arith.addf %179, %188 : vector<4x4xf32>
    %190 = vector.extract_strided_slice %168 {offsets = [2, 0], sizes = [1, 4], strides = [1, 1]} : vector<4x4xf32> to vector<1x4xf32>
    %cst_69 = arith.constant dense<0.000000e+00> : vector<1x4xf32>
    %191 = tpu.matmul %190, %59, %cst_69 {dimension_numbers = #tpu.dot_dimension_numbers<[1], [0], [0], [1], [0, 0, 1, 1], [], []>} : vector<1x4xf32>, vector<4x4xf32>, vector<1x4xf32> -> vector<1x4xf32>
    %cst_70 = arith.constant 0.000000e+00 : f32
    %192 = vector.shape_cast %191 : vector<1x4xf32> to vector<1x4xf32>
    %193 = vector.broadcast %192 : vector<1x4xf32> to vector<4x4xf32>
    %194 = vector.broadcast %cst_70 : f32 to vector<4x4xf32>
    %195 = arith.select %89, %193, %194 : vector<4x4xi1>, vector<4x4xf32>
    %196 = arith.addf %189, %195 : vector<4x4xf32>
    %197 = vector.extract_strided_slice %168 {offsets = [3, 0], sizes = [1, 4], strides = [1, 1]} : vector<4x4xf32> to vector<1x4xf32>
    %cst_71 = arith.constant dense<0.000000e+00> : vector<1x4xf32>
    %198 = tpu.matmul %197, %67, %cst_71 {dimension_numbers = #tpu.dot_dimension_numbers<[1], [0], [0], [1], [0, 0, 1, 1], [], []>} : vector<1x4xf32>, vector<4x4xf32>, vector<1x4xf32> -> vector<1x4xf32>
    %cst_72 = arith.constant 0.000000e+00 : f32
    %199 = vector.shape_cast %198 : vector<1x4xf32> to vector<1x4xf32>
    %200 = vector.broadcast %199 : vector<1x4xf32> to vector<4x4xf32>
    %201 = vector.broadcast %cst_72 : f32 to vector<4x4xf32>
    %202 = arith.select %91, %200, %201 : vector<4x4xi1>, vector<4x4xf32>
    %203 = arith.addf %196, %202 : vector<4x4xf32>
    %204 = arith.addf %167, %203 : vector<4x4xf32>
    %cst_73 = arith.constant 0.176776692 : f32
    %205 = vector.broadcast %cst_73 : f32 to vector<4x4xf32>
    %206 = arith.mulf %204, %205 : vector<4x4xf32>
    %cst_74 = arith.constant dense<0xFF800000> : vector<4xf32>
    %207 = vector.multi_reduction <maximumf>, %206, %cst_74 [1] : vector<4x4xf32> to vector<4xf32>
    %208 = vector.shape_cast %207 : vector<4xf32> to vector<4x1xf32>
    %209 = vector.broadcast %208 : vector<4x1xf32> to vector<4x4xf32>
    %210 = arith.subf %206, %209 : vector<4x4xf32>
    %211 = math.exp %210 : vector<4x4xf32>
    %cst_75 = arith.constant dense<0.000000e+00> : vector<4xf32>
    %212 = vector.multi_reduction <add>, %211, %cst_75 [1] : vector<4x4xf32> to vector<4xf32>
    %213 = vector.shape_cast %212 : vector<4xf32> to vector<4x1xf32>
    %214 = tpu.reciprocal %213 {approx = true} : vector<4x1xf32> -> vector<4x1xf32>
    %215 = vector.broadcast %214 : vector<4x1xf32> to vector<4x4xf32>
    %216 = arith.mulf %211, %215 : vector<4x4xf32>
    %cst_76 = arith.constant dense<0.000000e+00> : vector<4x8xf32>
    %217 = tpu.matmul %216, %159, %cst_76 {dimension_numbers = #tpu.dot_dimension_numbers<[1], [0], [0], [1], [0, 0, 1, 1], [], []>} : vector<4x4xf32>, vector<4x8xf32>, vector<4x8xf32> -> vector<4x8xf32>
    %c8 = arith.constant 8 : index
    %c0_77 = arith.constant 0 : index
    %218 = vector.load %arg10[%c8, %c0_77] : memref<32x32xf32, #tpu.memory_space<vmem>>, vector<8x32xf32>
    %cst_78 = arith.constant dense<0.000000e+00> : vector<4x32xf32>
    %219 = tpu.matmul %217, %218, %cst_78 {dimension_numbers = #tpu.dot_dimension_numbers<[1], [0], [0], [1], [0, 0, 1, 1], [], []>} : vector<4x8xf32>, vector<8x32xf32>, vector<4x32xf32> -> vector<4x32xf32>
    %220 = arith.addf %156, %219 : vector<4x32xf32>
    %221 = vector.extract_strided_slice %30 {offsets = [0, 16], sizes = [4, 8], strides = [1, 1]} : vector<4x96xf32> to vector<4x8xf32>
    %222 = vector.extract_strided_slice %30 {offsets = [0, 48], sizes = [4, 8], strides = [1, 1]} : vector<4x96xf32> to vector<4x8xf32>
    %223 = vector.extract_strided_slice %30 {offsets = [0, 80], sizes = [4, 8], strides = [1, 1]} : vector<4x96xf32> to vector<4x8xf32>
    %224 = vector.extract_strided_slice %33 {offsets = [0, 16], sizes = [4, 8], strides = [1, 1]} : vector<4x32xf32> to vector<4x8xf32>
    %c2 = arith.constant 2 : index
    %c0_79 = arith.constant 0 : index
    %225 = vector.load %arg8[%c2, %c0_79] : memref<4x8xf32, #tpu.memory_space<vmem>>, vector<1x8xf32>
    %226 = vector.broadcast %225 : vector<1x8xf32> to vector<4x8xf32>
    %227 = arith.addf %221, %226 : vector<4x8xf32>
    %c2_80 = arith.constant 2 : index
    %c0_81 = arith.constant 0 : index
    %228 = vector.load %arg9[%c2_80, %c0_81] : memref<4x8xf32, #tpu.memory_space<vmem>>, vector<1x8xf32>
    %229 = vector.broadcast %228 : vector<1x8xf32> to vector<4x8xf32>
    %230 = arith.addf %221, %229 : vector<4x8xf32>
    %cst_82 = arith.constant dense<0.000000e+00> : vector<4x4xf32>
    %231 = tpu.matmul %227, %222, %cst_82 {dimension_numbers = #tpu.dot_dimension_numbers<[1], [1], [0], [0], [0, 0, 1, 0], [], []>} : vector<4x8xf32>, vector<4x8xf32>, vector<4x4xf32> -> vector<4x4xf32>
    %cst_83 = arith.constant dense<0.000000e+00> : vector<4x4xf32>
    %232 = tpu.matmul %230, %224, %cst_83 {dimension_numbers = #tpu.dot_dimension_numbers<[1], [1], [0], [0], [0, 0, 1, 0], [], []>} : vector<4x8xf32>, vector<4x8xf32>, vector<4x4xf32> -> vector<4x4xf32>
    %cst_84 = arith.constant 0.000000e+00 : f32
    %233 = vector.broadcast %cst_84 : f32 to vector<4x4xf32>
    %234 = vector.extract_strided_slice %232 {offsets = [0, 0], sizes = [1, 4], strides = [1, 1]} : vector<4x4xf32> to vector<1x4xf32>
    %cst_85 = arith.constant dense<0.000000e+00> : vector<1x4xf32>
    %235 = tpu.matmul %234, %43, %cst_85 {dimension_numbers = #tpu.dot_dimension_numbers<[1], [0], [0], [1], [0, 0, 1, 1], [], []>} : vector<1x4xf32>, vector<4x4xf32>, vector<1x4xf32> -> vector<1x4xf32>
    %236 = vector.extract_strided_slice %232 {offsets = [1, 0], sizes = [1, 4], strides = [1, 1]} : vector<4x4xf32> to vector<1x4xf32>
    %cst_86 = arith.constant dense<0.000000e+00> : vector<1x4xf32>
    %237 = tpu.matmul %236, %75, %cst_86 {dimension_numbers = #tpu.dot_dimension_numbers<[1], [0], [0], [1], [0, 0, 1, 1], [], []>} : vector<1x4xf32>, vector<4x4xf32>, vector<1x4xf32> -> vector<1x4xf32>
    %238 = arith.addf %235, %237 : vector<1x4xf32>
    %cst_87 = arith.constant 0.000000e+00 : f32
    %239 = vector.shape_cast %238 : vector<1x4xf32> to vector<1x4xf32>
    %240 = vector.broadcast %239 : vector<1x4xf32> to vector<4x4xf32>
    %241 = vector.broadcast %cst_87 : f32 to vector<4x4xf32>
    %242 = arith.select %85, %240, %241 : vector<4x4xi1>, vector<4x4xf32>
    %243 = arith.addf %233, %242 : vector<4x4xf32>
    %244 = vector.extract_strided_slice %232 {offsets = [1, 0], sizes = [1, 4], strides = [1, 1]} : vector<4x4xf32> to vector<1x4xf32>
    %cst_88 = arith.constant dense<0.000000e+00> : vector<1x4xf32>
    %245 = tpu.matmul %244, %51, %cst_88 {dimension_numbers = #tpu.dot_dimension_numbers<[1], [0], [0], [1], [0, 0, 1, 1], [], []>} : vector<1x4xf32>, vector<4x4xf32>, vector<1x4xf32> -> vector<1x4xf32>
    %246 = vector.extract_strided_slice %232 {offsets = [2, 0], sizes = [1, 4], strides = [1, 1]} : vector<4x4xf32> to vector<1x4xf32>
    %cst_89 = arith.constant dense<0.000000e+00> : vector<1x4xf32>
    %247 = tpu.matmul %246, %83, %cst_89 {dimension_numbers = #tpu.dot_dimension_numbers<[1], [0], [0], [1], [0, 0, 1, 1], [], []>} : vector<1x4xf32>, vector<4x4xf32>, vector<1x4xf32> -> vector<1x4xf32>
    %248 = arith.addf %245, %247 : vector<1x4xf32>
    %cst_90 = arith.constant 0.000000e+00 : f32
    %249 = vector.shape_cast %248 : vector<1x4xf32> to vector<1x4xf32>
    %250 = vector.broadcast %249 : vector<1x4xf32> to vector<4x4xf32>
    %251 = vector.broadcast %cst_90 : f32 to vector<4x4xf32>
    %252 = arith.select %87, %250, %251 : vector<4x4xi1>, vector<4x4xf32>
    %253 = arith.addf %243, %252 : vector<4x4xf32>
    %254 = vector.extract_strided_slice %232 {offsets = [2, 0], sizes = [1, 4], strides = [1, 1]} : vector<4x4xf32> to vector<1x4xf32>
    %cst_91 = arith.constant dense<0.000000e+00> : vector<1x4xf32>
    %255 = tpu.matmul %254, %59, %cst_91 {dimension_numbers = #tpu.dot_dimension_numbers<[1], [0], [0], [1], [0, 0, 1, 1], [], []>} : vector<1x4xf32>, vector<4x4xf32>, vector<1x4xf32> -> vector<1x4xf32>
    %cst_92 = arith.constant 0.000000e+00 : f32
    %256 = vector.shape_cast %255 : vector<1x4xf32> to vector<1x4xf32>
    %257 = vector.broadcast %256 : vector<1x4xf32> to vector<4x4xf32>
    %258 = vector.broadcast %cst_92 : f32 to vector<4x4xf32>
    %259 = arith.select %89, %257, %258 : vector<4x4xi1>, vector<4x4xf32>
    %260 = arith.addf %253, %259 : vector<4x4xf32>
    %261 = vector.extract_strided_slice %232 {offsets = [3, 0], sizes = [1, 4], strides = [1, 1]} : vector<4x4xf32> to vector<1x4xf32>
    %cst_93 = arith.constant dense<0.000000e+00> : vector<1x4xf32>
    %262 = tpu.matmul %261, %67, %cst_93 {dimension_numbers = #tpu.dot_dimension_numbers<[1], [0], [0], [1], [0, 0, 1, 1], [], []>} : vector<1x4xf32>, vector<4x4xf32>, vector<1x4xf32> -> vector<1x4xf32>
    %cst_94 = arith.constant 0.000000e+00 : f32
    %263 = vector.shape_cast %262 : vector<1x4xf32> to vector<1x4xf32>
    %264 = vector.broadcast %263 : vector<1x4xf32> to vector<4x4xf32>
    %265 = vector.broadcast %cst_94 : f32 to vector<4x4xf32>
    %266 = arith.select %91, %264, %265 : vector<4x4xi1>, vector<4x4xf32>
    %267 = arith.addf %260, %266 : vector<4x4xf32>
    %268 = arith.addf %231, %267 : vector<4x4xf32>
    %cst_95 = arith.constant 0.176776692 : f32
    %269 = vector.broadcast %cst_95 : f32 to vector<4x4xf32>
    %270 = arith.mulf %268, %269 : vector<4x4xf32>
    %cst_96 = arith.constant dense<0xFF800000> : vector<4xf32>
    %271 = vector.multi_reduction <maximumf>, %270, %cst_96 [1] : vector<4x4xf32> to vector<4xf32>
    %272 = vector.shape_cast %271 : vector<4xf32> to vector<4x1xf32>
    %273 = vector.broadcast %272 : vector<4x1xf32> to vector<4x4xf32>
    %274 = arith.subf %270, %273 : vector<4x4xf32>
    %275 = math.exp %274 : vector<4x4xf32>
    %cst_97 = arith.constant dense<0.000000e+00> : vector<4xf32>
    %276 = vector.multi_reduction <add>, %275, %cst_97 [1] : vector<4x4xf32> to vector<4xf32>
    %277 = vector.shape_cast %276 : vector<4xf32> to vector<4x1xf32>
    %278 = tpu.reciprocal %277 {approx = true} : vector<4x1xf32> -> vector<4x1xf32>
    %279 = vector.broadcast %278 : vector<4x1xf32> to vector<4x4xf32>
    %280 = arith.mulf %275, %279 : vector<4x4xf32>
    %cst_98 = arith.constant dense<0.000000e+00> : vector<4x8xf32>
    %281 = tpu.matmul %280, %223, %cst_98 {dimension_numbers = #tpu.dot_dimension_numbers<[1], [0], [0], [1], [0, 0, 1, 1], [], []>} : vector<4x4xf32>, vector<4x8xf32>, vector<4x8xf32> -> vector<4x8xf32>
    %c16 = arith.constant 16 : index
    %c0_99 = arith.constant 0 : index
    %282 = vector.load %arg10[%c16, %c0_99] : memref<32x32xf32, #tpu.memory_space<vmem>>, vector<8x32xf32>
    %cst_100 = arith.constant dense<0.000000e+00> : vector<4x32xf32>
    %283 = tpu.matmul %281, %282, %cst_100 {dimension_numbers = #tpu.dot_dimension_numbers<[1], [0], [0], [1], [0, 0, 1, 1], [], []>} : vector<4x8xf32>, vector<8x32xf32>, vector<4x32xf32> -> vector<4x32xf32>
    %284 = arith.addf %220, %283 : vector<4x32xf32>
    %285 = vector.extract_strided_slice %30 {offsets = [0, 24], sizes = [4, 8], strides = [1, 1]} : vector<4x96xf32> to vector<4x8xf32>
    %286 = vector.extract_strided_slice %30 {offsets = [0, 56], sizes = [4, 8], strides = [1, 1]} : vector<4x96xf32> to vector<4x8xf32>
    %287 = vector.extract_strided_slice %30 {offsets = [0, 88], sizes = [4, 8], strides = [1, 1]} : vector<4x96xf32> to vector<4x8xf32>
    %288 = vector.extract_strided_slice %33 {offsets = [0, 24], sizes = [4, 8], strides = [1, 1]} : vector<4x32xf32> to vector<4x8xf32>
    %c3 = arith.constant 3 : index
    %c0_101 = arith.constant 0 : index
    %289 = vector.load %arg8[%c3, %c0_101] : memref<4x8xf32, #tpu.memory_space<vmem>>, vector<1x8xf32>
    %290 = vector.broadcast %289 : vector<1x8xf32> to vector<4x8xf32>
    %291 = arith.addf %285, %290 : vector<4x8xf32>
    %c3_102 = arith.constant 3 : index
    %c0_103 = arith.constant 0 : index
    %292 = vector.load %arg9[%c3_102, %c0_103] : memref<4x8xf32, #tpu.memory_space<vmem>>, vector<1x8xf32>
    %293 = vector.broadcast %292 : vector<1x8xf32> to vector<4x8xf32>
    %294 = arith.addf %285, %293 : vector<4x8xf32>
    %cst_104 = arith.constant dense<0.000000e+00> : vector<4x4xf32>
    %295 = tpu.matmul %291, %286, %cst_104 {dimension_numbers = #tpu.dot_dimension_numbers<[1], [1], [0], [0], [0, 0, 1, 0], [], []>} : vector<4x8xf32>, vector<4x8xf32>, vector<4x4xf32> -> vector<4x4xf32>
    %cst_105 = arith.constant dense<0.000000e+00> : vector<4x4xf32>
    %296 = tpu.matmul %294, %288, %cst_105 {dimension_numbers = #tpu.dot_dimension_numbers<[1], [1], [0], [0], [0, 0, 1, 0], [], []>} : vector<4x8xf32>, vector<4x8xf32>, vector<4x4xf32> -> vector<4x4xf32>
    %cst_106 = arith.constant 0.000000e+00 : f32
    %297 = vector.broadcast %cst_106 : f32 to vector<4x4xf32>
    %298 = vector.extract_strided_slice %296 {offsets = [0, 0], sizes = [1, 4], strides = [1, 1]} : vector<4x4xf32> to vector<1x4xf32>
    %cst_107 = arith.constant dense<0.000000e+00> : vector<1x4xf32>
    %299 = tpu.matmul %298, %43, %cst_107 {dimension_numbers = #tpu.dot_dimension_numbers<[1], [0], [0], [1], [0, 0, 1, 1], [], []>} : vector<1x4xf32>, vector<4x4xf32>, vector<1x4xf32> -> vector<1x4xf32>
    %300 = vector.extract_strided_slice %296 {offsets = [1, 0], sizes = [1, 4], strides = [1, 1]} : vector<4x4xf32> to vector<1x4xf32>
    %cst_108 = arith.constant dense<0.000000e+00> : vector<1x4xf32>
    %301 = tpu.matmul %300, %75, %cst_108 {dimension_numbers = #tpu.dot_dimension_numbers<[1], [0], [0], [1], [0, 0, 1, 1], [], []>} : vector<1x4xf32>, vector<4x4xf32>, vector<1x4xf32> -> vector<1x4xf32>
    %302 = arith.addf %299, %301 : vector<1x4xf32>
    %cst_109 = arith.constant 0.000000e+00 : f32
    %303 = vector.shape_cast %302 : vector<1x4xf32> to vector<1x4xf32>
    %304 = vector.broadcast %303 : vector<1x4xf32> to vector<4x4xf32>
    %305 = vector.broadcast %cst_109 : f32 to vector<4x4xf32>
    %306 = arith.select %85, %304, %305 : vector<4x4xi1>, vector<4x4xf32>
    %307 = arith.addf %297, %306 : vector<4x4xf32>
    %308 = vector.extract_strided_slice %296 {offsets = [1, 0], sizes = [1, 4], strides = [1, 1]} : vector<4x4xf32> to vector<1x4xf32>
    %cst_110 = arith.constant dense<0.000000e+00> : vector<1x4xf32>
    %309 = tpu.matmul %308, %51, %cst_110 {dimension_numbers = #tpu.dot_dimension_numbers<[1], [0], [0], [1], [0, 0, 1, 1], [], []>} : vector<1x4xf32>, vector<4x4xf32>, vector<1x4xf32> -> vector<1x4xf32>
    %310 = vector.extract_strided_slice %296 {offsets = [2, 0], sizes = [1, 4], strides = [1, 1]} : vector<4x4xf32> to vector<1x4xf32>
    %cst_111 = arith.constant dense<0.000000e+00> : vector<1x4xf32>
    %311 = tpu.matmul %310, %83, %cst_111 {dimension_numbers = #tpu.dot_dimension_numbers<[1], [0], [0], [1], [0, 0, 1, 1], [], []>} : vector<1x4xf32>, vector<4x4xf32>, vector<1x4xf32> -> vector<1x4xf32>
    %312 = arith.addf %309, %311 : vector<1x4xf32>
    %cst_112 = arith.constant 0.000000e+00 : f32
    %313 = vector.shape_cast %312 : vector<1x4xf32> to vector<1x4xf32>
    %314 = vector.broadcast %313 : vector<1x4xf32> to vector<4x4xf32>
    %315 = vector.broadcast %cst_112 : f32 to vector<4x4xf32>
    %316 = arith.select %87, %314, %315 : vector<4x4xi1>, vector<4x4xf32>
    %317 = arith.addf %307, %316 : vector<4x4xf32>
    %318 = vector.extract_strided_slice %296 {offsets = [2, 0], sizes = [1, 4], strides = [1, 1]} : vector<4x4xf32> to vector<1x4xf32>
    %cst_113 = arith.constant dense<0.000000e+00> : vector<1x4xf32>
    %319 = tpu.matmul %318, %59, %cst_113 {dimension_numbers = #tpu.dot_dimension_numbers<[1], [0], [0], [1], [0, 0, 1, 1], [], []>} : vector<1x4xf32>, vector<4x4xf32>, vector<1x4xf32> -> vector<1x4xf32>
    %cst_114 = arith.constant 0.000000e+00 : f32
    %320 = vector.shape_cast %319 : vector<1x4xf32> to vector<1x4xf32>
    %321 = vector.broadcast %320 : vector<1x4xf32> to vector<4x4xf32>
    %322 = vector.broadcast %cst_114 : f32 to vector<4x4xf32>
    %323 = arith.select %89, %321, %322 : vector<4x4xi1>, vector<4x4xf32>
    %324 = arith.addf %317, %323 : vector<4x4xf32>
    %325 = vector.extract_strided_slice %296 {offsets = [3, 0], sizes = [1, 4], strides = [1, 1]} : vector<4x4xf32> to vector<1x4xf32>
    %cst_115 = arith.constant dense<0.000000e+00> : vector<1x4xf32>
    %326 = tpu.matmul %325, %67, %cst_115 {dimension_numbers = #tpu.dot_dimension_numbers<[1], [0], [0], [1], [0, 0, 1, 1], [], []>} : vector<1x4xf32>, vector<4x4xf32>, vector<1x4xf32> -> vector<1x4xf32>
    %cst_116 = arith.constant 0.000000e+00 : f32
    %327 = vector.shape_cast %326 : vector<1x4xf32> to vector<1x4xf32>
    %328 = vector.broadcast %327 : vector<1x4xf32> to vector<4x4xf32>
    %329 = vector.broadcast %cst_116 : f32 to vector<4x4xf32>
    %330 = arith.select %91, %328, %329 : vector<4x4xi1>, vector<4x4xf32>
    %331 = arith.addf %324, %330 : vector<4x4xf32>
    %332 = arith.addf %295, %331 : vector<4x4xf32>
    %cst_117 = arith.constant 0.176776692 : f32
    %333 = vector.broadcast %cst_117 : f32 to vector<4x4xf32>
    %334 = arith.mulf %332, %333 : vector<4x4xf32>
    %cst_118 = arith.constant dense<0xFF800000> : vector<4xf32>
    %335 = vector.multi_reduction <maximumf>, %334, %cst_118 [1] : vector<4x4xf32> to vector<4xf32>
    %336 = vector.shape_cast %335 : vector<4xf32> to vector<4x1xf32>
    %337 = vector.broadcast %336 : vector<4x1xf32> to vector<4x4xf32>
    %338 = arith.subf %334, %337 : vector<4x4xf32>
    %339 = math.exp %338 : vector<4x4xf32>
    %cst_119 = arith.constant dense<0.000000e+00> : vector<4xf32>
    %340 = vector.multi_reduction <add>, %339, %cst_119 [1] : vector<4x4xf32> to vector<4xf32>
    %341 = vector.shape_cast %340 : vector<4xf32> to vector<4x1xf32>
    %342 = tpu.reciprocal %341 {approx = true} : vector<4x1xf32> -> vector<4x1xf32>
    %343 = vector.broadcast %342 : vector<4x1xf32> to vector<4x4xf32>
    %344 = arith.mulf %339, %343 : vector<4x4xf32>
    %cst_120 = arith.constant dense<0.000000e+00> : vector<4x8xf32>
    %345 = tpu.matmul %344, %287, %cst_120 {dimension_numbers = #tpu.dot_dimension_numbers<[1], [0], [0], [1], [0, 0, 1, 1], [], []>} : vector<4x4xf32>, vector<4x8xf32>, vector<4x8xf32> -> vector<4x8xf32>
    %c24 = arith.constant 24 : index
    %c0_121 = arith.constant 0 : index
    %346 = vector.load %arg10[%c24, %c0_121] : memref<32x32xf32, #tpu.memory_space<vmem>>, vector<8x32xf32>
    %cst_122 = arith.constant dense<0.000000e+00> : vector<4x32xf32>
    %347 = tpu.matmul %345, %346, %cst_122 {dimension_numbers = #tpu.dot_dimension_numbers<[1], [0], [0], [1], [0, 0, 1, 1], [], []>} : vector<4x8xf32>, vector<8x32xf32>, vector<4x32xf32> -> vector<4x32xf32>
    %348 = arith.addf %284, %347 : vector<4x32xf32>
    %349 = arith.addf %1, %348 : vector<4x32xf32>
    %c0_123 = arith.constant 0 : index
    %c0_124 = arith.constant 0 : index
    %350 = vector.load %arg11[%c0_123, %c0_124] : memref<1x32xf32, #tpu.memory_space<vmem>>, vector<1x32xf32>
    %351 = vector.broadcast %350 : vector<1x32xf32> to vector<4x32xf32>
    %352 = arith.addf %349, %351 : vector<4x32xf32>
    %c0_125 = arith.constant 0 : index
    %c0_126 = arith.constant 0 : index
    %c0_127 = arith.constant 0 : index
    %353 = vector.load %arg12[%c0_125, %c0_126, %c0_127] : memref<1x4x32xf32, #tpu.memory_space<vmem>>, vector<1x4x32xf32>
    %354 = vector.shape_cast %353 : vector<1x4x32xf32> to vector<4x32xf32>
    %355 = vector.shape_cast %352 : vector<4x32xf32> to vector<1x4x32xf32>
    tpu.vector_store %arg12[%c0_125, %c0_126, %c0_127], %355 {strides = array<i32>} : memref<1x4x32xf32, #tpu.memory_space<vmem>>, vector<1x4x32xf32>,
    return
  }
  func.func @transform_0(%arg0: i32) -> (i32, i32, i32) {
    %c0_i32 = arith.constant 0 : i32
    %c0_i32_0 = arith.constant 0 : i32
    %c0_i32_1 = arith.constant 0 : i32
    return %arg0, %c0_i32, %c0_i32_0 : i32, i32, i32
  }
  func.func @transform_1(%arg0: i32) -> (i32, i32) {
    %c0_i32 = arith.constant 0 : i32
    %c0_i32_0 = arith.constant 0 : i32
    %c0_i32_1 = arith.constant 0 : i32
    return %c0_i32, %c0_i32_0 : i32, i32
  }
  func.func @transform_2(%arg0: i32) -> (i32, i32) {
    %c0_i32 = arith.constant 0 : i32
    %c0_i32_0 = arith.constant 0 : i32
    %c0_i32_1 = arith.constant 0 : i32
    return %c0_i32, %c0_i32_0 : i32, i32
  }
  func.func @transform_3(%arg0: i32) -> (i32, i32) {
    %c0_i32 = arith.constant 0 : i32
    %c0_i32_0 = arith.constant 0 : i32
    %c0_i32_1 = arith.constant 0 : i32
    return %c0_i32, %c0_i32_0 : i32, i32
  }
  func.func @transform_4(%arg0: i32) -> (i32, i32) {
    %c0_i32 = arith.constant 0 : i32
    %c0_i32_0 = arith.constant 0 : i32
    %c0_i32_1 = arith.constant 0 : i32
    return %c0_i32, %c0_i32_0 : i32, i32
  }
  func.func @transform_5(%arg0: i32) -> (i32, i32) {
    %c0_i32 = arith.constant 0 : i32
    %c0_i32_0 = arith.constant 0 : i32
    %c0_i32_1 = arith.constant 0 : i32
    return %c0_i32, %c0_i32_0 : i32, i32
  }
  func.func @transform_6(%arg0: i32) -> (i32, i32) {
    %c0_i32 = arith.constant 0 : i32
    %c0_i32_0 = arith.constant 0 : i32
    %c0_i32_1 = arith.constant 0 : i32
    return %c0_i32, %c0_i32_0 : i32, i32
  }
  func.func @transform_7(%arg0: i32) -> (i32, i32) {
    %c0_i32 = arith.constant 0 : i32
    %c0_i32_0 = arith.constant 0 : i32
    %c0_i32_1 = arith.constant 0 : i32
    return %c0_i32, %c0_i32_0 : i32, i32
  }
  func.func @transform_8(%arg0: i32) -> (i32, i32) {
    %c0_i32 = arith.constant 0 : i32
    %c0_i32_0 = arith.constant 0 : i32
    %c0_i32_1 = arith.constant 0 : i32
    return %c0_i32, %c0_i32_0 : i32, i32
  }
  func.func @transform_9(%arg0: i32) -> (i32, i32) {
    %c0_i32 = arith.constant 0 : i32
    %c0_i32_0 = arith.constant 0 : i32
    %c0_i32_1 = arith.constant 0 : i32
    return %c0_i32, %c0_i32_0 : i32, i32
  }
  func.func @transform_10(%arg0: i32) -> (i32, i32) {
    %c0_i32 = arith.constant 0 : i32
    %c0_i32_0 = arith.constant 0 : i32
    %c0_i32_1 = arith.constant 0 : i32
    return %c0_i32, %c0_i32_0 : i32, i32
  }
  func.func @transform_11(%arg0: i32) -> (i32, i32, i32) {
    %c0_i32 = arith.constant 0 : i32
    %c0_i32_0 = arith.constant 0 : i32
    %c0_i32_1 = arith.constant 0 : i32
    return %arg0, %c0_i32, %c0_i32_0 : i32, i32, i32
  }
}

module attributes {stable_mosaic.version = 11 : i64} {
  func.func @kernel(%arg0: i32, %arg1: memref<1x4x32xf32, #tpu.memory_space<vmem>>, %arg2: memref<1x32xf32, #tpu.memory_space<vmem>>, %arg3: memref<1x32xf32, #tpu.memory_space<vmem>>, %arg4: memref<32x64xf32, #tpu.memory_space<vmem>>, %arg5: memref<1x64xf32, #tpu.memory_space<vmem>>, %arg6: memref<7x32xf32, #tpu.memory_space<vmem>>, %arg7: memref<1x32xf32, #tpu.memory_space<vmem>>, %arg8: memref<1x32xf32, #tpu.memory_space<vmem>>, %arg9: memref<1x32xf32, #tpu.memory_space<vmem>>, %arg10: memref<1x32xf32, #tpu.memory_space<vmem>>, %arg11: memref<32x32xf32, #tpu.memory_space<vmem>>, %arg12: memref<1x32xf32, #tpu.memory_space<vmem>>, %arg13: memref<1x4x32xf32, #tpu.memory_space<vmem>>, %arg14: memref<10x32xf32, #tpu.memory_space<vmem>>) attributes {dimension_semantics = [#tpu.dimension_semantics<parallel>], iteration_bounds = array<i64: 2>, scalar_prefetch = 0 : i64, scratch_operands = 1 : i64, tpu.core_type = #tpu.core_type<tc>, window_params = [{transform_indices = @transform_0, window_bounds = array<i64: 1, 4, 32>}, {pipeline_mode = #tpu.pipeline_mode<synchronous>, transform_indices = @transform_1, window_bounds = array<i64: 1, 32>}, {pipeline_mode = #tpu.pipeline_mode<synchronous>, transform_indices = @transform_2, window_bounds = array<i64: 1, 32>}, {pipeline_mode = #tpu.pipeline_mode<synchronous>, transform_indices = @transform_3, window_bounds = array<i64: 32, 64>}, {pipeline_mode = #tpu.pipeline_mode<synchronous>, transform_indices = @transform_4, window_bounds = array<i64: 1, 64>}, {pipeline_mode = #tpu.pipeline_mode<synchronous>, transform_indices = @transform_5, window_bounds = array<i64: 7, 32>}, {pipeline_mode = #tpu.pipeline_mode<synchronous>, transform_indices = @transform_6, window_bounds = array<i64: 1, 32>}, {pipeline_mode = #tpu.pipeline_mode<synchronous>, transform_indices = @transform_7, window_bounds = array<i64: 1, 32>}, {pipeline_mode = #tpu.pipeline_mode<synchronous>, transform_indices = @transform_8, window_bounds = array<i64: 1, 32>}, {pipeline_mode = #tpu.pipeline_mode<synchronous>, transform_indices = @transform_9, window_bounds = array<i64: 1, 32>}, {pipeline_mode = #tpu.pipeline_mode<synchronous>, transform_indices = @transform_10, window_bounds = array<i64: 32, 32>}, {pipeline_mode = #tpu.pipeline_mode<synchronous>, transform_indices = @transform_11, window_bounds = array<i64: 1, 32>}, {transform_indices = @transform_12, window_bounds = array<i64: 1, 4, 32>}]} {
    %c0 = arith.constant 0 : index
    %c0_0 = arith.constant 0 : index
    %c0_1 = arith.constant 0 : index
    %0 = vector.load %arg1[%c0, %c0_0, %c0_1] : memref<1x4x32xf32, #tpu.memory_space<vmem>>, vector<1x4x32xf32>
    %1 = vector.shape_cast %0 : vector<1x4x32xf32> to vector<4x32xf32>
    %c0_2 = arith.constant 0 : index
    %c0_3 = arith.constant 0 : index
    %2 = vector.load %arg2[%c0_2, %c0_3] : memref<1x32xf32, #tpu.memory_space<vmem>>, vector<1x32xf32>
    %c0_4 = arith.constant 0 : index
    %c0_5 = arith.constant 0 : index
    %3 = vector.load %arg3[%c0_4, %c0_5] : memref<1x32xf32, #tpu.memory_space<vmem>>, vector<1x32xf32>
    %cst = arith.constant dense<0.000000e+00> : vector<4xf32>
    %4 = vector.multi_reduction <add>, %1, %cst [1] : vector<4x32xf32> to vector<4xf32>
    %5 = vector.shape_cast %4 : vector<4xf32> to vector<4x1xf32>
    %cst_6 = arith.constant 3.200000e+01 : f32
    %6 = vector.broadcast %cst_6 : f32 to vector<4x1xf32>
    %7 = arith.divf %5, %6 : vector<4x1xf32>
    %8 = vector.broadcast %7 : vector<4x1xf32> to vector<4x32xf32>
    %9 = arith.subf %1, %8 : vector<4x32xf32>
    %10 = arith.mulf %9, %9 : vector<4x32xf32>
    %cst_7 = arith.constant dense<0.000000e+00> : vector<4xf32>
    %11 = vector.multi_reduction <add>, %10, %cst_7 [1] : vector<4x32xf32> to vector<4xf32>
    %12 = vector.shape_cast %11 : vector<4xf32> to vector<4x1xf32>
    %cst_8 = arith.constant 3.200000e+01 : f32
    %13 = vector.broadcast %cst_8 : f32 to vector<4x1xf32>
    %14 = arith.divf %12, %13 : vector<4x1xf32>
    %15 = vector.broadcast %7 : vector<4x1xf32> to vector<4x32xf32>
    %16 = arith.subf %1, %15 : vector<4x32xf32>
    %cst_9 = arith.constant 9.99999974E-6 : f32
    %17 = vector.broadcast %cst_9 : f32 to vector<4x1xf32>
    %18 = arith.addf %14, %17 : vector<4x1xf32>
    %19 = math.rsqrt %18 : vector<4x1xf32>
    %20 = vector.broadcast %19 : vector<4x1xf32> to vector<4x32xf32>
    %21 = arith.mulf %16, %20 : vector<4x32xf32>
    %22 = vector.broadcast %2 : vector<1x32xf32> to vector<4x32xf32>
    %23 = arith.mulf %21, %22 : vector<4x32xf32>
    %24 = vector.broadcast %3 : vector<1x32xf32> to vector<4x32xf32>
    %25 = arith.addf %23, %24 : vector<4x32xf32>
    %c0_10 = arith.constant 0 : index
    %c0_11 = arith.constant 0 : index
    %26 = vector.load %arg4[%c0_10, %c0_11] : memref<32x64xf32, #tpu.memory_space<vmem>>, vector<32x64xf32>
    %cst_12 = arith.constant dense<0.000000e+00> : vector<4x64xf32>
    %27 = tpu.matmul %25, %26, %cst_12 {dimension_numbers = #tpu.dot_dimension_numbers<[1], [0], [0], [1], [0, 0, 1, 1], [], []>} : vector<4x32xf32>, vector<32x64xf32>, vector<4x64xf32> -> vector<4x64xf32>
    %c0_13 = arith.constant 0 : index
    %c0_14 = arith.constant 0 : index
    %28 = vector.load %arg5[%c0_13, %c0_14] : memref<1x64xf32, #tpu.memory_space<vmem>>, vector<1x64xf32>
    %29 = vector.broadcast %28 : vector<1x64xf32> to vector<4x64xf32>
    %30 = arith.addf %27, %29 : vector<4x64xf32>
    %31 = vector.extract_strided_slice %30 {offsets = [0, 0], sizes = [4, 32], strides = [1, 1]} : vector<4x64xf32> to vector<4x32xf32>
    %32 = vector.extract_strided_slice %30 {offsets = [0, 32], sizes = [4, 32], strides = [1, 1]} : vector<4x64xf32> to vector<4x32xf32>
    %33 = arith.negf %32 : vector<4x32xf32>
    %34 = math.exp %33 : vector<4x32xf32>
    %cst_15 = arith.constant 1.000000e+00 : f32
    %35 = vector.broadcast %cst_15 : f32 to vector<4x32xf32>
    %36 = arith.addf %35, %34 : vector<4x32xf32>
    %37 = arith.divf %35, %36 : vector<4x32xf32>
    %38 = arith.mulf %31, %37 : vector<4x32xf32>
    %cst_16 = arith.constant 0.000000e+00 : f32
    %39 = vector.broadcast %cst_16 : f32 to vector<10x32xf32>
    %c0_17 = arith.constant 0 : index
    %c0_18 = arith.constant 0 : index
    %40 = vector.load %arg14[%c0_17, %c0_18] : memref<10x32xf32, #tpu.memory_space<vmem>>, vector<10x32xf32>
    tpu.vector_store %arg14[%c0_17, %c0_18], %39 {strides = array<i32>} : memref<10x32xf32, #tpu.memory_space<vmem>>, vector<10x32xf32>,
    %c3 = arith.constant 3 : index
    %c0_19 = arith.constant 0 : index
    %41 = vector.load %arg14[%c3, %c0_19] : memref<10x32xf32, #tpu.memory_space<vmem>>, vector<4x32xf32>
    tpu.vector_store %arg14[%c3, %c0_19], %38 {strides = array<i32>} : memref<10x32xf32, #tpu.memory_space<vmem>>, vector<4x32xf32>,
    %cst_20 = arith.constant 0.000000e+00 : f32
    %42 = vector.broadcast %cst_20 : f32 to vector<4x32xf32>
    %c0_21 = arith.constant 0 : index
    %c0_22 = arith.constant 0 : index
    %43 = vector.load %arg14[%c0_21, %c0_22] : memref<10x32xf32, #tpu.memory_space<vmem>>, vector<4x32xf32>
    %c0_23 = arith.constant 0 : index
    %c0_24 = arith.constant 0 : index
    %44 = vector.load %arg6[%c0_23, %c0_24] : memref<7x32xf32, #tpu.memory_space<vmem>>, vector<1x32xf32>
    %45 = vector.broadcast %44 : vector<1x32xf32> to vector<4x32xf32>
    %46 = arith.mulf %43, %45 : vector<4x32xf32>
    %47 = arith.addf %42, %46 : vector<4x32xf32>
    %c1 = arith.constant 1 : index
    %c0_25 = arith.constant 0 : index
    %48 = vector.load %arg14[%c1, %c0_25] : memref<10x32xf32, #tpu.memory_space<vmem>>, vector<4x32xf32>
    %c1_26 = arith.constant 1 : index
    %c0_27 = arith.constant 0 : index
    %49 = vector.load %arg6[%c1_26, %c0_27] : memref<7x32xf32, #tpu.memory_space<vmem>>, vector<1x32xf32>
    %50 = vector.broadcast %49 : vector<1x32xf32> to vector<4x32xf32>
    %51 = arith.mulf %48, %50 : vector<4x32xf32>
    %52 = arith.addf %47, %51 : vector<4x32xf32>
    %c2 = arith.constant 2 : index
    %c0_28 = arith.constant 0 : index
    %53 = vector.load %arg14[%c2, %c0_28] : memref<10x32xf32, #tpu.memory_space<vmem>>, vector<4x32xf32>
    %c2_29 = arith.constant 2 : index
    %c0_30 = arith.constant 0 : index
    %54 = vector.load %arg6[%c2_29, %c0_30] : memref<7x32xf32, #tpu.memory_space<vmem>>, vector<1x32xf32>
    %55 = vector.broadcast %54 : vector<1x32xf32> to vector<4x32xf32>
    %56 = arith.mulf %53, %55 : vector<4x32xf32>
    %57 = arith.addf %52, %56 : vector<4x32xf32>
    %c3_31 = arith.constant 3 : index
    %c0_32 = arith.constant 0 : index
    %58 = vector.load %arg14[%c3_31, %c0_32] : memref<10x32xf32, #tpu.memory_space<vmem>>, vector<4x32xf32>
    %c3_33 = arith.constant 3 : index
    %c0_34 = arith.constant 0 : index
    %59 = vector.load %arg6[%c3_33, %c0_34] : memref<7x32xf32, #tpu.memory_space<vmem>>, vector<1x32xf32>
    %60 = vector.broadcast %59 : vector<1x32xf32> to vector<4x32xf32>
    %61 = arith.mulf %58, %60 : vector<4x32xf32>
    %62 = arith.addf %57, %61 : vector<4x32xf32>
    %c4 = arith.constant 4 : index
    %c0_35 = arith.constant 0 : index
    %63 = vector.load %arg14[%c4, %c0_35] : memref<10x32xf32, #tpu.memory_space<vmem>>, vector<4x32xf32>
    %c4_36 = arith.constant 4 : index
    %c0_37 = arith.constant 0 : index
    %64 = vector.load %arg6[%c4_36, %c0_37] : memref<7x32xf32, #tpu.memory_space<vmem>>, vector<1x32xf32>
    %65 = vector.broadcast %64 : vector<1x32xf32> to vector<4x32xf32>
    %66 = arith.mulf %63, %65 : vector<4x32xf32>
    %67 = arith.addf %62, %66 : vector<4x32xf32>
    %c5 = arith.constant 5 : index
    %c0_38 = arith.constant 0 : index
    %68 = vector.load %arg14[%c5, %c0_38] : memref<10x32xf32, #tpu.memory_space<vmem>>, vector<4x32xf32>
    %c5_39 = arith.constant 5 : index
    %c0_40 = arith.constant 0 : index
    %69 = vector.load %arg6[%c5_39, %c0_40] : memref<7x32xf32, #tpu.memory_space<vmem>>, vector<1x32xf32>
    %70 = vector.broadcast %69 : vector<1x32xf32> to vector<4x32xf32>
    %71 = arith.mulf %68, %70 : vector<4x32xf32>
    %72 = arith.addf %67, %71 : vector<4x32xf32>
    %c6 = arith.constant 6 : index
    %c0_41 = arith.constant 0 : index
    %73 = vector.load %arg14[%c6, %c0_41] : memref<10x32xf32, #tpu.memory_space<vmem>>, vector<4x32xf32>
    %c6_42 = arith.constant 6 : index
    %c0_43 = arith.constant 0 : index
    %74 = vector.load %arg6[%c6_42, %c0_43] : memref<7x32xf32, #tpu.memory_space<vmem>>, vector<1x32xf32>
    %75 = vector.broadcast %74 : vector<1x32xf32> to vector<4x32xf32>
    %76 = arith.mulf %73, %75 : vector<4x32xf32>
    %77 = arith.addf %72, %76 : vector<4x32xf32>
    %c0_44 = arith.constant 0 : index
    %c0_45 = arith.constant 0 : index
    %78 = vector.load %arg7[%c0_44, %c0_45] : memref<1x32xf32, #tpu.memory_space<vmem>>, vector<1x32xf32>
    %c0_46 = arith.constant 0 : index
    %c0_47 = arith.constant 0 : index
    %79 = vector.load %arg10[%c0_46, %c0_47] : memref<1x32xf32, #tpu.memory_space<vmem>>, vector<1x32xf32>
    %cst_48 = arith.constant 9.99999974E-6 : f32
    %80 = vector.broadcast %cst_48 : f32 to vector<1x32xf32>
    %81 = arith.addf %79, %80 : vector<1x32xf32>
    %82 = math.rsqrt %81 : vector<1x32xf32>
    %83 = arith.mulf %78, %82 : vector<1x32xf32>
    %c0_49 = arith.constant 0 : index
    %c0_50 = arith.constant 0 : index
    %84 = vector.load %arg8[%c0_49, %c0_50] : memref<1x32xf32, #tpu.memory_space<vmem>>, vector<1x32xf32>
    %c0_51 = arith.constant 0 : index
    %c0_52 = arith.constant 0 : index
    %85 = vector.load %arg9[%c0_51, %c0_52] : memref<1x32xf32, #tpu.memory_space<vmem>>, vector<1x32xf32>
    %86 = arith.mulf %85, %83 : vector<1x32xf32>
    %87 = arith.subf %84, %86 : vector<1x32xf32>
    %88 = vector.broadcast %83 : vector<1x32xf32> to vector<4x32xf32>
    %89 = arith.mulf %77, %88 : vector<4x32xf32>
    %90 = vector.broadcast %87 : vector<1x32xf32> to vector<4x32xf32>
    %91 = arith.addf %89, %90 : vector<4x32xf32>
    %92 = arith.negf %91 : vector<4x32xf32>
    %93 = math.exp %92 : vector<4x32xf32>
    %cst_53 = arith.constant 1.000000e+00 : f32
    %94 = vector.broadcast %cst_53 : f32 to vector<4x32xf32>
    %95 = arith.addf %94, %93 : vector<4x32xf32>
    %96 = arith.divf %94, %95 : vector<4x32xf32>
    %97 = arith.mulf %91, %96 : vector<4x32xf32>
    %c0_54 = arith.constant 0 : index
    %c0_55 = arith.constant 0 : index
    %98 = vector.load %arg11[%c0_54, %c0_55] : memref<32x32xf32, #tpu.memory_space<vmem>>, vector<32x32xf32>
    %cst_56 = arith.constant dense<0.000000e+00> : vector<4x32xf32>
    %99 = tpu.matmul %97, %98, %cst_56 {dimension_numbers = #tpu.dot_dimension_numbers<[1], [0], [0], [1], [0, 0, 1, 1], [], []>} : vector<4x32xf32>, vector<32x32xf32>, vector<4x32xf32> -> vector<4x32xf32>
    %c0_57 = arith.constant 0 : index
    %c0_58 = arith.constant 0 : index
    %100 = vector.load %arg12[%c0_57, %c0_58] : memref<1x32xf32, #tpu.memory_space<vmem>>, vector<1x32xf32>
    %101 = vector.broadcast %100 : vector<1x32xf32> to vector<4x32xf32>
    %102 = arith.addf %99, %101 : vector<4x32xf32>
    %103 = arith.addf %1, %102 : vector<4x32xf32>
    %c0_59 = arith.constant 0 : index
    %c0_60 = arith.constant 0 : index
    %c0_61 = arith.constant 0 : index
    %104 = vector.load %arg13[%c0_59, %c0_60, %c0_61] : memref<1x4x32xf32, #tpu.memory_space<vmem>>, vector<1x4x32xf32>
    %105 = vector.shape_cast %104 : vector<1x4x32xf32> to vector<4x32xf32>
    %106 = vector.shape_cast %103 : vector<4x32xf32> to vector<1x4x32xf32>
    tpu.vector_store %arg13[%c0_59, %c0_60, %c0_61], %106 {strides = array<i32>} : memref<1x4x32xf32, #tpu.memory_space<vmem>>, vector<1x4x32xf32>,
    return
  }
  func.func @transform_0(%arg0: i32) -> (i32, i32, i32) {
    %c0_i32 = arith.constant 0 : i32
    %c0_i32_0 = arith.constant 0 : i32
    %c0_i32_1 = arith.constant 0 : i32
    return %arg0, %c0_i32, %c0_i32_0 : i32, i32, i32
  }
  func.func @transform_1(%arg0: i32) -> (i32, i32) {
    %c0_i32 = arith.constant 0 : i32
    %c0_i32_0 = arith.constant 0 : i32
    %c0_i32_1 = arith.constant 0 : i32
    return %c0_i32, %c0_i32_0 : i32, i32
  }
  func.func @transform_2(%arg0: i32) -> (i32, i32) {
    %c0_i32 = arith.constant 0 : i32
    %c0_i32_0 = arith.constant 0 : i32
    %c0_i32_1 = arith.constant 0 : i32
    return %c0_i32, %c0_i32_0 : i32, i32
  }
  func.func @transform_3(%arg0: i32) -> (i32, i32) {
    %c0_i32 = arith.constant 0 : i32
    %c0_i32_0 = arith.constant 0 : i32
    %c0_i32_1 = arith.constant 0 : i32
    return %c0_i32, %c0_i32_0 : i32, i32
  }
  func.func @transform_4(%arg0: i32) -> (i32, i32) {
    %c0_i32 = arith.constant 0 : i32
    %c0_i32_0 = arith.constant 0 : i32
    %c0_i32_1 = arith.constant 0 : i32
    return %c0_i32, %c0_i32_0 : i32, i32
  }
  func.func @transform_5(%arg0: i32) -> (i32, i32) {
    %c0_i32 = arith.constant 0 : i32
    %c0_i32_0 = arith.constant 0 : i32
    %c0_i32_1 = arith.constant 0 : i32
    return %c0_i32, %c0_i32_0 : i32, i32
  }
  func.func @transform_6(%arg0: i32) -> (i32, i32) {
    %c0_i32 = arith.constant 0 : i32
    %c0_i32_0 = arith.constant 0 : i32
    %c0_i32_1 = arith.constant 0 : i32
    return %c0_i32, %c0_i32_0 : i32, i32
  }
  func.func @transform_7(%arg0: i32) -> (i32, i32) {
    %c0_i32 = arith.constant 0 : i32
    %c0_i32_0 = arith.constant 0 : i32
    %c0_i32_1 = arith.constant 0 : i32
    return %c0_i32, %c0_i32_0 : i32, i32
  }
  func.func @transform_8(%arg0: i32) -> (i32, i32) {
    %c0_i32 = arith.constant 0 : i32
    %c0_i32_0 = arith.constant 0 : i32
    %c0_i32_1 = arith.constant 0 : i32
    return %c0_i32, %c0_i32_0 : i32, i32
  }
  func.func @transform_9(%arg0: i32) -> (i32, i32) {
    %c0_i32 = arith.constant 0 : i32
    %c0_i32_0 = arith.constant 0 : i32
    %c0_i32_1 = arith.constant 0 : i32
    return %c0_i32, %c0_i32_0 : i32, i32
  }
  func.func @transform_10(%arg0: i32) -> (i32, i32) {
    %c0_i32 = arith.constant 0 : i32
    %c0_i32_0 = arith.constant 0 : i32
    %c0_i32_1 = arith.constant 0 : i32
    return %c0_i32, %c0_i32_0 : i32, i32
  }
  func.func @transform_11(%arg0: i32) -> (i32, i32) {
    %c0_i32 = arith.constant 0 : i32
    %c0_i32_0 = arith.constant 0 : i32
    %c0_i32_1 = arith.constant 0 : i32
    return %c0_i32, %c0_i32_0 : i32, i32
  }
  func.func @transform_12(%arg0: i32) -> (i32, i32, i32) {
    %c0_i32 = arith.constant 0 : i32
    %c0_i32_0 = arith.constant 0 : i32
    %c0_i32_1 = arith.constant 0 : i32
    return %arg0, %c0_i32, %c0_i32_0 : i32, i32, i32
  }
}

module attributes {stable_mosaic.version = 11 : i64} {
  func.func @_ff_final_ln_kernel(%arg0: i32, %arg1: memref<1x4x32xf32, #tpu.memory_space<vmem>>, %arg2: memref<1x32xf32, #tpu.memory_space<vmem>>, %arg3: memref<1x32xf32, #tpu.memory_space<vmem>>, %arg4: memref<32x128xf32, #tpu.memory_space<vmem>>, %arg5: memref<1x128xf32, #tpu.memory_space<vmem>>, %arg6: memref<128x32xf32, #tpu.memory_space<vmem>>, %arg7: memref<1x32xf32, #tpu.memory_space<vmem>>, %arg8: memref<1x32xf32, #tpu.memory_space<vmem>>, %arg9: memref<1x32xf32, #tpu.memory_space<vmem>>, %arg10: memref<1x4x32xf32, #tpu.memory_space<vmem>>) attributes {dimension_semantics = [#tpu.dimension_semantics<parallel>], iteration_bounds = array<i64: 2>, scalar_prefetch = 0 : i64, scratch_operands = 0 : i64, tpu.core_type = #tpu.core_type<tc>, window_params = [{transform_indices = @transform_0, window_bounds = array<i64: 1, 4, 32>}, {pipeline_mode = #tpu.pipeline_mode<synchronous>, transform_indices = @transform_1, window_bounds = array<i64: 1, 32>}, {pipeline_mode = #tpu.pipeline_mode<synchronous>, transform_indices = @transform_2, window_bounds = array<i64: 1, 32>}, {pipeline_mode = #tpu.pipeline_mode<synchronous>, transform_indices = @transform_3, window_bounds = array<i64: 32, 128>}, {pipeline_mode = #tpu.pipeline_mode<synchronous>, transform_indices = @transform_4, window_bounds = array<i64: 1, 128>}, {pipeline_mode = #tpu.pipeline_mode<synchronous>, transform_indices = @transform_5, window_bounds = array<i64: 128, 32>}, {pipeline_mode = #tpu.pipeline_mode<synchronous>, transform_indices = @transform_6, window_bounds = array<i64: 1, 32>}, {pipeline_mode = #tpu.pipeline_mode<synchronous>, transform_indices = @transform_7, window_bounds = array<i64: 1, 32>}, {pipeline_mode = #tpu.pipeline_mode<synchronous>, transform_indices = @transform_8, window_bounds = array<i64: 1, 32>}, {transform_indices = @transform_9, window_bounds = array<i64: 1, 4, 32>}]} {
    %c0 = arith.constant 0 : index
    %c0_0 = arith.constant 0 : index
    %c0_1 = arith.constant 0 : index
    %0 = vector.load %arg1[%c0, %c0_0, %c0_1] : memref<1x4x32xf32, #tpu.memory_space<vmem>>, vector<1x4x32xf32>
    %1 = vector.shape_cast %0 : vector<1x4x32xf32> to vector<4x32xf32>
    %c0_2 = arith.constant 0 : index
    %c0_3 = arith.constant 0 : index
    %2 = vector.load %arg2[%c0_2, %c0_3] : memref<1x32xf32, #tpu.memory_space<vmem>>, vector<1x32xf32>
    %c0_4 = arith.constant 0 : index
    %c0_5 = arith.constant 0 : index
    %3 = vector.load %arg3[%c0_4, %c0_5] : memref<1x32xf32, #tpu.memory_space<vmem>>, vector<1x32xf32>
    %cst = arith.constant dense<0.000000e+00> : vector<4xf32>
    %4 = vector.multi_reduction <add>, %1, %cst [1] : vector<4x32xf32> to vector<4xf32>
    %5 = vector.shape_cast %4 : vector<4xf32> to vector<4x1xf32>
    %cst_6 = arith.constant 3.200000e+01 : f32
    %6 = vector.broadcast %cst_6 : f32 to vector<4x1xf32>
    %7 = arith.divf %5, %6 : vector<4x1xf32>
    %8 = vector.broadcast %7 : vector<4x1xf32> to vector<4x32xf32>
    %9 = arith.subf %1, %8 : vector<4x32xf32>
    %10 = arith.mulf %9, %9 : vector<4x32xf32>
    %cst_7 = arith.constant dense<0.000000e+00> : vector<4xf32>
    %11 = vector.multi_reduction <add>, %10, %cst_7 [1] : vector<4x32xf32> to vector<4xf32>
    %12 = vector.shape_cast %11 : vector<4xf32> to vector<4x1xf32>
    %cst_8 = arith.constant 3.200000e+01 : f32
    %13 = vector.broadcast %cst_8 : f32 to vector<4x1xf32>
    %14 = arith.divf %12, %13 : vector<4x1xf32>
    %15 = vector.broadcast %7 : vector<4x1xf32> to vector<4x32xf32>
    %16 = arith.subf %1, %15 : vector<4x32xf32>
    %cst_9 = arith.constant 9.99999974E-6 : f32
    %17 = vector.broadcast %cst_9 : f32 to vector<4x1xf32>
    %18 = arith.addf %14, %17 : vector<4x1xf32>
    %19 = math.rsqrt %18 : vector<4x1xf32>
    %20 = vector.broadcast %19 : vector<4x1xf32> to vector<4x32xf32>
    %21 = arith.mulf %16, %20 : vector<4x32xf32>
    %22 = vector.broadcast %2 : vector<1x32xf32> to vector<4x32xf32>
    %23 = arith.mulf %21, %22 : vector<4x32xf32>
    %24 = vector.broadcast %3 : vector<1x32xf32> to vector<4x32xf32>
    %25 = arith.addf %23, %24 : vector<4x32xf32>
    %c0_10 = arith.constant 0 : index
    %c0_11 = arith.constant 0 : index
    %26 = vector.load %arg4[%c0_10, %c0_11] : memref<32x128xf32, #tpu.memory_space<vmem>>, vector<32x128xf32>
    %cst_12 = arith.constant dense<0.000000e+00> : vector<4x128xf32>
    %27 = tpu.matmul %25, %26, %cst_12 {dimension_numbers = #tpu.dot_dimension_numbers<[1], [0], [0], [1], [0, 0, 1, 1], [], []>} : vector<4x32xf32>, vector<32x128xf32>, vector<4x128xf32> -> vector<4x128xf32>
    %c0_13 = arith.constant 0 : index
    %c0_14 = arith.constant 0 : index
    %28 = vector.load %arg5[%c0_13, %c0_14] : memref<1x128xf32, #tpu.memory_space<vmem>>, vector<1x128xf32>
    %29 = vector.broadcast %28 : vector<1x128xf32> to vector<4x128xf32>
    %30 = arith.addf %27, %29 : vector<4x128xf32>
    %31 = arith.negf %30 : vector<4x128xf32>
    %32 = math.exp %31 : vector<4x128xf32>
    %cst_15 = arith.constant 1.000000e+00 : f32
    %33 = vector.broadcast %cst_15 : f32 to vector<4x128xf32>
    %34 = arith.addf %33, %32 : vector<4x128xf32>
    %35 = arith.divf %33, %34 : vector<4x128xf32>
    %36 = arith.mulf %30, %35 : vector<4x128xf32>
    %c0_16 = arith.constant 0 : index
    %c0_17 = arith.constant 0 : index
    %37 = vector.load %arg6[%c0_16, %c0_17] : memref<128x32xf32, #tpu.memory_space<vmem>>, vector<128x32xf32>
    %cst_18 = arith.constant dense<0.000000e+00> : vector<4x32xf32>
    %38 = tpu.matmul %36, %37, %cst_18 {dimension_numbers = #tpu.dot_dimension_numbers<[1], [0], [0], [1], [0, 0, 1, 1], [], []>} : vector<4x128xf32>, vector<128x32xf32>, vector<4x32xf32> -> vector<4x32xf32>
    %c0_19 = arith.constant 0 : index
    %c0_20 = arith.constant 0 : index
    %39 = vector.load %arg7[%c0_19, %c0_20] : memref<1x32xf32, #tpu.memory_space<vmem>>, vector<1x32xf32>
    %40 = vector.broadcast %39 : vector<1x32xf32> to vector<4x32xf32>
    %41 = arith.addf %38, %40 : vector<4x32xf32>
    %cst_21 = arith.constant 5.000000e-01 : f32
    %42 = vector.broadcast %cst_21 : f32 to vector<4x32xf32>
    %43 = arith.mulf %42, %41 : vector<4x32xf32>
    %44 = arith.addf %1, %43 : vector<4x32xf32>
    %c0_22 = arith.constant 0 : index
    %c0_23 = arith.constant 0 : index
    %45 = vector.load %arg8[%c0_22, %c0_23] : memref<1x32xf32, #tpu.memory_space<vmem>>, vector<1x32xf32>
    %c0_24 = arith.constant 0 : index
    %c0_25 = arith.constant 0 : index
    %46 = vector.load %arg9[%c0_24, %c0_25] : memref<1x32xf32, #tpu.memory_space<vmem>>, vector<1x32xf32>
    %cst_26 = arith.constant dense<0.000000e+00> : vector<4xf32>
    %47 = vector.multi_reduction <add>, %44, %cst_26 [1] : vector<4x32xf32> to vector<4xf32>
    %48 = vector.shape_cast %47 : vector<4xf32> to vector<4x1xf32>
    %cst_27 = arith.constant 3.200000e+01 : f32
    %49 = vector.broadcast %cst_27 : f32 to vector<4x1xf32>
    %50 = arith.divf %48, %49 : vector<4x1xf32>
    %51 = vector.broadcast %50 : vector<4x1xf32> to vector<4x32xf32>
    %52 = arith.subf %44, %51 : vector<4x32xf32>
    %53 = arith.mulf %52, %52 : vector<4x32xf32>
    %cst_28 = arith.constant dense<0.000000e+00> : vector<4xf32>
    %54 = vector.multi_reduction <add>, %53, %cst_28 [1] : vector<4x32xf32> to vector<4xf32>
    %55 = vector.shape_cast %54 : vector<4xf32> to vector<4x1xf32>
    %cst_29 = arith.constant 3.200000e+01 : f32
    %56 = vector.broadcast %cst_29 : f32 to vector<4x1xf32>
    %57 = arith.divf %55, %56 : vector<4x1xf32>
    %58 = vector.broadcast %50 : vector<4x1xf32> to vector<4x32xf32>
    %59 = arith.subf %44, %58 : vector<4x32xf32>
    %cst_30 = arith.constant 9.99999974E-6 : f32
    %60 = vector.broadcast %cst_30 : f32 to vector<4x1xf32>
    %61 = arith.addf %57, %60 : vector<4x1xf32>
    %62 = math.rsqrt %61 : vector<4x1xf32>
    %63 = vector.broadcast %62 : vector<4x1xf32> to vector<4x32xf32>
    %64 = arith.mulf %59, %63 : vector<4x32xf32>
    %65 = vector.broadcast %45 : vector<1x32xf32> to vector<4x32xf32>
    %66 = arith.mulf %64, %65 : vector<4x32xf32>
    %67 = vector.broadcast %46 : vector<1x32xf32> to vector<4x32xf32>
    %68 = arith.addf %66, %67 : vector<4x32xf32>
    %c0_31 = arith.constant 0 : index
    %c0_32 = arith.constant 0 : index
    %c0_33 = arith.constant 0 : index
    %69 = vector.load %arg10[%c0_31, %c0_32, %c0_33] : memref<1x4x32xf32, #tpu.memory_space<vmem>>, vector<1x4x32xf32>
    %70 = vector.shape_cast %69 : vector<1x4x32xf32> to vector<4x32xf32>
    %71 = vector.shape_cast %68 : vector<4x32xf32> to vector<1x4x32xf32>
    tpu.vector_store %arg10[%c0_31, %c0_32, %c0_33], %71 {strides = array<i32>} : memref<1x4x32xf32, #tpu.memory_space<vmem>>, vector<1x4x32xf32>,
    return
  }
  func.func @transform_0(%arg0: i32) -> (i32, i32, i32) {
    %c0_i32 = arith.constant 0 : i32
    %c0_i32_0 = arith.constant 0 : i32
    %c0_i32_1 = arith.constant 0 : i32
    return %arg0, %c0_i32, %c0_i32_0 : i32, i32, i32
  }
  func.func @transform_1(%arg0: i32) -> (i32, i32) {
    %c0_i32 = arith.constant 0 : i32
    %c0_i32_0 = arith.constant 0 : i32
    %c0_i32_1 = arith.constant 0 : i32
    return %c0_i32, %c0_i32_0 : i32, i32
  }
  func.func @transform_2(%arg0: i32) -> (i32, i32) {
    %c0_i32 = arith.constant 0 : i32
    %c0_i32_0 = arith.constant 0 : i32
    %c0_i32_1 = arith.constant 0 : i32
    return %c0_i32, %c0_i32_0 : i32, i32
  }
  func.func @transform_3(%arg0: i32) -> (i32, i32) {
    %c0_i32 = arith.constant 0 : i32
    %c0_i32_0 = arith.constant 0 : i32
    %c0_i32_1 = arith.constant 0 : i32
    return %c0_i32, %c0_i32_0 : i32, i32
  }
  func.func @transform_4(%arg0: i32) -> (i32, i32) {
    %c0_i32 = arith.constant 0 : i32
    %c0_i32_0 = arith.constant 0 : i32
    %c0_i32_1 = arith.constant 0 : i32
    return %c0_i32, %c0_i32_0 : i32, i32
  }
  func.func @transform_5(%arg0: i32) -> (i32, i32) {
    %c0_i32 = arith.constant 0 : i32
    %c0_i32_0 = arith.constant 0 : i32
    %c0_i32_1 = arith.constant 0 : i32
    return %c0_i32, %c0_i32_0 : i32, i32
  }
  func.func @transform_6(%arg0: i32) -> (i32, i32) {
    %c0_i32 = arith.constant 0 : i32
    %c0_i32_0 = arith.constant 0 : i32
    %c0_i32_1 = arith.constant 0 : i32
    return %c0_i32, %c0_i32_0 : i32, i32
  }
  func.func @transform_7(%arg0: i32) -> (i32, i32) {
    %c0_i32 = arith.constant 0 : i32
    %c0_i32_0 = arith.constant 0 : i32
    %c0_i32_1 = arith.constant 0 : i32
    return %c0_i32, %c0_i32_0 : i32, i32
  }
  func.func @transform_8(%arg0: i32) -> (i32, i32) {
    %c0_i32 = arith.constant 0 : i32
    %c0_i32_0 = arith.constant 0 : i32
    %c0_i32_1 = arith.constant 0 : i32
    return %c0_i32, %c0_i32_0 : i32, i32
  }
  func.func @transform_9(%arg0: i32) -> (i32, i32, i32) {
    %c0_i32 = arith.constant 0 : i32
    %c0_i32_0 = arith.constant 0 : i32
    %c0_i32_1 = arith.constant 0 : i32
    return %arg0, %c0_i32, %c0_i32_0 : i32, i32, i32
  }
}

</mosaic_0001>

<bundles_post_ra>
// kernel: conformer_encoder.10
= control target key start
LH: loop header
LB: loop body
LE: loop exit
PB: predicated region body
PF: predicated region fallthrough
CT: control target
= control target key end

     0   :  { %s491_s12 = smov 0   ;;  %s536_s0 = inlined_call_operand.vmem [shape: f32[128,9], index: 0, kind: input, shape index: {}]   ;;  %s537_s1 = inlined_call_operand.vmem [shape: f32[9,32], index: 1, kind: input, shape index: {}]   ;;  %s538_s2 = inlined_call_operand.vmem [shape: f32[1,32], index: 2, kind: input, shape index: {}]   ;;  %s539_s3 = inlined_call_operand.vmem [shape: f32[128,32], index: 3, kind: output, shape index: {}]  }
   0x1 LB: > { %s398_s13 = sadd.s32 4294967295, %s468_s12   ;;  %p402_p0 = scmp.ge.s32.totalorder %s468_s12, 1  ;;  %s468_s12 = sphi %s491_s12, %s13_s12  }
   0x2   : > { %p138_p1 = scmp.lt.s32.totalorder %s468_s12, 3 }
   0x4   : > { %p139_p2 = pnand %p402_p0, %p138_p1 }
   0x5   : > { %v182_v0 = vld [vmem:[%s537_s1] sm:$0xff] (!%p139_p2)  ;;  %v183_v1 = vld [vmem:[%s537_s1 + $0x8] sm:$0x1] (!%p139_p2)  ;;  %vm216_vm0 = vcmask (!%p139_p2), 1040384   ;;  %s403_s18 = sshll.u32 (!%p139_p2), %s398_s13, 3  ;;  %vm470_vm1 = vmmov (!%p139_p2), 1  }
   0x6   : > { %142 = sbr.rel (%p139_p2) target bundleno = 241 (0xf1), region = 32  ;;  %v445_v2 = vpack.c.bf16 (!%p139_p2), %v183_v1, %v182_v0  ;;  %vm446_vm2 = vmpackc.low (!%p139_p2), %vm216_vm0, %vm470_vm1  ;;  %p163_p3 = scmp.lt.s32.totalorder (!%p139_p2), %s403_s18, 15  ;;  %vm191_vm3 = vcmask (!%p139_p2), 72704   ;;  %v407_v11 = vld [vmem:[%s538_s2] ss:$0 sm:$0xff] (!%p139_p2)  ;;  %vm333_vm4 = vcmask (!%p139_p2), 261120  }
   0x8   : > { %447 = vmatprep.subr.msk.bf16.mxu0 (!%p139_p2), %vm446_vm2, %v445_v2  ;;  %451 = vmatprep.subr.msk.bf16.mxu1 (!%p139_p2), %vm446_vm2, %v445_v2 }
   0x9   : > { %450 = vmatpush3.bf16.msk.msra.mxu0 (!%p139_p2), %vm446_vm2, %v445_v2  ;;  %452 = vmatpush3.bf16.msk.msra.mxu1 (!%p139_p2), %vm446_vm2, %v445_v2 }
   0xd   : > { %s541_s18 = smov (!%p163_p3, %s403_s18), 15 }
   0xe   : > { %s404_s19 = sshll.u32 %s541_s18, 3 }
   0xf   : > { %s166_s22 = scalar_lea.vmem %s536_s0, %s404_s19  ;;  %s172_s27 = scalar_lea.vmem %s539_s3, %s404_s19 }
  0x10   : > { %v174_v3 = vld [vmem:[%s166_s22] sm:$0xff]  ;;  %v175_v5 = vld [vmem:[%s166_s22 + $0x8] sm:$0xff]  ;;  %v176_v7 = vld [vmem:[%s166_s22 + $0x10] sm:$0xff] }
  0x11   : > { %v178_v4 = vld [vmem:[%s166_s22 + $0x20] sm:$0xff]  ;;  %433 = vmatprep.mubr.msk.f32.mxu0 %vm191_vm3, %v174_v3  ;;  %v179_v6 = vld [vmem:[%s166_s22 + $0x28] sm:$0xff]  ;;  %v180_v8 = vld [vmem:[%s166_s22 + $0x30] sm:$0xff] }
  0x12   : > { %439 = vmatprep.mubr.msk.f32.mxu1 %vm191_vm3, %v178_v4  ;;  %434 = vmatmul.mubr.msk.f32.vlgmr.msra.gmra.mrb[0].mxu0 %vm191_vm3, %v175_v5  ;;  %v177_v9 = vld [vmem:[%s166_s22 + $0x18] sm:$0xff] }
  0x13   : > { %440 = vmatmul.mubr.msk.f32.vlgmr.msra.gmra.mrb[0].mxu1 %vm191_vm3, %v179_v6  ;;  %436 = vmatprep.mubr.msk.f32.mxu0 %vm191_vm3, %v176_v7  ;;  %v181_v10 = vld [vmem:[%s166_s22 + $0x38] sm:$0xff] }
  0x14   : > { %442 = vmatprep.mubr.msk.f32.mxu1 %vm191_vm3, %v180_v8 }
  0x16   : > { %437 = vmatmul.mubr.msk.f32.gmra.mrb[2].mxu0 %vm191_vm3, %v177_v9 }
  0x17   : > { %443 = vmatmul.mubr.msk.f32.gmra.mrb[2].mxu1 %vm191_vm3, %v181_v10 }
  0xe5   : > { %v435_v12 = vpop.f32.mrb[0].mxu0 }
  0xe6   : > { %v441_v13 = vpop.f32.mrb[0].mxu1  ;;  %v292_v14 = vadd.f32 %v435_v12, %v407_v11  ;;  %v286_v16 = vpop.f32.mrb[1].mxu0 }
  0xe7   : > { %v312_v15 = vadd.f32 %v441_v13, %v407_v11  ;;  %v306_v17 = vpop.f32.mrb[1].mxu1  ;;  %v287_v18 = vadd.f32 %v407_v11, %v286_v16 }
  0xe8   : > { %v307_v19 = vadd.f32 %v407_v11, %v306_v17  ;;  %v326_v20 = vmax.f32 %v292_v14, 0.0 }
  0xe9   : > { %v330_v21 = vmax.f32 %v312_v15, 0.0  ;;  %v325_v22 = vmax.f32 %v287_v18, 0.0  ;;  %v438_v24 = vpop.f32.mrb[2].mxu0 }
  0xea   : > { %v329_v23 = vmax.f32 %v307_v19, 0.0  ;;  %v444_v25 = vpop.f32.mrb[2].mxu1  ;;  %335 = vst.msk [vmem:[%s172_s27 + $0x8] sm:$0xff] %vm333_vm4, %v326_v20  ;;  %v302_v26 = vadd.f32 %v438_v24, %v407_v11  ;;  %v296_v28 = vpop.f32.mrb[3].mxu0 }
  0xeb   : > { %339 = vst.msk [vmem:[%s172_s27 + $0x28] sm:$0xff] %vm333_vm4, %v330_v21  ;;  %v322_v27 = vadd.f32 %v444_v25, %v407_v11  ;;  %v316_v29 = vpop.f32.mrb[3].mxu1  ;;  %334 = vst.msk [vmem:[%s172_s27] sm:$0xff] %vm333_vm4, %v325_v22  ;;  %v297_v30 = vadd.f32 %v407_v11, %v296_v28 }
  0xec   : > { %338 = vst.msk [vmem:[%s172_s27 + $0x20] sm:$0xff] %vm333_vm4, %v329_v23  ;;  %v317_v31 = vadd.f32 %v407_v11, %v316_v29  ;;  %v328_v32 = vmax.f32 %v302_v26, 0.0 }
  0xed   : > { %v332_v33 = vmax.f32 %v322_v27, 0.0  ;;  %v327_v34 = vmax.f32 %v297_v30, 0.0 }
  0xee   : > { %v331_v35 = vmax.f32 %v317_v31, 0.0  ;;  %337 = vst.msk [vmem:[%s172_s27 + $0x18] sm:$0xff] %vm333_vm4, %v328_v32 }
  0xef   : > { %341 = vst.msk [vmem:[%s172_s27 + $0x38] sm:$0xff] %vm333_vm4, %v332_v33  ;;  %336 = vst.msk [vmem:[%s172_s27 + $0x10] sm:$0xff] %vm333_vm4, %v327_v34 }
  0xf0   : > { %340 = vst.msk [vmem:[%s172_s27 + $0x30] sm:$0xff] %vm333_vm4, %v331_v35 }
  0xf1 PF: > { %s13_s12 = sadd.s32 1, %s468_s12  }
  0xf2   : > { %p10_p4 = scmp.ge.s32.totalorder %s13_s12, 4  }
  0xf4   :  { %12 = sbr.rel (!%p10_p4) target bundleno = 1 (0x1), region = 62 }

// kernel: conformer_encoder.11
= control target key start
LH: loop header
LB: loop body
LE: loop exit
PB: predicated region body
PF: predicated region fallthrough
CT: control target
= control target key end

     0   :  { %s743_s18 = smov 0   ;;  %s918_s0 = inlined_call_operand.vmem [shape: f32[4,8,288], index: 0, kind: input, shape index: {}]   ;;  %s919_s1 = inlined_call_operand.vmem [shape: f32[288,32], index: 1, kind: input, shape index: {}]   ;;  %s920_s2 = inlined_call_operand.vmem [shape: f32[1,32], index: 2, kind: input, shape index: {}]   ;;  %s921_s3 = inlined_call_operand.vmem [shape: f32[4,32,32], index: 3, kind: input, shape index: {}]   ;;  %s922_s4 = inlined_call_operand.vmem [shape: f32[1,32], index: 4, kind: input, shape index: {}]   ;;  %s923_s5 = inlined_call_operand.vmem [shape: f32[8,32], index: 5, kind: output, shape index: {}]  }
   0x1 LB: > { %s749_s19 = sadd.s32 4294967295, %s707_s18   ;;  %p564_p0 = scmp.ge.s32.totalorder %s707_s18, 1  ;;  %s707_s18 = sphi %s743_s18, %s15_s18  }
   0x2   : > { %p192_p1 = scmp.lt.s32.totalorder %s707_s18, 5 }
   0x4   : > { %p193_p2 = pnand %p564_p0, %p192_p1 }
   0x5   : > { %p220_p3 = scmp.lt.s32.totalorder (!%p193_p2), %s749_s19, 3  ;;  %p568_p4 = scmp.ne.s32.totalorder (!%p193_p2), %s749_s19, 0 }
   0x6   : > { %196 = sbr.rel (%p193_p2) target bundleno = 502 (0x1f6), region = 40 }
   0xd   : > { %s221_s20 = scalar_select %p220_p3, %s749_s19, 3 }
   0xe   : > { %233 = sbr.rel (%p568_p4) target bundleno = 21 (0x15), region = 44  ;;  %vm234_vm0 = vcmask (!%p568_p4), 261120   ;;  %v709_v0 = vmov (!%p568_p4), 0.0  }
   0xf   : > { %s688_s21 = smul.u32 24, %s221_s20  ;;  %s576_s22 = sshll.u32 %s221_s20, 5  ;;  %235 = vst.msk [vmem:[%s923_s5] sm:$0xff] (!%p568_p4), %vm234_vm0, %v709_v0 }
  0x10   : > { %s758_s25 = scalar_lea.vmem %s921_s3, %s576_s22 }
  0x11   : > { %s763_s28 = scalar_lea.vmem %s918_s0, %s688_s21 }
  0x15 PF: > { %v255_v1 = vld [vmem:[%s919_s1 + $0x80] sm:$0xff]  ;;  %v256_v2 = vld [vmem:[%s919_s1 + $0x88] sm:$0xff]  ;;  %v257_v6 = vld [vmem:[%s919_s1 + $0x90] sm:$0xff]  ;;  %v710_v8 = vmov 0.0|0.0   ;;  %vm711_vm1 = vmmov 0   ;;  %v712_v9 = vmov 0.0  }
  0x16   : > { %v239_v3 = vld [vmem:[%s919_s1] sm:$0xff]  ;;  %v644_v4 = vpack.c.bf16 %v256_v2, %v255_v1  ;;  %v240_v5 = vld [vmem:[%s919_s1 + $0x8] sm:$0xff]  ;;  %v258_v7 = vld [vmem:[%s919_s1 + $0x98] sm:$0xff]  ;;  %676 = vmatprep.subr.bf16.mxu1 %v710_v8  ;;  %630 = vmatprep.mubr.msk.f32.mxu1 %vm711_vm1, %v712_v9  ;;  %vm282_vm2 = vcmask 261120   ;;  %p572_p5 = scmp.ne.s32.totalorder %s749_s19, 3 }
  0x17   : > { %v646_v10 = vpack.c.bf16 %v240_v5, %v239_v3  ;;  %v648_v11 = vpack.c.bf16 %v258_v7, %v257_v6  ;;  %v241_v12 = vld [vmem:[%s919_s1 + $0x10] sm:$0xff]  ;;  %v242_v13 = vld [vmem:[%s919_s1 + $0x18] sm:$0xff]  ;;  %v259_v14 = vld [vmem:[%s919_s1 + $0xa0] sm:$0xff] }
  0x18   : > { %645 = vmatprep.subr.bf16.mxu0 %v644_v4  ;;  %v260_v15 = vld [vmem:[%s919_s1 + $0xa8] sm:$0xff]  ;;  %v650_v16 = vpack.c.bf16 %v242_v13, %v241_v12  ;;  %v243_v18 = vld [vmem:[%s919_s1 + $0x20] sm:$0xff]  ;;  %v261_v20 = vld [vmem:[%s919_s1 + $0xb0] sm:$0xff] }
  0x19   : > { %647 = vmatpush3.bf16.msra.mxu0 %v646_v10  ;;  %v652_v17 = vpack.c.bf16 %v260_v15, %v259_v14  ;;  %v244_v19 = vld [vmem:[%s919_s1 + $0x28] sm:$0xff]  ;;  %v262_v21 = vld [vmem:[%s919_s1 + $0xb8] sm:$0xff]  ;;  %v245_v24 = vld [vmem:[%s919_s1 + $0x30] sm:$0xff] }
  0x1a   : > { %649 = vmatprep.subr.bf16.mxu0 %v648_v11  ;;  %v654_v22 = vpack.c.bf16 %v244_v19, %v243_v18  ;;  %v656_v23 = vpack.c.bf16 %v262_v21, %v261_v20  ;;  %v246_v25 = vld [vmem:[%s919_s1 + $0x38] sm:$0xff]  ;;  %v263_v26 = vld [vmem:[%s919_s1 + $0xc0] sm:$0xff]  ;;  %v264_v27 = vld [vmem:[%s919_s1 + $0xc8] sm:$0xff] }
  0x1b   : > { %v271_v28 = vld [vmem:[%s919_s1 + $0x100] sm:$0xff]  ;;  %v272_v29 = vld [vmem:[%s919_s1 + $0x108] sm:$0xff]  ;;  %v658_v31 = vpack.c.bf16 %v246_v25, %v245_v24  ;;  %v273_v33 = vld [vmem:[%s919_s1 + $0x110] sm:$0xff]  ;;  %v660_v35 = vpack.c.bf16 %v264_v27, %v263_v26 }
  0x1c   : > { %v237_v30 = vld [vmem:[%s763_s28 + $0x8] sm:$0xff]  ;;  %v677_v32 = vpack.c.bf16 %v272_v29, %v271_v28  ;;  %v274_v34 = vld [vmem:[%s919_s1 + $0x118] sm:$0xff]  ;;  %v247_v36 = vld [vmem:[%s919_s1 + $0x40] sm:$0xff] }
  0x1d   : > { %651 = vmatpush3.bf16.msra.mxu0 %v650_v16  ;;  %350 = vmatprep.mubr.f32.mxu0 %v237_v30  ;;  %v248_v37 = vld [vmem:[%s919_s1 + $0x48] sm:$0xff]  ;;  %v265_v38 = vld [vmem:[%s919_s1 + $0xd0] sm:$0xff]  ;;  %v266_v39 = vld [vmem:[%s919_s1 + $0xd8] sm:$0xff]  ;;  %v680_v40 = vpack.c.bf16 %v274_v34, %v273_v33 }
  0x1e   : > { %653 = vmatprep.subr.bf16.mxu0 %v652_v17  ;;  %678 = vmatpush3.bf16.msra.mxu1 %v677_v32  ;;  %v662_v41 = vpack.c.bf16 %v248_v37, %v247_v36  ;;  %v664_v42 = vpack.c.bf16 %v266_v39, %v265_v38  ;;  %v249_v43 = vld [vmem:[%s919_s1 + $0x50] sm:$0xff]  ;;  %v250_v44 = vld [vmem:[%s919_s1 + $0x58] sm:$0xff]  ;;  %v267_v45 = vld [vmem:[%s919_s1 + $0xe0] sm:$0xff] }
  0x1f   : > { %679 = vmatprep.subr.bf16.mxu1 %v710_v8  ;;  %v268_v46 = vld [vmem:[%s919_s1 + $0xe8] sm:$0xff]  ;;  %v238_v47 = vld [vmem:[%s763_s28 + $0x10] sm:$0xff]  ;;  %v666_v48 = vpack.c.bf16 %v250_v44, %v249_v43  ;;  %v251_v50 = vld [vmem:[%s919_s1 + $0x60] sm:$0xff] }
  0x20   : > { %v668_v49 = vpack.c.bf16 %v268_v46, %v267_v45  ;;  %v252_v51 = vld [vmem:[%s919_s1 + $0x68] sm:$0xff]  ;;  %v269_v52 = vld [vmem:[%s919_s1 + $0xf0] sm:$0xff]  ;;  %v270_v53 = vld [vmem:[%s919_s1 + $0xf8] sm:$0xff] }
  0x21   : > { %655 = vmatpush3.bf16.msra.mxu0 %v654_v22  ;;  %v670_v54 = vpack.c.bf16 %v252_v51, %v251_v50  ;;  %v672_v55 = vpack.c.bf16 %v270_v53, %v269_v52  ;;  %v253_v56 = vld [vmem:[%s919_s1 + $0x70] sm:$0xff]  ;;  %v254_v57 = vld [vmem:[%s919_s1 + $0x78] sm:$0xff]  ;;  %v236_v59 = vld [vmem:[%s763_s28] sm:$0xff] }
  0x22   : > { %657 = vmatprep.subr.bf16.mxu0 %v656_v23  ;;  %681 = vmatpush3.bf16.msra.mxu1 %v680_v40  ;;  %v674_v58 = vpack.c.bf16 %v254_v57, %v253_v56  ;;  %v428_v60 = vld [vmem:[%s758_s25] sm:$0xff]  ;;  %v429_v61 = vld [vmem:[%s758_s25 + $0x8] sm:$0xff]  ;;  %v430_v63 = vld [vmem:[%s758_s25 + $0x10] sm:$0xff] }
  0x23   : > { %682 = vmatprep.subr.bf16.mxu1 %v710_v8  ;;  %v683_v62 = vpack.c.bf16 %v429_v61, %v428_v60  ;;  %v431_v0 = vld [vmem:[%s758_s25 + $0x18] sm:$0xff]  ;;  %v569_v6 = vld [vmem:[%s920_s2] ss:$0 sm:$0xff] }
  0x24   : > { %v686_v1 = vpack.c.bf16 %v431_v0, %v430_v63  ;;  %v573_v16 = vld [vmem:[%s922_s4] ss:$0 sm:$0xff] (!%p572_p5) }
  0x25   : > { %659 = vmatpush3.bf16.msra.mxu0 %v658_v31  ;;  %631 = vmatmul.mubr.msk.f32.vlgmr.msra.gmra.mrb[0].mxu1 %vm282_vm2, %v238_v47 }
  0x26   : > { %661 = vmatprep.subr.bf16.mxu0 %v660_v35  ;;  %641 = vmatprep.mubr.msk.f32.mxu1 %vm711_vm1, %v712_v9 }
  0x27   : > { %684 = vmatpush3.bf16.msra.mxu1 %v683_v62 }
  0x28   : > { %685 = vmatprep.subr.bf16.mxu1 %v710_v8  ;;  %v427_v8 = vld [vmem:[%s923_s5] sm:$0xff] }
  0x29   : > { %663 = vmatpush3.bf16.msra.mxu0 %v662_v41 }
  0x2a   : > { %665 = vmatprep.subr.bf16.mxu0 %v664_v42 }
  0x2b   : > { %687 = vmatpush3.bf16.msra.mxu1 %v686_v1 }
  0x2d   : > { %667 = vmatpush3.bf16.msra.mxu0 %v666_v48 }
  0x2e   : > { %669 = vmatprep.subr.bf16.mxu0 %v668_v49 }
  0x31   : > { %671 = vmatpush3.bf16.msra.mxu0 %v670_v54 }
  0x32   : > { %673 = vmatprep.subr.bf16.mxu0 %v672_v55 }
  0x35   : > { %675 = vmatpush3.bf16.msra.mxu0 %v674_v58 }
  0x38   : > { %351 = vmatmul.mubr.f32.vlgmr.msra.gmra.mrb[0].mxu0 %v236_v59 }
  0xf8   : > { %v422_v2 = vpop.f32.mrb[0].mxu1 }
  0xf9   : > { %v632_v3 = vpop.f32.mrb[1].mxu1 }
 0x10b   : > { %v609_v4 = vpop.f32.mrb[0].mxu0 }
 0x10c   : > { %v610_v5 = vpop.f32.mrb[1].mxu0 }
 0x10d   : > { %v611_v7 = vadd.f32 %v610_v5, %v609_v4 }
 0x10f   : > { %v353_v9 = vadd.f32 %v611_v7, %v569_v6 }
 0x111   : > { %v423_v10 = vadd.f32 %v422_v2, %v353_v9 }
 0x113   : > { %v426_v11 = vmax.f32 %v423_v10, 0.0 }
 0x115   : > { %642 = vmatmul.mubr.msk.f32.vlgmr.msra.gmra.mrb[2].mxu1 %vm282_vm2, %v426_v11 }
 0x1e5   : > { %510 = sbr.rel (%p572_p5) target bundleno = 502 (0x1f6), region = 48 }
 0x1e8   : > { %v501_v12 = vpop.f32.mrb[2].mxu1 }
 0x1e9   : > { %v505_v13 = vadd.f32 %v501_v12, %v427_v8  ;;  %v643_v14 = vpop.f32.mrb[3].mxu1 }
 0x1eb   : > { %506 = vst.msk [vmem:[%s923_s5] sm:$0xff] %vm282_vm2, %v505_v13 }
 0x1f2   : > { %v511_v15 = vld [vmem:[%s923_s5] sm:$0xff] }
 0x1f3   : > { %v519_v17 = vadd.f32 %v573_v16, %v511_v15 }
 0x1f5   : > { %520 = vst.msk [vmem:[%s923_s5] sm:$0xff] %vm282_vm2, %v519_v17 }
 0x1f6 PF: > { %s15_s18 = sadd.s32 1, %s707_s18  }
 0x1f7   : > { %p12_p6 = scmp.ge.s32.totalorder %s15_s18, 6  }
 0x1f9   :  { %14 = sbr.rel (!%p12_p6) target bundleno = 1 (0x1), region = 77 }

// kernel: conformer_encoder.12
= control target key start
LH: loop header
LB: loop body
LE: loop exit
PB: predicated region body
PF: predicated region fallthrough
CT: control target
= control target key end

     0   :  { %s728_s24 = smov 0   ;;  %s832_s0 = inlined_call_operand.vmem [shape: f32[2,4,32], index: 0, kind: input, shape index: {}, may-alias: {0,7}]   ;;  %s833_s1 = inlined_call_operand.vmem [shape: f32[1,32], index: 1, kind: input, shape index: {}]   ;;  %s834_s2 = inlined_call_operand.vmem [shape: f32[1,32], index: 2, kind: input, shape index: {}]   ;;  %s835_s3 = inlined_call_operand.vmem [shape: f32[32,128], index: 3, kind: input, shape index: {}]   ;;  %s836_s4 = inlined_call_operand.vmem [shape: f32[1,128], index: 4, kind: input, shape index: {}]   ;;  %s837_s5 = inlined_call_operand.vmem [shape: f32[128,32], index: 5, kind: input, shape index: {}]   ;;  %s838_s6 = inlined_call_operand.vmem [shape: f32[1,32], index: 6, kind: input, shape index: {}]   ;;  %s839_s7 = inlined_call_operand.vmem [shape: f32[2,4,32], index: 7, kind: output, shape index: {}, may-alias: {0,7}]  }
   0x1 LB: > { %s547_s25 = sadd.s32 4294967295, %s683_s24   ;;  %p551_p0 = scmp.ge.s32.totalorder %s683_s24, 1  ;;  %s683_s24 = sphi %s728_s24, %s17_s24  }
   0x2   : > { %p236_p1 = scmp.lt.s32.totalorder %s683_s24, 3 }
   0x4   : > { %p237_p2 = pnand %p551_p0, %p236_p1 }
   0x5   : > { %p266_p3 = scmp.lt.s32.totalorder (!%p237_p2), %s547_s25, 1  ;;  %vm277_vm0 = vcmask (!%p237_p2), 257024   ;;  %v306_v7 = vld [vmem:[%s835_s3] sm:$0xff] (!%p237_p2)  ;;  %v307_v8 = vld [vmem:[%s835_s3 + $0x8] sm:$0xff] (!%p237_p2)  ;;  %v308_v9 = vld [vmem:[%s835_s3 + $0x10] sm:$0xff] (!%p237_p2)  ;;  %v685_v10 = vmov (!%p237_p2), 0.0|0.0  }
   0x6   : > { %240 = sbr.rel (%p237_p2) target bundleno = 791 (0x317), region = 48  ;;  %630 = vmatprep.subr.bf16.mxu0 (!%p237_p2), %v685_v10  ;;  %v631_v11 = vpack.c.bf16 (!%p237_p2), %v307_v8, %v306_v7  ;;  %v309_v12 = vld [vmem:[%s835_s3 + $0x18] sm:$0xff] (!%p237_p2)  ;;  %vm686_vm1 = vmmov (!%p237_p2), 0   ;;  %v687_v13 = vmov (!%p237_p2), 0.0   ;;  %636 = vmatprep.subr.bf16.mxu1 (!%p237_p2), %v685_v10  ;;  %v554_v19 = vld [vmem:[%s833_s1] ss:$0 sm:$0xff] (!%p237_p2) }
   0x7   : > { %592 = vmatprep.mubr.msk.f32.mxu0 (!%p237_p2), %vm686_vm1, %v687_v13  ;;  %627 = vmatprep.mubr.msk.f32.mxu1 (!%p237_p2), %vm686_vm1, %v687_v13  ;;  %v634_v14 = vpack.c.bf16 (!%p237_p2), %v309_v12, %v308_v9  ;;  %v555_v21 = vld [vmem:[%s834_s2] ss:$0 sm:$0xff] (!%p237_p2)  ;;  %vm317_vm2 = vcmask (!%p237_p2), 261120   ;;  %v399_v25 = vld [vmem:[%s837_s5 + $0x8] sm:$0xff] (!%p237_p2)  ;;  %v400_v27 = vld [vmem:[%s837_s5 + $0x10] sm:$0xff] (!%p237_p2) }
   0x8   : > { %632 = vmatpush3.bf16.msra.mxu0 (!%p237_p2), %v631_v11  ;;  %v398_v24 = vld [vmem:[%s837_s5] sm:$0xff] (!%p237_p2)  ;;  %v401_v28 = vld [vmem:[%s837_s5 + $0x18] sm:$0xff] (!%p237_p2)  ;;  %v403_v31 = vld [vmem:[%s837_s5 + $0x28] sm:$0xff] (!%p237_p2) }
   0x9   : > { %633 = vmatprep.subr.bf16.mxu0 (!%p237_p2), %v685_v10  ;;  %v637_v26 = vpack.c.bf16 (!%p237_p2), %v399_v25, %v398_v24  ;;  %v640_v29 = vpack.c.bf16 (!%p237_p2), %v401_v28, %v400_v27  ;;  %v402_v30 = vld [vmem:[%s837_s5 + $0x20] sm:$0xff] (!%p237_p2)  ;;  %v404_v33 = vld [vmem:[%s837_s5 + $0x30] sm:$0xff] (!%p237_p2)  ;;  %v405_v34 = vld [vmem:[%s837_s5 + $0x38] sm:$0xff] (!%p237_p2) }
   0xa   : > { %v643_v32 = vpack.c.bf16 (!%p237_p2), %v403_v31, %v402_v30  ;;  %v646_v35 = vpack.c.bf16 (!%p237_p2), %v405_v34, %v404_v33  ;;  %v406_v36 = vld [vmem:[%s837_s5 + $0x40] sm:$0xff] (!%p237_p2)  ;;  %v407_v37 = vld [vmem:[%s837_s5 + $0x48] sm:$0xff] (!%p237_p2)  ;;  %v408_v39 = vld [vmem:[%s837_s5 + $0x50] sm:$0xff] (!%p237_p2) }
   0xb   : > { %638 = vmatpush3.bf16.msra.mxu1 (!%p237_p2), %v637_v26  ;;  %v649_v38 = vpack.c.bf16 (!%p237_p2), %v407_v37, %v406_v36  ;;  %v409_v40 = vld [vmem:[%s837_s5 + $0x58] sm:$0xff] (!%p237_p2)  ;;  %v410_v42 = vld [vmem:[%s837_s5 + $0x60] sm:$0xff] (!%p237_p2)  ;;  %v411_v43 = vld [vmem:[%s837_s5 + $0x68] sm:$0xff] (!%p237_p2) }
   0xc   : > { %635 = vmatpush3.bf16.msra.mxu0 (!%p237_p2), %v634_v14  ;;  %639 = vmatprep.subr.bf16.mxu1 (!%p237_p2), %v685_v10  ;;  %v652_v41 = vpack.c.bf16 (!%p237_p2), %v409_v40, %v408_v39  ;;  %v655_v44 = vpack.c.bf16 (!%p237_p2), %v411_v43, %v410_v42  ;;  %v412_v45 = vld [vmem:[%s837_s5 + $0x70] sm:$0xff] (!%p237_p2)  ;;  %v413_v46 = vld [vmem:[%s837_s5 + $0x78] sm:$0xff] (!%p237_p2)  ;;  %v556_v48 = vld [vmem:[%s836_s4] ss:$0 sm:$0xff] (!%p237_p2) }
   0xd   : > { %s841_s25 = smov (!%p266_p3, %s547_s25), 1  ;;  %v658_v47 = vpack.c.bf16 %v413_v46, %v412_v45  ;;  %v559_v57 = vld [vmem:[%s838_s6] ss:$0 sm:$0xff] }
   0xe   : > { %s552_s26 = sshll.u32 %s841_s25, 2 }
   0xf   : > { %s269_s29 = scalar_lea.vmem %s832_s0, %s552_s26  ;;  %641 = vmatpush3.bf16.msra.mxu1 %v640_v29  ;;  %s273_s17 = scalar_lea.vmem %s839_s7, %s552_s26 }
  0x10   : > { %v744_v0 = vld [vmem:[%s269_s29] sm:$0xf]  ;;  %642 = vmatprep.subr.bf16.mxu1 %v685_v10 }
  0x11   : > { %v278_v1 = vsel %vm277_vm0, %v744_v0, 0.0 }
  0x12   : > { %279 = vadd.xlane.f32.xlu0 %v278_v1 }
  0x13   : > { %644 = vmatpush3.bf16.msra.mxu1 %v643_v32 }
  0x14   : > { %645 = vmatprep.subr.bf16.mxu1 %v685_v10 }
  0x17   : > { %647 = vmatpush3.bf16.msra.mxu1 %v646_v35 }
  0x18   : > { %648 = vmatprep.subr.bf16.mxu1 %v685_v10 }
  0x1b   : > { %650 = vmatpush3.bf16.msra.mxu1 %v649_v38 }
  0x1c   : > { %651 = vmatprep.subr.bf16.mxu1 %v685_v10 }
  0x1f   : > { %653 = vmatpush3.bf16.msra.mxu1 %v652_v41 }
  0x20   : > { %654 = vmatprep.subr.bf16.mxu1 %v685_v10 }
  0x23   : > { %656 = vmatpush3.bf16.msra.mxu1 %v655_v44 }
  0x24   : > { %657 = vmatprep.subr.bf16.mxu1 %v685_v10 }
  0x27   : > { %659 = vmatpush3.bf16.msra.mxu1 %v658_v47 }
  0x9f   : > { %v280_v2 = vpop.xlane.xlu0 %279 }
  0xa0   : > { %v282_v3 = vmul.f32 0.03125, %v280_v2 }
  0xa2   : > { %v283_v4 = vsub.f32 %v744_v0, %v282_v3 }
  0xa4   : > { %v284_v5 = vmul.f32 %v283_v4, %v283_v4 }
  0xa6   : > { %v285_v6 = vsel %vm277_vm0, %v284_v5, 0.0 }
  0xa7   : > { %286 = vadd.xlane.f32.xlu0 %v285_v6 }
 0x134   : > { %v287_v15 = vpop.xlane.xlu0 %286 }
 0x135   : > { %v288_v16 = vmul.f32 0.03125, %v287_v15 }
 0x137   : > { %v289_v17 = vadd.f32 1e-05, %v288_v16 }
 0x139   : > { %671 = vrsqrt.f32 %v289_v17 }
 0x143   : > { %v672_v18 = vpop.eup %671 }
 0x144   : > { %v291_v20 = vmul.f32 %v672_v18, %v283_v4 }
 0x146   : > { %v298_v22 = vmul.f32 %v554_v19, %v291_v20 }
 0x148   : > { %v305_v23 = vadd.f32 %v555_v21, %v298_v22 }
 0x14a   : > { %593 = vmatmul.mubr.msk.f32.vlgmr.msra.gmra.mrb[0].mxu0 %vm317_vm2, %v305_v23 }
 0x21d   : > { %v387_v49 = vpop.f32.mrb[0].mxu0 }
 0x21e   : > { %v388_v50 = vadd.f32 %v556_v48, %v387_v49  ;;  %v594_v51 = vpop.f32.mrb[1].mxu0 }
 0x220   : > { %v558_v52 = vmul.f32 -1.442695, %v388_v50 }
 0x222   : > { %673 = vpow2.f32 %v558_v52 }
 0x22c   : > { %v674_v53 = vpop.eup %673 }
 0x22d   : > { %v394_v54 = vadd.f32 1.0, %v674_v53 }
 0x22f   : > { %675 = vrcp.f32 %v394_v54 }
 0x239   : > { %v676_v55 = vpop.eup %675 }
 0x23a   : > { %v397_v56 = vmul.f32 %v676_v55, %v388_v50 }
 0x23c   : > { %628 = vmatmul.mubr.f32.vlgmr.msra.gmra.mrb[0].mxu1 %v397_v56 }
 0x30f   : > { %v487_v58 = vpop.f32.mrb[0].mxu1 }
 0x310   : > { %v488_v59 = vadd.f32 %v559_v57, %v487_v58  ;;  %v629_v60 = vpop.f32.mrb[1].mxu1 }
 0x312   : > { %v491_v61 = vmul.f32 0.5, %v488_v59 }
 0x314   : > { %v492_v62 = vadd.f32 %v491_v61, %v744_v0 }
 0x316   : > { %493 = vst.msk [vmem:[%s273_s17] sm:$0xf] %vm277_vm0, %v492_v62 }
 0x317 PF: > { %s17_s24 = sadd.s32 1, %s683_s24  }
 0x318   : > { %p14_p4 = scmp.ge.s32.totalorder %s17_s24, 4  }
 0x31a   :  { %16 = sbr.rel (!%p14_p4) target bundleno = 1 (0x1), region = 78 }

// kernel: conformer_encoder.15
= control target key start
LH: loop header
LB: loop body
LE: loop exit
PB: predicated region body
PF: predicated region fallthrough
CT: control target
= control target key end

     0   :  { %s825_s30 = smov 0   ;;  %s937_s0 = inlined_call_operand.vmem [shape: f32[2,4,32], index: 0, kind: input, shape index: {}, may-alias: {0,9}]   ;;  %s938_s1 = inlined_call_operand.vmem [shape: f32[1,32], index: 1, kind: input, shape index: {}]   ;;  %s939_s2 = inlined_call_operand.vmem [shape: f32[1,32], index: 2, kind: input, shape index: {}]   ;;  %s940_s3 = inlined_call_operand.vmem [shape: f32[32,128], index: 3, kind: input, shape index: {}]   ;;  %s941_s4 = inlined_call_operand.vmem [shape: f32[1,128], index: 4, kind: input, shape index: {}]   ;;  %s942_s5 = inlined_call_operand.vmem [shape: f32[128,32], index: 5, kind: input, shape index: {}]   ;;  %s943_s6 = inlined_call_operand.vmem [shape: f32[1,32], index: 6, kind: input, shape index: {}]   ;;  %s944_s7 = inlined_call_operand.vmem [shape: f32[1,32], index: 7, kind: input, shape index: {}]   ;;  %s945_s8 = inlined_call_operand.vmem [shape: f32[1,32], index: 8, kind: input, shape index: {}]   ;;  %s946_s9 = inlined_call_operand.vmem [shape: f32[2,4,32], index: 9, kind: output, shape index: {}, may-alias: {0,9}]  }
   0x1 LB: > { %s630_s10 = sadd.s32 4294967295, %s770_s30   ;;  %p634_p0 = scmp.ge.s32.totalorder %s770_s30, 1  ;;  %s770_s30 = sphi %s825_s30, %s19_s30  }
   0x2   : > { %p286_p1 = scmp.lt.s32.totalorder %s770_s30, 3 }
   0x4   : > { %p287_p2 = pnand %p634_p0, %p286_p1 }
   0x5   : > { %p320_p3 = scmp.lt.s32.totalorder (!%p287_p2), %s630_s10, 1  ;;  %vm331_vm0 = vcmask (!%p287_p2), 257024   ;;  %v360_v7 = vld [vmem:[%s940_s3] sm:$0xff] (!%p287_p2)  ;;  %v361_v8 = vld [vmem:[%s940_s3 + $0x8] sm:$0xff] (!%p287_p2)  ;;  %v362_v9 = vld [vmem:[%s940_s3 + $0x10] sm:$0xff] (!%p287_p2)  ;;  %v772_v10 = vmov (!%p287_p2), 0.0|0.0  }
   0x6   : > { %290 = sbr.rel (%p287_p2) target bundleno = 1104 (0x450), region = 56  ;;  %715 = vmatprep.subr.bf16.mxu0 (!%p287_p2), %v772_v10  ;;  %v716_v11 = vpack.c.bf16 (!%p287_p2), %v361_v8, %v360_v7  ;;  %v363_v12 = vld [vmem:[%s940_s3 + $0x18] sm:$0xff] (!%p287_p2)  ;;  %vm773_vm1 = vmmov (!%p287_p2), 0   ;;  %v774_v13 = vmov (!%p287_p2), 0.0   ;;  %721 = vmatprep.subr.bf16.mxu1 (!%p287_p2), %v772_v10  ;;  %v637_v19 = vld [vmem:[%s938_s1] ss:$0 sm:$0xff] (!%p287_p2) }
   0x7   : > { %677 = vmatprep.mubr.msk.f32.mxu0 (!%p287_p2), %vm773_vm1, %v774_v13  ;;  %712 = vmatprep.mubr.msk.f32.mxu1 (!%p287_p2), %vm773_vm1, %v774_v13  ;;  %v719_v14 = vpack.c.bf16 (!%p287_p2), %v363_v12, %v362_v9  ;;  %v638_v21 = vld [vmem:[%s939_s2] ss:$0 sm:$0xff] (!%p287_p2)  ;;  %vm371_vm2 = vcmask (!%p287_p2), 261120   ;;  %v453_v25 = vld [vmem:[%s942_s5 + $0x8] sm:$0xff] (!%p287_p2)  ;;  %v454_v27 = vld [vmem:[%s942_s5 + $0x10] sm:$0xff] (!%p287_p2) }
   0x8   : > { %717 = vmatpush3.bf16.msra.mxu0 (!%p287_p2), %v716_v11  ;;  %v452_v24 = vld [vmem:[%s942_s5] sm:$0xff] (!%p287_p2)  ;;  %v455_v28 = vld [vmem:[%s942_s5 + $0x18] sm:$0xff] (!%p287_p2)  ;;  %v457_v31 = vld [vmem:[%s942_s5 + $0x28] sm:$0xff] (!%p287_p2) }
   0x9   : > { %718 = vmatprep.subr.bf16.mxu0 (!%p287_p2), %v772_v10  ;;  %v722_v26 = vpack.c.bf16 (!%p287_p2), %v453_v25, %v452_v24  ;;  %v725_v29 = vpack.c.bf16 (!%p287_p2), %v455_v28, %v454_v27  ;;  %v456_v30 = vld [vmem:[%s942_s5 + $0x20] sm:$0xff] (!%p287_p2)  ;;  %v458_v33 = vld [vmem:[%s942_s5 + $0x30] sm:$0xff] (!%p287_p2)  ;;  %v459_v34 = vld [vmem:[%s942_s5 + $0x38] sm:$0xff] (!%p287_p2) }
   0xa   : > { %v728_v32 = vpack.c.bf16 (!%p287_p2), %v457_v31, %v456_v30  ;;  %v731_v35 = vpack.c.bf16 (!%p287_p2), %v459_v34, %v458_v33  ;;  %v460_v36 = vld [vmem:[%s942_s5 + $0x40] sm:$0xff] (!%p287_p2)  ;;  %v461_v37 = vld [vmem:[%s942_s5 + $0x48] sm:$0xff] (!%p287_p2)  ;;  %v462_v39 = vld [vmem:[%s942_s5 + $0x50] sm:$0xff] (!%p287_p2) }
   0xb   : > { %723 = vmatpush3.bf16.msra.mxu1 (!%p287_p2), %v722_v26  ;;  %v734_v38 = vpack.c.bf16 (!%p287_p2), %v461_v37, %v460_v36  ;;  %v463_v40 = vld [vmem:[%s942_s5 + $0x58] sm:$0xff] (!%p287_p2)  ;;  %v464_v42 = vld [vmem:[%s942_s5 + $0x60] sm:$0xff] (!%p287_p2)  ;;  %v465_v43 = vld [vmem:[%s942_s5 + $0x68] sm:$0xff] (!%p287_p2) }
   0xc   : > { %720 = vmatpush3.bf16.msra.mxu0 (!%p287_p2), %v719_v14  ;;  %724 = vmatprep.subr.bf16.mxu1 (!%p287_p2), %v772_v10  ;;  %v737_v41 = vpack.c.bf16 (!%p287_p2), %v463_v40, %v462_v39  ;;  %v740_v44 = vpack.c.bf16 (!%p287_p2), %v465_v43, %v464_v42  ;;  %v466_v45 = vld [vmem:[%s942_s5 + $0x70] sm:$0xff] (!%p287_p2)  ;;  %v467_v46 = vld [vmem:[%s942_s5 + $0x78] sm:$0xff] (!%p287_p2)  ;;  %v639_v48 = vld [vmem:[%s941_s4] ss:$0 sm:$0xff] (!%p287_p2) }
   0xd   : > { %s948_s10 = smov (!%p320_p3, %s630_s10), 1  ;;  %v743_v47 = vpack.c.bf16 %v467_v46, %v466_v45  ;;  %v642_v57 = vld [vmem:[%s943_s6] ss:$0 sm:$0xff] }
   0xe   : > { %s635_s11 = sshll.u32 %s948_s10, 2  ;;  %v644_v11 = vld [vmem:[%s945_s8] ss:$0 sm:$0xff] }
   0xf   : > { %s323_s14 = scalar_lea.vmem %s937_s0, %s635_s11  ;;  %726 = vmatpush3.bf16.msra.mxu1 %v725_v29  ;;  %s327_s15 = scalar_lea.vmem %s946_s9, %s635_s11 }
  0x10   : > { %v841_v0 = vld [vmem:[%s323_s14] sm:$0xf]  ;;  %727 = vmatprep.subr.bf16.mxu1 %v772_v10 }
  0x11   : > { %v332_v1 = vsel %vm331_vm0, %v841_v0, 0.0 }
  0x12   : > { %333 = vadd.xlane.f32.xlu0 %v332_v1 }
  0x13   : > { %729 = vmatpush3.bf16.msra.mxu1 %v728_v32 }
  0x14   : > { %730 = vmatprep.subr.bf16.mxu1 %v772_v10 }
  0x17   : > { %732 = vmatpush3.bf16.msra.mxu1 %v731_v35 }
  0x18   : > { %733 = vmatprep.subr.bf16.mxu1 %v772_v10 }
  0x1b   : > { %735 = vmatpush3.bf16.msra.mxu1 %v734_v38 }
  0x1c   : > { %736 = vmatprep.subr.bf16.mxu1 %v772_v10 }
  0x1f   : > { %738 = vmatpush3.bf16.msra.mxu1 %v737_v41 }
  0x20   : > { %739 = vmatprep.subr.bf16.mxu1 %v772_v10 }
  0x23   : > { %741 = vmatpush3.bf16.msra.mxu1 %v740_v44 }
  0x24   : > { %742 = vmatprep.subr.bf16.mxu1 %v772_v10 }
  0x27   : > { %744 = vmatpush3.bf16.msra.mxu1 %v743_v47 }
  0x9f   : > { %v334_v2 = vpop.xlane.xlu0 %333 }
  0xa0   : > { %v336_v3 = vmul.f32 0.03125, %v334_v2 }
  0xa2   : > { %v337_v4 = vsub.f32 %v841_v0, %v336_v3 }
  0xa4   : > { %v338_v5 = vmul.f32 %v337_v4, %v337_v4 }
  0xa6   : > { %v339_v6 = vsel %vm331_vm0, %v338_v5, 0.0 }
  0xa7   : > { %340 = vadd.xlane.f32.xlu0 %v339_v6 }
 0x134   : > { %v341_v15 = vpop.xlane.xlu0 %340 }
 0x135   : > { %v342_v16 = vmul.f32 0.03125, %v341_v15 }
 0x137   : > { %v343_v17 = vadd.f32 1e-05, %v342_v16 }
 0x139   : > { %756 = vrsqrt.f32 %v343_v17 }
 0x143   : > { %v757_v18 = vpop.eup %756 }
 0x144   : > { %v345_v20 = vmul.f32 %v757_v18, %v337_v4 }
 0x146   : > { %v352_v22 = vmul.f32 %v637_v19, %v345_v20 }
 0x148   : > { %v359_v23 = vadd.f32 %v638_v21, %v352_v22 }
 0x14a   : > { %678 = vmatmul.mubr.msk.f32.vlgmr.msra.gmra.mrb[0].mxu0 %vm371_vm2, %v359_v23 }
 0x21d   : > { %v441_v49 = vpop.f32.mrb[0].mxu0 }
 0x21e   : > { %v442_v50 = vadd.f32 %v639_v48, %v441_v49  ;;  %v679_v51 = vpop.f32.mrb[1].mxu0 }
 0x220   : > { %v641_v52 = vmul.f32 -1.442695, %v442_v50 }
 0x222   : > { %758 = vpow2.f32 %v641_v52 }
 0x22c   : > { %v759_v53 = vpop.eup %758 }
 0x22d   : > { %v448_v54 = vadd.f32 1.0, %v759_v53 }
 0x22f   : > { %760 = vrcp.f32 %v448_v54 }
 0x239   : > { %v761_v55 = vpop.eup %760 }
 0x23a   : > { %v451_v56 = vmul.f32 %v761_v55, %v442_v50 }
 0x23c   : > { %713 = vmatmul.mubr.f32.vlgmr.msra.gmra.mrb[0].mxu1 %v451_v56 }
 0x30f   : > { %v541_v58 = vpop.f32.mrb[0].mxu1 }
 0x310   : > { %v542_v59 = vadd.f32 %v642_v57, %v541_v58  ;;  %v714_v60 = vpop.f32.mrb[1].mxu1 }
 0x312   : > { %v545_v61 = vmul.f32 0.5, %v542_v59 }
 0x314   : > { %v546_v62 = vadd.f32 %v545_v61, %v841_v0  ;;  %v643_v0 = vld [vmem:[%s944_s7] ss:$0 sm:$0xff] }
 0x316   : > { %v549_v63 = vsel %vm331_vm0, %v546_v62, 0.0 }
 0x317   : > { %550 = vadd.xlane.f32.xlu1 %v549_v63 }
 0x3a4   : > { %v551_v1 = vpop.xlane.xlu1 %550 }
 0x3a5   : > { %v552_v2 = vmul.f32 0.03125, %v551_v1 }
 0x3a7   : > { %v553_v3 = vsub.f32 %v546_v62, %v552_v2 }
 0x3a9   : > { %v554_v4 = vmul.f32 %v553_v3, %v553_v3 }
 0x3ab   : > { %v555_v5 = vsel %vm331_vm0, %v554_v4, 0.0 }
 0x3ac   : > { %556 = vadd.xlane.f32.xlu1 %v555_v5 }
 0x439   : > { %v557_v6 = vpop.xlane.xlu1 %556 }
 0x43a   : > { %v558_v7 = vmul.f32 0.03125, %v557_v6 }
 0x43c   : > { %v559_v8 = vadd.f32 1e-05, %v558_v7 }
 0x43e   : > { %762 = vrsqrt.f32 %v559_v8 }
 0x448   : > { %v763_v9 = vpop.eup %762 }
 0x449   : > { %v561_v10 = vmul.f32 %v763_v9, %v553_v3 }
 0x44b   : > { %v568_v12 = vmul.f32 %v643_v0, %v561_v10 }
 0x44d   : > { %v575_v13 = vadd.f32 %v644_v11, %v568_v12 }
 0x44f   : > { %576 = vst.msk [vmem:[%s327_s15] sm:$0xf] %vm331_vm0, %v575_v13 }
 0x450 PF: > { %s19_s30 = sadd.s32 1, %s770_s30  }
 0x451   : > { %p16_p4 = scmp.ge.s32.totalorder %s19_s30, 4  }
 0x453   :  { %18 = sbr.rel (!%p16_p4) target bundleno = 1 (0x1), region = 86 }

// kernel: conformer_encoder.14
= control target key start
LH: loop header
LB: loop body
LE: loop exit
PB: predicated region body
PF: predicated region fallthrough
CT: control target
= control target key end

     0   :  { %s935_s21 = smov 0   ;;  %s1040_s0 = inlined_call_operand.vmem [shape: f32[2,4,32], index: 0, kind: input, shape index: {}, may-alias: {0,12}]   ;;  %s1041_s1 = inlined_call_operand.vmem [shape: f32[1,32], index: 1, kind: input, shape index: {}]   ;;  %s1042_s2 = inlined_call_operand.vmem [shape: f32[1,32], index: 2, kind: input, shape index: {}]   ;;  %s1043_s3 = inlined_call_operand.vmem [shape: f32[32,64], index: 3, kind: input, shape index: {}]   ;;  %s1044_s4 = inlined_call_operand.vmem [shape: f32[1,64], index: 4, kind: input, shape index: {}]   ;;  %s1045_s5 = inlined_call_operand.vmem [shape: f32[7,32], index: 5, kind: input, shape index: {}]   ;;  %s1046_s6 = inlined_call_operand.vmem [shape: f32[1,32], index: 6, kind: input, shape index: {}]   ;;  %s1047_s7 = inlined_call_operand.vmem [shape: f32[1,32], index: 7, kind: input, shape index: {}]   ;;  %s1048_s8 = inlined_call_operand.vmem [shape: f32[1,32], index: 8, kind: input, shape index: {}]   ;;  %s1049_s9 = inlined_call_operand.vmem [shape: f32[1,32], index: 9, kind: input, shape index: {}]   ;;  %s1050_s10 = inlined_call_operand.vmem [shape: f32[32,32], index: 10, kind: input, shape index: {}]   ;;  %s1051_s11 = inlined_call_operand.vmem [shape: f32[1,32], index: 11, kind: input, shape index: {}]   ;;  %s1052_s12 = inlined_call_operand.vmem [shape: f32[2,4,32], index: 12, kind: output, shape index: {}, may-alias: {0,12}]  }
   0x1 LB: > { %s766_s22 = sadd.s32 4294967295, %s864_s21   ;;  %p770_p0 = scmp.ge.s32.totalorder %s864_s21, 1  ;;  %s864_s21 = sphi %s935_s21, %s22_s21  }
   0x2   : > { %p361_p1 = scmp.lt.s32.totalorder %s864_s21, 3 }
   0x4   : > { %p362_p2 = pnand %p770_p0, %p361_p1 }
   0x5   : > { %p401_p3 = scmp.lt.s32.totalorder (!%p362_p2), %s766_s22, 1  ;;  %vm412_vm0 = vcmask (!%p362_p2), 257024   ;;  %v441_v7 = vld [vmem:[%s1043_s3] sm:$0xff] (!%p362_p2)  ;;  %v442_v8 = vld [vmem:[%s1043_s3 + $0x8] sm:$0xff] (!%p362_p2)  ;;  %v443_v9 = vld [vmem:[%s1043_s3 + $0x10] sm:$0xff] (!%p362_p2)  ;;  %v866_v10 = vmov (!%p362_p2), 0.0|0.0   ;;  %v607_v47 = vlaneseq (!%p362_p2) }
   0x6   : > { %365 = sbr.rel (%p362_p2) target bundleno = 959 (0x3bf), region = 68  ;;  %822 = vmatprep.subr.bf16.mxu0 (!%p362_p2), %v866_v10  ;;  %v823_v11 = vpack.c.bf16 (!%p362_p2), %v442_v8, %v441_v7  ;;  %v444_v12 = vld [vmem:[%s1043_s3 + $0x18] sm:$0xff] (!%p362_p2)  ;;  %vm867_vm1 = vmmov (!%p362_p2), 0   ;;  %v868_v13 = vmov (!%p362_p2), 0.0   ;;  %vm538_vm2 = vcmask (!%p362_p2), 254976   ;;  %828 = vmatprep.subr.bf16.mxu1 (!%p362_p2), %v866_v10  ;;  %v627_v31 = vld [vmem:[%s1050_s10] sm:$0xff] (!%p362_p2) }
   0x7   : > { %808 = vmatprep.mubr.msk.f32.mxu0 (!%p362_p2), %vm867_vm1, %v868_v13  ;;  %539 = vst.msk [vmem:[#allocation2 + $0x8] sm:$0x3] (!%p362_p2), %vm538_vm2, %v868_v13  ;;  %819 = vmatprep.mubr.msk.f32.mxu1 (!%p362_p2), %vm867_vm1, %v868_v13  ;;  %v826_v14 = vpack.c.bf16 (!%p362_p2), %v444_v12, %v443_v9  ;;  %vm452_vm3 = vcmask (!%p362_p2), 261120   ;;  %v773_v19 = vld [vmem:[%s1041_s1] ss:$0 sm:$0xff] (!%p362_p2)  ;;  %v628_v32 = vld [vmem:[%s1050_s10 + $0x8] sm:$0xff] (!%p362_p2) }
   0x8   : > { %824 = vmatpush3.bf16.msra.mxu0 (!%p362_p2), %v823_v11  ;;  %537 = vst.msk [vmem:[#allocation2] sm:$0xff] (!%p362_p2), %vm452_vm3, %v868_v13  ;;  %v774_v21 = vld [vmem:[%s1042_s2] ss:$0 sm:$0xff] (!%p362_p2)  ;;  %v629_v33 = vld [vmem:[%s1050_s10 + $0x10] sm:$0xff] (!%p362_p2)  ;;  %v829_v34 = vpack.c.bf16 (!%p362_p2), %v628_v32, %v627_v31  ;;  %v630_v35 = vld [vmem:[%s1050_s10 + $0x18] sm:$0xff] (!%p362_p2)  ;;  %s869_s16 = smov (!%p362_p2), 96  }
   0x9   : > { %825 = vmatprep.subr.bf16.mxu0 (!%p362_p2), %v866_v10  ;;  %v775_v24 = vld [vmem:[%s1044_s4] ss:$0 sm:$0xff] (!%p362_p2)  ;;  %v832_v36 = vpack.c.bf16 (!%p362_p2), %v630_v35, %v629_v33  ;;  %v779_v44 = vld [vmem:[%s1045_s5 + $0x1] ss:$0 sm:$0xff] (!%p362_p2)  ;;  %v780_v46 = vld [vmem:[%s1045_s5 + $0x2] ss:$0 sm:$0xff] (!%p362_p2) }
   0xa   : > { %830 = vmatpush3.bf16.msra.mxu1 (!%p362_p2), %v829_v34  ;;  %v598_v38 = vld [vmem:[%s1049_s9] sm:$0x1] (!%p362_p2)  ;;  %v781_v55 = vld [vmem:[%s1045_s5 + $0x3] ss:$0 sm:$0xff] (!%p362_p2)  ;;  %v608_v59 = vshrl.u32 (!%p362_p2), %v607_v47, 7 }
   0xb   : > { %831 = vmatprep.subr.bf16.mxu1 (!%p362_p2), %v866_v10  ;;  %v599_v39 = vadd.f32 (!%p362_p2), 1e-05, %v598_v38  ;;  %v778_v43 = vld [vmem:[%s1045_s5] ss:$0 sm:$0xff] (!%p362_p2)  ;;  %v782_v61 = vld [vmem:[%s1045_s5 + $0x4] ss:$0 sm:$0xff] (!%p362_p2) }
   0xc   : > { %827 = vmatpush3.bf16.msra.mxu0 (!%p362_p2), %v826_v14  ;;  %v597_v45 = vld [vmem:[%s1046_s6] sm:$0x1] (!%p362_p2)  ;;  %v609_v7 = vsub.s32 (!%p362_p2), 0, %v608_v59  ;;  %v784_v9 = vld [vmem:[%s1045_s5 + $0x6] ss:$0 sm:$0xff] (!%p362_p2) }
   0xd   : > { %s1054_s22 = smov (!%p401_p3, %s766_s22), 1  ;;  %v603_v56 = vld [vmem:[%s1048_s8] sm:$0x1] }
   0xe   : > { %s771_s23 = sshll.u32 %s1054_s22, 2  ;;  %833 = vmatpush3.bf16.msra.mxu1 %v832_v36 }
   0xf   : > { %s404_s26 = scalar_lea.vmem %s1040_s0, %s771_s23  ;;  %s408_s13 = scalar_lea.vmem %s1052_s12, %s771_s23 }
  0x10   : > { %v951_v0 = vld [vmem:[%s404_s26] sm:$0xf] }
  0x11   : > { %v413_v1 = vsel %vm412_vm0, %v951_v0, 0.0 }
  0x12   : > { %414 = vadd.xlane.f32.xlu0 %v413_v1 }
  0x9f   : > { %v415_v2 = vpop.xlane.xlu0 %414 }
  0xa0   : > { %v417_v3 = vmul.f32 0.03125, %v415_v2 }
  0xa2   : > { %v418_v4 = vsub.f32 %v951_v0, %v417_v3  ;;  %v783_v3 = vld [vmem:[%s1045_s5 + $0x5] ss:$0 sm:$0xff] }
  0xa4   : > { %v419_v5 = vmul.f32 %v418_v4, %v418_v4 }
  0xa6   : > { %v420_v6 = vsel %vm412_vm0, %v419_v5, 0.0 }
  0xa7   : > { %421 = vadd.xlane.f32.xlu0 %v420_v6 }
 0x134   : > { %v422_v15 = vpop.xlane.xlu0 %421 }
 0x135   : > { %v423_v16 = vmul.f32 0.03125, %v422_v15 }
 0x137   : > { %v424_v17 = vadd.f32 1e-05, %v423_v16 }
 0x139   : > { %846 = vrsqrt.f32 %v424_v17 }
 0x143   : > { %v847_v18 = vpop.eup %846 }
 0x144   : > { %v426_v20 = vmul.f32 %v847_v18, %v418_v4  ;;  %v602_v4 = vld [vmem:[%s1047_s7] sm:$0x1] }
 0x146   : > { %v433_v22 = vmul.f32 %v773_v19, %v426_v20 }
 0x148   : > { %v440_v23 = vadd.f32 %v774_v21, %v433_v22 }
 0x14a   : > { %809 = vmatmul.mubr.msk.f32.vlgmr.msra.gmra.mrb[0].mxu0 %vm452_vm3, %v440_v23 }
 0x21d   : > { %v522_v25 = vpop.f32.mrb[0].mxu0 }
 0x21e   : > { %v523_v26 = vadd.f32 %v775_v24, %v522_v25  ;;  %v810_v27 = vpop.f32.mrb[1].mxu0  ;;  %v786_v25 = vld [vmem:[%s1051_s11] ss:$0 sm:$0xff] }
 0x220   : > { %v777_v28 = vmul.f32 -1.442695, %v523_v26 }
 0x222   : > { %848 = vpow2.f32 %v777_v28 }
 0x22c   : > { %v849_v29 = vpop.eup %848 }
 0x22d   : > { %v529_v30 = vadd.f32 1.0, %v849_v29 }
 0x22f   : > { %850 = vrcp.f32 %v529_v30 }
 0x230   : > { %852 = vrsqrt.f32 %v599_v39 }
 0x239   : > { %v851_v37 = vpop.eup %850 }
 0x23a   : > { %533 = vrot.lane.b32.xlu1 %v851_v37, %s869_s16  ;;  %v853_v42 = vpop.eup %852 }
 0x23b   : > { %v601_v53 = vmul.f32 %v853_v42, %v597_v45 }
 0x23d   : > { %v604_v1 = vmul.f32 %v603_v56, %v601_v53  ;;  %v610_v15 = vrot.slane %v601_v53, %v609_v7 }
 0x23f   : > { %v605_v12 = vsub.f32 %v602_v4, %v604_v1 }
 0x241   : > { %v617_v17 = vrot.slane %v605_v12, %v609_v7 }
 0x2ac   : > { %v534_v40 = vpop.permute.xlu1 %533 }
 0x2ad   : > { %v536_v41 = vmul.f32 %v534_v40, %v523_v26 }
 0x2af   : > { %540 = vst.msk [vmem:[#allocation2 + $0x3] sm:$0xf] %vm412_vm0, %v536_v41 }
 0x2b6   : > { %v541_v48 = vld [vmem:[#allocation2] sm:$0xf]  ;;  %v573_v60 = vld [vmem:[#allocation2 + $0x4] sm:$0xf] }
 0x2b7   : > { %v549_v49 = vld [vmem:[#allocation2 + $0x1] sm:$0xf]  ;;  %v547_v51 = vmul.f32 %v778_v43, %v541_v48  ;;  %v581_v2 = vld [vmem:[#allocation2 + $0x5] sm:$0xf]  ;;  %v579_v6 = vmul.f32 %v782_v61, %v573_v60 }
 0x2b8   : > { %v557_v50 = vld [vmem:[#allocation2 + $0x2] sm:$0xf]  ;;  %v555_v52 = vmul.f32 %v779_v44, %v549_v49  ;;  %v589_v8 = vld [vmem:[#allocation2 + $0x6] sm:$0xf]  ;;  %v587_v11 = vmul.f32 %v783_v3, %v581_v2 }
 0x2b9   : > { %v565_v54 = vld [vmem:[#allocation2 + $0x3] sm:$0xf]  ;;  %v563_v58 = vmul.f32 %v780_v46, %v557_v50  ;;  %v595_v14 = vmul.f32 %v784_v9, %v589_v8 }
 0x2ba   : > { %v556_v57 = vadd.f32 %v555_v52, %v547_v51  ;;  %v571_v63 = vmul.f32 %v781_v55, %v565_v54 }
 0x2bc   : > { %v564_v62 = vadd.f32 %v563_v58, %v556_v57 }
 0x2be   : > { %v572_v5 = vadd.f32 %v571_v63, %v564_v62 }
 0x2c0   : > { %v580_v10 = vadd.f32 %v579_v6, %v572_v5 }
 0x2c2   : > { %v588_v13 = vadd.f32 %v587_v11, %v580_v10 }
 0x2c4   : > { %v596_v16 = vadd.f32 %v595_v14, %v588_v13 }
 0x2c6   : > { %v612_v18 = vmul.f32 %v610_v15, %v596_v16 }
 0x2c8   : > { %v619_v19 = vadd.f32 %v617_v17, %v612_v18 }
 0x2ca   : > { %v785_v20 = vmul.f32 -1.442695, %v619_v19 }
 0x2cc   : > { %854 = vpow2.f32 %v785_v20 }
 0x2d6   : > { %v855_v21 = vpop.eup %854 }
 0x2d7   : > { %v623_v22 = vadd.f32 1.0, %v855_v21 }
 0x2d9   : > { %856 = vrcp.f32 %v623_v22 }
 0x2e3   : > { %v857_v23 = vpop.eup %856 }
 0x2e4   : > { %v626_v24 = vmul.f32 %v857_v23, %v619_v19 }
 0x2e6   : > { %820 = vmatmul.mubr.msk.f32.vlgmr.msra.gmra.mrb[0].mxu1 %vm452_vm3, %v626_v24 }
 0x3b9   : > { %v707_v26 = vpop.f32.mrb[0].mxu1 }
 0x3ba   : > { %v708_v27 = vadd.f32 %v786_v25, %v707_v26  ;;  %v821_v28 = vpop.f32.mrb[1].mxu1 }
 0x3bc   : > { %v711_v29 = vadd.f32 %v708_v27, %v951_v0 }
 0x3be   : > { %712 = vst.msk [vmem:[%s408_s13] sm:$0xf] %vm412_vm0, %v711_v29 }
 0x3bf PF: > { %s22_s21 = sadd.s32 1, %s864_s21  }
 0x3c0   : > { %p19_p4 = scmp.ge.s32.totalorder %s22_s21, 4  }
 0x3c2   :  { %21 = sbr.rel (!%p19_p4) target bundleno = 1 (0x1), region = 98 }

// kernel: conformer_encoder.13
= control target key start
LH: loop header
LB: loop body
LE: loop exit
PB: predicated region body
PF: predicated region fallthrough
CT: control target
= control target key end

     0   :  { %s4459_s17 = smov 0   ;;  %s4917_s0 = inlined_call_operand.vmem [shape: f32[2,4,32], index: 0, kind: input, shape index: {}, may-alias: {0,11}]   ;;  %s4918_s1 = inlined_call_operand.vmem [shape: f32[1,32], index: 1, kind: input, shape index: {}]   ;;  %s4919_s2 = inlined_call_operand.vmem [shape: f32[1,32], index: 2, kind: input, shape index: {}]   ;;  %s4920_s3 = inlined_call_operand.vmem [shape: f32[32,96], index: 3, kind: input, shape index: {}]   ;;  %s4921_s4 = inlined_call_operand.vmem [shape: f32[1,96], index: 4, kind: input, shape index: {}]   ;;  %s4922_s5 = inlined_call_operand.vmem [shape: f32[4,32], index: 5, kind: input, shape index: {}]   ;;  %s4923_s6 = inlined_call_operand.vmem [shape: f32[32,32], index: 6, kind: input, shape index: {}]   ;;  %s4924_s7 = inlined_call_operand.vmem [shape: f32[4,8], index: 7, kind: input, shape index: {}]   ;;  %s4925_s8 = inlined_call_operand.vmem [shape: f32[4,8], index: 8, kind: input, shape index: {}]   ;;  %s4926_s9 = inlined_call_operand.vmem [shape: f32[32,32], index: 9, kind: input, shape index: {}]   ;;  %s4927_s10 = inlined_call_operand.vmem [shape: f32[1,32], index: 10, kind: input, shape index: {}]   ;;  %s4928_s11 = inlined_call_operand.vmem [shape: f32[2,4,32], index: 11, kind: output, shape index: {}, may-alias: {0,11}]  }
   0x1 LB: > { %s3883_s18 = sadd.s32 4294967295, %s4380_s17   ;;  %p3887_p0 = scmp.ge.s32.totalorder %s4380_s17, 1  ;;  %s4380_s17 = sphi %s4459_s17, %s21_s17  }
   0x2   : > { %p336_p1 = scmp.lt.s32.totalorder %s4380_s17, 3 }
   0x4   : > { %p337_p2 = pnand %p3887_p0, %p336_p1 }
   0x5   : > { %p374_p3 = scmp.lt.s32.totalorder (!%p337_p2), %s3883_s18, 1  ;;  %vm385_vm0 = vcmask (!%p337_p2), 257024   ;;  %v500_v2 = vld [vmem:[%s4923_s6] sm:$0xff] (!%p337_p2)  ;;  %v501_v3 = vld [vmem:[%s4923_s6 + $0x8] sm:$0xff] (!%p337_p2)  ;;  %v502_v4 = vld [vmem:[%s4923_s6 + $0x10] sm:$0xff] (!%p337_p2)  ;;  %v4382_v5 = vmov (!%p337_p2), 0.0|0.0   ;;  %v577_v34 = vlaneseq (!%p337_p2) }
   0x6   : > { %340 = sbr.rel (%p337_p2) target bundleno = 4039 (0xfc7), region = 64  ;;  %4308 = vmatprep.subr.bf16.mxu1 (!%p337_p2), %v4382_v5  ;;  %v4309_v6 = vpack.c.bf16 (!%p337_p2), %v501_v3, %v500_v2  ;;  %v503_v7 = vld [vmem:[%s4923_s6 + $0x18] sm:$0xff] (!%p337_p2)  ;;  %vm4383_vm1 = vmmov (!%p337_p2), 0   ;;  %v4384_v8 = vmov (!%p337_p2), 0.0   ;;  %4302 = vmatprep.subr.bf16.mxu0 (!%p337_p2), %v4382_v5  ;;  %vm425_vm2 = vcmask (!%p337_p2), 261120   ;;  %v414_v16 = vld [vmem:[%s4920_s3] sm:$0xff] (!%p337_p2) }
   0x7   : > { %4099 = vmatprep.mubr.msk.f32.mxu1 (!%p337_p2), %vm4383_vm1, %v4384_v8  ;;  %4088 = vmatprep.mubr.msk.f32.mxu0 (!%p337_p2), %vm4383_vm1, %v4384_v8  ;;  %v4312_v9 = vpack.c.bf16 (!%p337_p2), %v503_v7, %v502_v4  ;;  %v499_v10 = vld [vmem:[%s4922_s5] sm:$0xf] (!%p337_p2)  ;;  %v415_v17 = vld [vmem:[%s4920_s3 + $0x8] sm:$0xff] (!%p337_p2)  ;;  %v416_v18 = vld [vmem:[%s4920_s3 + $0x10] sm:$0xff] (!%p337_p2)  ;;  %s4385_s26 = smov (!%p337_p2), 120   ;;  %s4386_s29 = smov (!%p337_p2), 8  }
   0x8   : > { %4310 = vmatpush3.bf16.msra.mxu1 (!%p337_p2), %v4309_v6  ;;  %v4303_v19 = vpack.c.bf16 (!%p337_p2), %v415_v17, %v414_v16  ;;  %v417_v20 = vld [vmem:[%s4920_s3 + $0x18] sm:$0xff] (!%p337_p2)  ;;  %v3923_v24 = vld [vmem:[%s4924_s7 + $0x1] ss:$0 sm:$0xff] (!%p337_p2)  ;;  %v3890_v29 = vld [vmem:[%s4918_s1] ss:$0 sm:$0xff] (!%p337_p2)  ;;  %vm632_vm3 = vcmask (!%p337_p2), 64512  }
   0x9   : > { %4311 = vmatprep.subr.bf16.mxu1 (!%p337_p2), %v4382_v5  ;;  %v4306_v21 = vpack.c.bf16 (!%p337_p2), %v417_v20, %v416_v18  ;;  %v3891_v31 = vld [vmem:[%s4919_s2] ss:$0 sm:$0xff] (!%p337_p2)  ;;  %v4539_v36 = vshrl.u32 (!%p337_p2), %v577_v34, 7  ;;  %v580_v37 = vand.u32 (!%p337_p2), 127, %v577_v34  ;;  %vm714_vm6 = vcmask (!%p337_p2), 1043456   ;;  %s4387_s23 = smov (!%p337_p2), 96  }
   0xa   : > { %4304 = vmatpush3.bf16.msra.mxu0 (!%p337_p2), %v4303_v19  ;;  %v3892_v35 = vld [vmem:[%s4921_s4] ss:$0 sm:$0xff] (!%p337_p2)  ;;  %v3924_v44 = vld [vmem:[%s4925_s8 + $0x1] ss:$0 sm:$0xff] (!%p337_p2)  ;;  %s4389_s30 = smov (!%p337_p2), 88   ;;  %s4391_s12 = smov (!%p337_p2), 112  }
   0xb   : > { %4305 = vmatprep.subr.bf16.mxu0 (!%p337_p2), %v4382_v5  ;;  %v3904_v39 = vld [vmem:[%s4925_s8] ss:$0 sm:$0xff] (!%p337_p2)  ;;  %vm604_vm4 = vcmp.ge.s32.totalorder (!%p337_p2), %v580_v37, 2  ;;  %v3899_v40 = vadd.s32 (!%p337_p2), 4294967294, %v580_v37  ;;  %v3901_v46 = vadd.s32 (!%p337_p2), 4294967293, %v580_v37  ;;  %vm610_vm8 = vcmp.ge.s32.totalorder (!%p337_p2), %v580_v37, 3 }
   0xc   : > { %4313 = vmatpush3.bf16.msra.mxu1 (!%p337_p2), %v4312_v9  ;;  %v582_v51 = vadd.s32 (!%p337_p2), 3, %v580_v37  ;;  %v588_v52 = vadd.s32 (!%p337_p2), 2, %v580_v37  ;;  %vm581_vm11 = vcmp.le.s32.totalorder (!%p337_p2), %v580_v37, 0  ;;  %vm587_vm13 = vcmp.le.s32.totalorder (!%p337_p2), %v580_v37, 1  ;;  %v3903_v63 = vld [vmem:[%s4924_s7] ss:$0 sm:$0xff] (!%p337_p2) }
   0xd   : > { %s4930_s18 = smov (!%p374_p3, %s3883_s18), 1  ;;  %4107 = vmatprep.subr.mxu1 %v4384_v8  ;;  %vm606_vm5 = vcmp.eq.s32.totalorder %v4539_v36, %v3899_v40  ;;  %vm612_vm9 = vcmp.eq.s32.totalorder %v4539_v36, %v3901_v46  ;;  %v594_v53 = vadd.s32 1, %v580_v37  ;;  %v4635_v3 = vsub.s32 0, %v4539_v36  ;;  %s4392_s15 = smov 16  }
   0xe   : > { %s3888_s19 = sshll.u32 %s4930_s18, 2  ;;  %4307 = vmatpush3.bf16.msra.mxu0 %v4306_v21  ;;  %vm607_vm7 = vmand %vm604_vm4, %vm606_vm5  ;;  %vm583_vm12 = vcmp.eq.s32.totalorder %v4539_v36, %v582_v51  ;;  %vm589_vm14 = vcmp.eq.s32.totalorder %v4539_v36, %v588_v52  ;;  %vm711_vm4 = vcmask 31744   ;;  %vm593_vm5 = vcmp.le.s32.totalorder %v580_v37, 2  ;;  %s4393_s27 = smov 80  }
   0xf   : > { %s4475_s22 = scalar_lea.vmem %s4917_s0, %s3888_s19  ;;  %4100 = vmatmul.mubr.msk.f32.vlgmr.msra.gmra.mrb[0].mxu1 %vm425_vm2, %v499_v10  ;;  %4102 = vmatprep.subr.mxu0 %v4384_v8  ;;  %v4553_v45 = vsel %vm607_vm7, 1.0, %v4384_v8  ;;  %vm613_vm10 = vmand %vm610_vm8, %vm612_vm9  ;;  %vm595_vm7 = vcmp.eq.s32.totalorder %v4539_v36, %v594_v53  ;;  %vm599_vm8 = vcmp.le.s32.totalorder %v580_v37, 3  ;;  %vm600_vm9 = vcmp.eq.s32.totalorder %v4539_v36, %v580_v37  ;;  %s4398_s21 = smov 40  }
  0x10   : > { %v382_v0 = vld [vmem:[%s4475_s22] sm:$0xf]  ;;  %4109 = vmatprep.mubr.msk.f32.mxu1 %vm4383_vm1, %v4384_v8  ;;  %4108 = vmatpush3.msk.msra.mxu1 %vm714_vm6, %v4553_v45  ;;  %v4564_v47 = vsel %vm613_vm10, 1.0, %v4384_v8  ;;  %vm584_vm15 = vmand %vm581_vm11, %vm583_vm12  ;;  %vm616_vm12 = vcmp.eq.s32.totalorder %v4539_v36, 0 }
  0x11   : > { %v386_v1 = vsel %vm385_vm0, %v382_v0, 0.0  ;;  %4112 = vmatprep.subr.mxu1 %v4384_v8  ;;  %v4574_v58 = vsel %vm584_vm15, 1.0, %v4384_v8  ;;  %vm596_vm10 = vmand %vm593_vm5, %vm595_vm7  ;;  %vm619_vm15 = vcmp.eq.s32.totalorder %v4539_v36, 3 }
  0x12   : > { %387 = vadd.xlane.f32.xlu0 %v386_v1  ;;  %vm601_vm11 = vmand %vm599_vm8, %vm600_vm9  ;;  %v4594_v60 = vsel %vm596_vm10, 1.0, %v4384_v8 }
  0x13   : > { %v4597_v61 = vsel %vm601_vm11, 1.0, %v4384_v8 }
  0x9f   : > { %v388_v11 = vpop.xlane.xlu0 %387 }
  0xa0   : > { %v390_v12 = vmul.f32 0.03125, %v388_v11 }
  0xa2   : > { %v391_v13 = vsub.f32 %v382_v0, %v390_v12 }
  0xa4   : > { %v392_v14 = vmul.f32 %v391_v13, %v391_v13 }
  0xa6   : > { %v393_v15 = vsel %vm385_vm0, %v392_v14, 0.0 }
  0xa7   : > { %394 = vadd.xlane.f32.xlu0 %v393_v15 }
  0xe2   : > { %v4516_v22 = vpop.f32.mrb[0].mxu1 }
  0xe3   : > { %1377 = vrot.lane.b32.xlu0 %v4516_v22, %s4385_s26  ;;  %v4101_v23 = vpop.f32.mrb[1].mxu1 }
  0xe7   : > { %1360 = vrot.lane.b32.xlu0 %v3923_v24, %s4386_s29 }
 0x134   : > { %v395_v25 = vpop.xlane.xlu0 %394 }
 0x135   : > { %v396_v26 = vmul.f32 0.03125, %v395_v25 }
 0x137   : > { %v397_v27 = vadd.f32 1e-05, %v396_v26 }
 0x139   : > { %4355 = vrsqrt.f32 %v397_v27 }
 0x143   : > { %v4356_v28 = vpop.eup %4355 }
 0x144   : > { %v399_v30 = vmul.f32 %v4356_v28, %v391_v13 }
 0x146   : > { %v406_v32 = vmul.f32 %v3890_v29, %v399_v30 }
 0x148   : > { %v413_v33 = vadd.f32 %v3891_v31, %v406_v32 }
 0x14a   : > { %4089 = vmatmul.mubr.msk.f32.vlgmr.msra.gmra.mrb[0].mxu0 %vm425_vm2, %v413_v33  ;;  %vm590_vm2 = vmand %vm587_vm13, %vm589_vm14  ;;  %vm617_vm13 = vcmp.eq.s32.totalorder %v4539_v36, 1  ;;  %vm618_vm14 = vcmp.eq.s32.totalorder %v4539_v36, 2  ;;  %v3745_v36 = vld [vmem:[%s4926_s9 + $0x18] sm:$0xff] }
 0x14b   : > { %4104 = vmatprep.mubr.msk.f32.mxu0 %vm4383_vm1, %v4384_v8  ;;  %4103 = vmatpush3.xpose.msk.msra.mxu0 %vm632_vm3, %v4516_v22  ;;  %v4577_v59 = vsel %vm590_vm2, 1.0, %v4384_v8  ;;  %vm1264_vm2 = vcmask 27648  }
 0x14c   : > { %4117 = vmatprep.subr.mxu0 %v4384_v8 }
 0x155   : > { %v1378_v1 = vpop.permute.xlu0 %1377 }
 0x21d   : > { %v495_v38 = vpop.f32.mrb[0].mxu0 }
 0x21e   : > { %v4544_v41 = vadd.f32 %v3892_v35, %v495_v38  ;;  %v4090_v42 = vpop.f32.mrb[1].mxu0  ;;  %v1361_v35 = vpop.permute.xlu0 %1360 }
 0x220   : > { %1186 = vrot.lane.b32.xlu1 %v4544_v41, %s4387_s23  ;;  %v631_v43 = vadd.f32 %v3904_v39, %v4544_v41  ;;  %v625_v0 = vadd.f32 %v3903_v63, %v4544_v41  ;;  %v1363_v37 = vadd.f32 %v1361_v35, %v4544_v41  ;;  %v1353_v35 = vld [vmem:[%s4926_s9] sm:$0xff] }
 0x222   : > { %4105 = vmatmul.mubr.msk.f32.vlgmr.msra.gmra.mrb[2].mxu0 %vm632_vm3, %v631_v43 }
 0x223   : > { %4119 = vmatprep.mubr.msk.f32.mxu0 %vm4383_vm1, %v4384_v8  ;;  %4118 = vmatpush3.msk.msra.mxu0 %vm714_vm6, %v4564_v47 }
 0x224   : > { %1370 = vrot.lane.b32.xlu1 %v3924_v44, %s4386_s29  ;;  %4122 = vmatprep.subr.mxu0 %v4384_v8  ;;  %s4388_s29 = smov 64  }
 0x292   : > { %v1187_v48 = vpop.permute.xlu1 %1186 }
 0x296   : > { %v1371_v49 = vpop.permute.xlu1 %1370 }
 0x297   : > { %v1373_v50 = vadd.f32 %v1371_v49, %v4544_v41 }
 0x299   : > { %1375 = vrot.lane.b32.xlu1 %v1373_v50, %s4385_s26 }
 0x2f5   : > { %v705_v54 = vpop.f32.mrb[2].mxu0 }
 0x2f6   : > { %v710_v55 = vrot.slane %v705_v54, 1  ;;  %v869_v56 = vrot.slane %v705_v54, 2  ;;  %v4106_v57 = vpop.f32.mrb[3].mxu0  ;;  %v1103_v62 = vrot.slane %v705_v54, 3 }
 0x2f8   : > { %4110 = vmatmul.mubr.msk.f32.vlgmr.msra.gmra.mrb[2].mxu1 %vm711_vm4, %v710_v55  ;;  %4120 = vmatmul.mubr.msk.f32.vlgmr.msra.gmra.mrb[4].mxu0 %vm711_vm4, %v869_v56 }
 0x2f9   : > { %4113 = vmatpush3.msk.msra.mxu1 %vm714_vm6, %v4574_v58  ;;  %4123 = vmatpush3.msk.msra.mxu0 %vm714_vm6, %v4577_v59 }
 0x2fa   : > { %4114 = vmatprep.mubr.msk.f32.mxu1 %vm4383_vm1, %v4384_v8  ;;  %4124 = vmatprep.mubr.msk.f32.mxu0 %vm4383_vm1, %v4384_v8 }
 0x2fb   : > { %4127 = vmatprep.subr.mxu1 %v4384_v8  ;;  %4132 = vmatprep.subr.mxu0 %v4384_v8 }
 0x300   : > { %4115 = vmatmul.mubr.msk.f32.vlgmr.msra.gmra.mrb[2].mxu1 %vm711_vm4, %v705_v54  ;;  %4125 = vmatmul.mubr.msk.f32.vlgmr.msra.gmra.mrb[4].mxu0 %vm711_vm4, %v710_v55 }
 0x301   : > { %4128 = vmatpush3.msk.msra.mxu1 %vm714_vm6, %v4594_v60  ;;  %4133 = vmatpush3.msk.msra.mxu0 %vm714_vm6, %v4597_v61 }
 0x302   : > { %4129 = vmatprep.mubr.msk.f32.mxu1 %vm4383_vm1, %v4384_v8  ;;  %4134 = vmatprep.mubr.msk.f32.mxu0 %vm4383_vm1, %v4384_v8 }
 0x303   : > { %4137 = vmatprep.subr.mxu1 %v4384_v8  ;;  %4142 = vmatprep.subr.mxu0 %v4384_v8 }
 0x304   : > { %4130 = vmatmul.mubr.msk.f32.vlgmr.msra.gmra.mrb[4].mxu1 %vm711_vm4, %v869_v56  ;;  %4135 = vmatmul.mubr.msk.f32.vlgmr.msra.gmra.mrb[6].mxu0 %vm711_vm4, %v1103_v62 }
 0x305   : > { %4139 = vmatprep.mubr.msk.f32.mxu1 %vm4383_vm1, %v4384_v8  ;;  %4144 = vmatprep.mubr.msk.f32.mxu0 %vm4383_vm1, %v4384_v8 }
 0x308   : > { %4138 = vmatpush3.xpose.msk.msra.mxu1 %vm632_vm3, %v1187_v48 }
 0x309   : > { %4147 = vmatprep.subr.mxu1 %v4384_v8 }
 0x30b   : > { %4140 = vmatmul.mubr.msk.f32.vlgmr.msra.gmra.mrb[6].mxu1 %vm632_vm3, %v625_v0  ;;  %v1376_v2 = vpop.permute.xlu1 %1375 }
 0x30c   : > { %4148 = vmatpush3.xpose.msk.msra.mxu1 %vm632_vm3, %v1378_v1  ;;  %4149 = vmatprep.mubr.msk.f32.mxu1 %vm4383_vm1, %v4384_v8 }
 0x30d   : > { %4162 = vmatprep.subr.mxu1 %v4384_v8 }
 0x30f   : > { %4150 = vmatmul.mubr.msk.f32.vlgmr.msra.gmra.mrb[8].mxu1 %vm632_vm3, %v1376_v2 }
 0x310   : > { %4163 = vmatpush3.msk.msra.mxu1 %vm714_vm6, %v4564_v47  ;;  %4164 = vmatprep.mubr.msk.f32.mxu1 %vm4383_vm1, %v4384_v8 }
 0x311   : > { %4167 = vmatprep.subr.mxu1 %v4384_v8 }
 0x3d3   : > { %v859_v4 = vpop.f32.mrb[2].mxu1  ;;  %v1014_v5 = vpop.f32.mrb[4].mxu0 }
 0x3d4   : > { %v866_v6 = vrot.slane %v859_v4, %v4635_v3  ;;  %v1021_v7 = vrot.slane %v1014_v5, %v4635_v3  ;;  %v4116_v9 = vpop.f32.mrb[3].mxu1  ;;  %v4126_v10 = vpop.f32.mrb[5].mxu0 }
 0x3d6   : > { %v867_v11 = vsel %vm616_vm12, %v866_v6, 0.0  ;;  %v1022_v12 = vsel %vm617_vm13, %v1021_v7, 0.0 }
 0x3d7   : > { %v1023_v13 = vadd.f32 %v1022_v12, %v867_v11  ;;  %v1093_v14 = vpop.f32.mrb[4].mxu1  ;;  %v1175_v15 = vpop.f32.mrb[6].mxu0 }
 0x3d8   : > { %v1100_v16 = vrot.slane %v1093_v14, %v4635_v3  ;;  %v1182_v17 = vrot.slane %v1175_v15, %v4635_v3  ;;  %v4131_v18 = vpop.f32.mrb[5].mxu1  ;;  %v4136_v19 = vpop.f32.mrb[7].mxu0 }
 0x3da   : > { %v1101_v20 = vsel %vm618_vm14, %v1100_v16, 0.0  ;;  %v1183_v23 = vsel %vm619_vm15, %v1182_v17, 0.0 }
 0x3db   : > { %v1102_v21 = vadd.f32 %v1101_v20, %v1023_v13 }
 0x3dd   : > { %v1184_v24 = vadd.f32 %v1183_v23, %v1102_v21 }
 0x3de   : > { %v1259_v25 = vpop.f32.mrb[6].mxu1 }
 0x3df   : > { %v1260_v26 = vadd.f32 %v1259_v25, %v1184_v24  ;;  %v4141_v27 = vpop.f32.mrb[7].mxu1 }
 0x3e0   : > { %v3946_v27 = vld [vmem:[%s4925_s8 + $0x2] ss:$0 sm:$0xff] }
 0x3e1   : > { %v1263_v28 = vmul.f32 0.17677669, %v1260_v26 }
 0x3e2   : > { %v1449_v29 = vpop.f32.mrb[8].mxu1 }
 0x3e3   : > { %v1605_v30 = vrot.slane %v1449_v29, 2  ;;  %v4151_v31 = vpop.f32.mrb[9].mxu1  ;;  %v1265_v32 = vsel %vm1264_vm2, %v1263_v28, -inf  ;;  %v1454_v33 = vrot.slane %v1449_v29, 1  ;;  %v1830_v34 = vrot.slane %v1449_v29, 3 }
 0x3e4   : > { %1266 = vmax.xlane.f32.xlu1 %v1265_v32  ;;  %v3945_v32 = vld [vmem:[%s4924_s7 + $0x2] ss:$0 sm:$0xff] }
 0x3e5   : > { %4165 = vmatmul.mubr.msk.f32.vlgmr.msra.gmra.mrb[10].mxu1 %vm711_vm4, %v1605_v30 }
 0x3e6   : > { %4168 = vmatpush3.msk.msra.mxu1 %vm714_vm6, %v4577_v59  ;;  %4169 = vmatprep.mubr.msk.f32.mxu1 %vm4383_vm1, %v4384_v8 }
 0x3e7   : > { %4177 = vmatprep.subr.mxu1 %v4384_v8 }
 0x3ed   : > { %4170 = vmatmul.mubr.msk.f32.vlgmr.msra.gmra.mrb[10].mxu1 %vm711_vm4, %v1454_v33 }
 0x3ee   : > { %4178 = vmatpush3.msk.msra.mxu1 %vm714_vm6, %v4597_v61  ;;  %4179 = vmatprep.mubr.msk.f32.mxu1 %vm4383_vm1, %v4384_v8 }
 0x3ef   : > { %4187 = vmatprep.subr.mxu1 %v4384_v8 }
 0x3f1   : > { %4180 = vmatmul.mubr.msk.f32.vlgmr.msra.gmra.mrb[12].mxu1 %vm711_vm4, %v1830_v34 }
 0x3f2   : > { %4189 = vmatprep.mubr.msk.f32.mxu1 %vm4383_vm1, %v4384_v8 }
 0x3f5   : > { %1276 = vrot.lane.b32.xlu1 %v4544_v41, %s4388_s29 }
 0x3f9   : > { %1910 = vrot.lane.b32.xlu1 %v1363_v37, %s4385_s26  ;;  %s4390_s26 = smov 56  }
 0x471   : > { %v1267_v38 = vpop.xlane.xlu1 %1266 }
 0x472   : > { %v1268_v39 = vsub.f32 %v1263_v28, %v1267_v38 }
 0x474   : > { %v1269_v40 = vmul.f32 1.442695, %v1268_v39 }
 0x475   : > { %v1277_v42 = vpop.permute.xlu1 %1276 }
 0x476   : > { %4357 = vpow2.f32 %v1269_v40  ;;  %4143 = vmatpush3.msk.msra.mxu0 %vm714_vm6, %v1277_v42  ;;  %v3967_v42 = vld [vmem:[%s4925_s8 + $0x3] ss:$0 sm:$0xff] }
 0x477   : > { %4152 = vmatprep.subr.mxu0 %v4384_v8 }
 0x479   : > { %v1911_v55 = vpop.permute.xlu1 %1910 }
 0x480   : > { %v4358_v43 = vpop.eup %4357 }
 0x481   : > { %v1271_v44 = vsel %vm1264_vm2, %v4358_v43, 0.0 }
 0x482   : > { %1272 = vadd.xlane.f32.xlu0 %v1271_v44 }
 0x498   : > { %1912 = vrot.lane.b32.xlu0 %v4544_v41, %s4389_s30  ;;  %s4394_s30 = smov 24  }
 0x4c0   : > { %v1744_v46 = vpop.f32.mrb[10].mxu1 }
 0x4c1   : > { %v4171_v48 = vpop.f32.mrb[11].mxu1  ;;  %v1751_v62 = vrot.slane %v1744_v46, %v4635_v3 }
 0x4c3   : > { %v1752_v2 = vsel %vm617_vm13, %v1751_v62, 0.0 }
 0x4c4   : > { %v1899_v49 = vpop.f32.mrb[12].mxu1 }
 0x4c5   : > { %v4181_v50 = vpop.f32.mrb[13].mxu1  ;;  %v1906_v7 = vrot.slane %v1899_v49, %v4635_v3 }
 0x4c7   : > { %v1907_v13 = vsel %vm619_vm15, %v1906_v7, 0.0 }
 0x50f   : > { %v1273_v51 = vpop.xlane.xlu0 %1272 }
 0x510   : > { %4359 = vrcp.f32 %v1273_v51 }
 0x513   : > { %v1913_v54 = vpop.permute.xlu0 %1912 }
 0x51a   : > { %v4360_v52 = vpop.eup %4359 }
 0x51b   : > { %v1275_v53 = vmul.f32 %v4360_v52, %v4358_v43 }
 0x51d   : > { %4145 = vmatmul.mubr.msk.f32.vlgmr.msra.gmra.mrb[8].mxu0 %vm711_vm4, %v1275_v53 }
 0x51e   : > { %4153 = vmatpush3.msk.msra.mxu0 %vm714_vm6, %v4553_v45  ;;  %4154 = vmatprep.mubr.msk.f32.mxu0 %vm4383_vm1, %v4384_v8 }
 0x51f   : > { %4157 = vmatprep.subr.mxu0 %v4384_v8 }
 0x521   : > { %4155 = vmatmul.mubr.msk.f32.vlgmr.msra.gmra.mrb[10].mxu0 %vm711_vm4, %v1454_v33 }
 0x522   : > { %4158 = vmatpush3.msk.msra.mxu0 %vm714_vm6, %v4574_v58  ;;  %4159 = vmatprep.mubr.msk.f32.mxu0 %vm4383_vm1, %v4384_v8 }
 0x523   : > { %4172 = vmatprep.subr.mxu0 %v4384_v8 }
 0x529   : > { %4160 = vmatmul.mubr.msk.f32.vlgmr.msra.gmra.mrb[10].mxu0 %vm711_vm4, %v1449_v29 }
 0x52a   : > { %4173 = vmatpush3.msk.msra.mxu0 %vm714_vm6, %v4594_v60  ;;  %4174 = vmatprep.mubr.msk.f32.mxu0 %vm4383_vm1, %v4384_v8 }
 0x52b   : > { %4182 = vmatprep.subr.mxu0 %v4384_v8 }
 0x52d   : > { %4175 = vmatmul.mubr.msk.f32.vlgmr.msra.gmra.mrb[12].mxu0 %vm711_vm4, %v1605_v30  ;;  %v2077_v30 = vld [vmem:[%s4926_s9 + $0x8] sm:$0xff] }
 0x52e   : > { %4184 = vmatprep.mubr.msk.f32.mxu0 %vm4383_vm1, %v4384_v8 }
 0x531   : > { %4183 = vmatpush3.xpose.msk.msra.mxu0 %vm632_vm3, %v1913_v54 }
 0x532   : > { %4192 = vmatprep.subr.mxu0 %v4384_v8 }
 0x534   : > { %4185 = vmatmul.mubr.msk.f32.vlgmr.msra.gmra.mrb[14].mxu0 %vm632_vm3, %v1911_v55 }
 0x535   : > { %4194 = vmatprep.mubr.msk.f32.mxu0 %vm4383_vm1, %v4384_v8  ;;  %4193 = vmatpush3.msra.mxu0 %v2077_v30 }
 0x536   : > { %4202 = vmatprep.subr.mxu0 %v4384_v8 }
 0x5f0   : > { %v1349_v56 = vpop.f32.mrb[8].mxu0 }
 0x5f1   : > { %v4146_v57 = vpop.f32.mrb[9].mxu0 }
 0x5fc   : > { %v1595_v63 = vpop.f32.mrb[10].mxu0 }
 0x5fd   : > { %v1602_v0 = vrot.slane %v1595_v63, %v4635_v3  ;;  %v4161_v1 = vpop.f32.mrb[11].mxu0 }
 0x5ff   : > { %v1603_v4 = vsel %vm616_vm12, %v1602_v0, 0.0 }
 0x600   : > { %v1753_v5 = vadd.f32 %v1752_v2, %v1603_v4  ;;  %v1820_v6 = vpop.f32.mrb[12].mxu0 }
 0x601   : > { %v1827_v9 = vrot.slane %v1820_v6, %v4635_v3  ;;  %v4176_v10 = vpop.f32.mrb[13].mxu0 }
 0x603   : > { %v1828_v11 = vsel %vm618_vm14, %v1827_v9, 0.0 }
 0x604   : > { %v1829_v12 = vadd.f32 %v1828_v11, %v1753_v5 }
 0x606   : > { %v1908_v14 = vadd.f32 %v1907_v13, %v1829_v12 }
 0x607   : > { %v1984_v15 = vpop.f32.mrb[14].mxu0 }
 0x608   : > { %v1985_v16 = vadd.f32 %v1984_v15, %v1908_v14  ;;  %v4186_v17 = vpop.f32.mrb[15].mxu0 }
 0x60a   : > { %v1988_v18 = vmul.f32 0.17677669, %v1985_v16 }
 0x60c   : > { %v1989_v19 = vsel %vm1264_vm2, %v1988_v18, -inf }
 0x60d   : > { %1990 = vmax.xlane.f32.xlu1 %v1989_v19 }
 0x61e   : > { %2000 = vrot.lane.b32.xlu1 %v4544_v41, %s4390_s26  ;;  %s4395_s26 = smov 48  }
 0x622   : > { %2247 = vrot.lane.b32.xlu1 %v4516_v22, %s4391_s12 }
 0x69a   : > { %v1991_v20 = vpop.xlane.xlu1 %1990 }
 0x69b   : > { %v1992_v21 = vsub.f32 %v1988_v18, %v1991_v20 }
 0x69d   : > { %v1993_v23 = vmul.f32 1.442695, %v1992_v21 }
 0x69e   : > { %v2001_v24 = vpop.permute.xlu1 %2000 }
 0x69f   : > { %4361 = vpow2.f32 %v1993_v23  ;;  %4188 = vmatpush3.msk.msra.mxu1 %vm714_vm6, %v2001_v24 }
 0x6a0   : > { %4197 = vmatprep.subr.mxu1 %v4384_v8 }
 0x6a2   : > { %v2248_v37 = vpop.permute.xlu1 %2247 }
 0x6a9   : > { %v4362_v25 = vpop.eup %4361 }
 0x6aa   : > { %v1995_v26 = vsel %vm1264_vm2, %v4362_v25, 0.0 }
 0x6ab   : > { %1996 = vadd.xlane.f32.xlu0 %v1995_v26 }
 0x6c1   : > { %2240 = vrot.lane.b32.xlu0 %v3946_v27, %s4392_s15 }
 0x738   : > { %v1997_v28 = vpop.xlane.xlu0 %1996 }
 0x739   : > { %4363 = vrcp.f32 %v1997_v28  ;;  %v3966_v28 = vld [vmem:[%s4924_s7 + $0x3] ss:$0 sm:$0xff] }
 0x73c   : > { %v2241_v29 = vpop.permute.xlu0 %2240 }
 0x73d   : > { %v2243_v31 = vadd.f32 %v2241_v29, %v4544_v41 }
 0x73f   : > { %2245 = vrot.lane.b32.xlu1 %v2243_v31, %s4391_s12 }
 0x743   : > { %v4364_v33 = vpop.eup %4363  ;;  %2230 = vrot.lane.b32.xlu1 %v3945_v32, %s4392_s15  ;;  %s4397_s15 = smov 72  }
 0x744   : > { %v1999_v34 = vmul.f32 %v4364_v33, %v4362_v25 }
 0x746   : > { %4190 = vmatmul.mubr.msk.f32.vlgmr.msra.gmra.mrb[14].mxu1 %vm711_vm4, %v1999_v34 }
 0x747   : > { %2782 = vrot.lane.b32.xlu1 %v4544_v41, %s4393_s27  ;;  %4198 = vmatpush3.msra.mxu1 %v1353_v35 }
 0x748   : > { %4199 = vmatprep.mubr.msk.f32.mxu1 %vm4383_vm1, %v4384_v8  ;;  %4207 = vmatprep.subr.mxu1 %v4384_v8 }
 0x74a   : > { %4200 = vmatmul.mubr.msk.f32.vlgmr.msra.gmra.mrb[16].mxu1 %vm632_vm3, %v1349_v56 }
 0x74b   : > { %4208 = vmatpush3.msk.msra.mxu1 %vm714_vm6, %v4553_v45  ;;  %4209 = vmatprep.mubr.msk.f32.mxu1 %vm4383_vm1, %v4384_v8 }
 0x74c   : > { %4212 = vmatprep.subr.mxu1 %v4384_v8 }
 0x7b1   : > { %v2246_v38 = vpop.permute.xlu1 %2245 }
 0x7b5   : > { %v2231_v39 = vpop.permute.xlu1 %2230 }
 0x7b6   : > { %v2233_v40 = vadd.f32 %v2231_v39, %v4544_v41  ;;  %v2947_v39 = vld [vmem:[%s4926_s9 + $0x10] sm:$0xff] }
 0x7b8   : > { %2780 = vrot.lane.b32.xlu1 %v2233_v40, %s4391_s12  ;;  %s4396_s12 = smov 104  }
 0x7b9   : > { %v2783_v57 = vpop.permute.xlu1 %2782 }
 0x7bc   : > { %3038 = vrot.lane.b32.xlu1 %v3967_v42, %s4394_s30 }
 0x819   : > { %v2073_v43 = vpop.f32.mrb[14].mxu1 }
 0x81a   : > { %v4191_v44 = vpop.f32.mrb[15].mxu1  ;;  %4195 = vmatmul.mubr.msk.f32.vlgmr.msra.gmra.mrb[16].mxu0 %vm632_vm3, %v2073_v43 }
 0x81b   : > { %4203 = vmatpush3.xpose.msk.msra.mxu0 %vm632_vm3, %v2248_v37  ;;  %4204 = vmatprep.mubr.msk.f32.mxu0 %vm4383_vm1, %v4384_v8 }
 0x81c   : > { %4217 = vmatprep.subr.mxu0 %v4384_v8 }
 0x81d   : > { %v2220_v46 = vpop.f32.mrb[16].mxu1 }
 0x81e   : > { %v4201_v48 = vpop.f32.mrb[17].mxu1  ;;  %4205 = vmatmul.mubr.msk.f32.vlgmr.msra.gmra.mrb[18].mxu0 %vm632_vm3, %v2246_v38 }
 0x81f   : > { %4218 = vmatpush3.msk.msra.mxu0 %vm714_vm6, %v4564_v47  ;;  %4219 = vmatprep.mubr.msk.f32.mxu0 %vm4383_vm1, %v4384_v8 }
 0x820   : > { %4222 = vmatprep.subr.mxu0 %v4384_v8 }
 0x82a   : > { %v2781_v62 = vpop.permute.xlu1 %2780 }
 0x82e   : > { %v3039_v26 = vpop.permute.xlu1 %3038 }
 0x82f   : > { %v3041_v27 = vadd.f32 %v3039_v26, %v4544_v41 }
 0x8ed   : > { %v2147_v49 = vpop.f32.mrb[16].mxu0 }
 0x8ee   : > { %v4764_v50 = vadd.f32 %v2220_v46, %v2147_v49  ;;  %v4196_v51 = vpop.f32.mrb[17].mxu0 }
 0x8f1   : > { %v2319_v52 = vpop.f32.mrb[18].mxu0 }
 0x8f2   : > { %v2324_v53 = vrot.slane %v2319_v52, 1  ;;  %v2475_v54 = vrot.slane %v2319_v52, 2  ;;  %v4206_v55 = vpop.f32.mrb[19].mxu0  ;;  %v2700_v56 = vrot.slane %v2319_v52, 3 }
 0x8f4   : > { %4210 = vmatmul.mubr.msk.f32.vlgmr.msra.gmra.mrb[18].mxu1 %vm711_vm4, %v2324_v53  ;;  %4220 = vmatmul.mubr.msk.f32.vlgmr.msra.gmra.mrb[20].mxu0 %vm711_vm4, %v2475_v54 }
 0x8f5   : > { %4213 = vmatpush3.msk.msra.mxu1 %vm714_vm6, %v4574_v58  ;;  %4223 = vmatpush3.msk.msra.mxu0 %vm714_vm6, %v4577_v59 }
 0x8f6   : > { %4214 = vmatprep.mubr.msk.f32.mxu1 %vm4383_vm1, %v4384_v8  ;;  %4224 = vmatprep.mubr.msk.f32.mxu0 %vm4383_vm1, %v4384_v8 }
 0x8f7   : > { %4227 = vmatprep.subr.mxu1 %v4384_v8  ;;  %4232 = vmatprep.subr.mxu0 %v4384_v8 }
 0x8fc   : > { %4215 = vmatmul.mubr.msk.f32.vlgmr.msra.gmra.mrb[18].mxu1 %vm711_vm4, %v2319_v52  ;;  %4225 = vmatmul.mubr.msk.f32.vlgmr.msra.gmra.mrb[20].mxu0 %vm711_vm4, %v2324_v53 }
 0x8fd   : > { %4228 = vmatpush3.msk.msra.mxu1 %vm714_vm6, %v4594_v60  ;;  %4233 = vmatpush3.msk.msra.mxu0 %vm714_vm6, %v4597_v61 }
 0x8fe   : > { %4229 = vmatprep.mubr.msk.f32.mxu1 %vm4383_vm1, %v4384_v8  ;;  %4234 = vmatprep.mubr.msk.f32.mxu0 %vm4383_vm1, %v4384_v8 }
 0x8ff   : > { %4237 = vmatprep.subr.mxu1 %v4384_v8  ;;  %4242 = vmatprep.subr.mxu0 %v4384_v8 }
 0x900   : > { %4230 = vmatmul.mubr.msk.f32.vlgmr.msra.gmra.mrb[20].mxu1 %vm711_vm4, %v2475_v54  ;;  %4235 = vmatmul.mubr.msk.f32.vlgmr.msra.gmra.mrb[22].mxu0 %vm711_vm4, %v2700_v56 }
 0x901   : > { %4239 = vmatprep.mubr.msk.f32.mxu1 %vm4383_vm1, %v4384_v8  ;;  %4244 = vmatprep.mubr.msk.f32.mxu0 %vm4383_vm1, %v4384_v8 }
 0x904   : > { %4238 = vmatpush3.xpose.msk.msra.mxu1 %vm632_vm3, %v2783_v57 }
 0x905   : > { %4247 = vmatprep.subr.mxu1 %v4384_v8 }
 0x907   : > { %4240 = vmatmul.mubr.msk.f32.vlgmr.msra.gmra.mrb[22].mxu1 %vm632_vm3, %v2781_v62 }
 0x908   : > { %4249 = vmatprep.mubr.msk.f32.mxu1 %vm4383_vm1, %v4384_v8  ;;  %4248 = vmatpush3.msra.mxu1 %v2947_v39 }
 0x909   : > { %4257 = vmatprep.subr.mxu1 %v4384_v8 }
 0x9cf   : > { %v2465_v63 = vpop.f32.mrb[18].mxu1  ;;  %v2614_v0 = vpop.f32.mrb[20].mxu0 }
 0x9d0   : > { %v2472_v1 = vrot.slane %v2465_v63, %v4635_v3  ;;  %v2621_v2 = vrot.slane %v2614_v0, %v4635_v3  ;;  %v4216_v4 = vpop.f32.mrb[19].mxu1  ;;  %v4226_v5 = vpop.f32.mrb[21].mxu0 }
 0x9d2   : > { %v2473_v6 = vsel %vm616_vm12, %v2472_v1, 0.0  ;;  %v2622_v7 = vsel %vm617_vm13, %v2621_v2, 0.0 }
 0x9d3   : > { %v2623_v9 = vadd.f32 %v2622_v7, %v2473_v6  ;;  %v2690_v10 = vpop.f32.mrb[20].mxu1  ;;  %v2769_v11 = vpop.f32.mrb[22].mxu0 }
 0x9d4   : > { %v2697_v12 = vrot.slane %v2690_v10, %v4635_v3  ;;  %v2776_v13 = vrot.slane %v2769_v11, %v4635_v3  ;;  %v4231_v14 = vpop.f32.mrb[21].mxu1  ;;  %v4236_v15 = vpop.f32.mrb[23].mxu0 }
 0x9d6   : > { %v2698_v16 = vsel %vm618_vm14, %v2697_v12, 0.0  ;;  %v2777_v18 = vsel %vm619_vm15, %v2776_v13, 0.0 }
 0x9d7   : > { %v2699_v17 = vadd.f32 %v2698_v16, %v2623_v9 }
 0x9d9   : > { %v2778_v19 = vadd.f32 %v2777_v18, %v2699_v17 }
 0x9da   : > { %v2854_v20 = vpop.f32.mrb[22].mxu1 }
 0x9db   : > { %v2855_v21 = vadd.f32 %v2854_v20, %v2778_v19  ;;  %v4241_v23 = vpop.f32.mrb[23].mxu1 }
 0x9dd   : > { %v2858_v24 = vmul.f32 0.17677669, %v2855_v21 }
 0x9df   : > { %v2859_v25 = vsel %vm1264_vm2, %v2858_v24, -inf }
 0x9e0   : > { %2860 = vmax.xlane.f32.xlu0 %v2859_v25 }
 0x9f6   : > { %2870 = vrot.lane.b32.xlu0 %v4544_v41, %s4395_s26 }
 0x9fa   : > { %3043 = vrot.lane.b32.xlu0 %v3041_v27, %s4396_s12 }
 0x9fe   : > { %3028 = vrot.lane.b32.xlu0 %v3966_v28, %s4394_s30  ;;  %s381_s30 = scalar_lea.vmem %s4928_s11, %s3888_s19 }
 0xa6d   : > { %v2861_v29 = vpop.xlane.xlu0 %2860 }
 0xa6e   : > { %v2862_v30 = vsub.f32 %v2858_v24, %v2861_v29 }
 0xa70   : > { %v2863_v31 = vmul.f32 1.442695, %v2862_v30  ;;  %v3987_v30 = vld [vmem:[%s4927_s10] ss:$0 sm:$0xff] }
 0xa71   : > { %v2871_v32 = vpop.permute.xlu0 %2870 }
 0xa72   : > { %4365 = vpow2.f32 %v2863_v31  ;;  %4243 = vmatpush3.msk.msra.mxu0 %vm714_vm6, %v2871_v32  ;;  %v4373_v31 = vld [vmem:[%s4475_s22] sm:$0xf] }
 0xa73   : > { %4252 = vmatprep.subr.mxu0 %v4384_v8 }
 0xa75   : > { %v3044_v33 = vpop.permute.xlu0 %3043 }
 0xa79   : > { %v3029_v34 = vpop.permute.xlu0 %3028 }
 0xa7a   : > { %v3031_v35 = vadd.f32 %v3029_v34, %v4544_v41 }
 0xa7c   : > { %v4366_v37 = vpop.eup %4365  ;;  %3578 = vrot.lane.b32.xlu0 %v3031_v35, %s4396_s12 }
 0xa7d   : > { %v2865_v38 = vsel %vm1264_vm2, %v4366_v37, 0.0 }
 0xa7e   : > { %2866 = vadd.xlane.f32.xlu1 %v2865_v38 }
 0xa8f   : > { %3045 = vrot.lane.b32.xlu1 %v4516_v22, %s4396_s12 }
 0xa93   : > { %3580 = vrot.lane.b32.xlu1 %v4544_v41, %s4397_s15 }
 0xb0b   : > { %v2867_v40 = vpop.xlane.xlu1 %2866 }
 0xb0c   : > { %4367 = vrcp.f32 %v2867_v40 }
 0xb0f   : > { %v3046_v44 = vpop.permute.xlu1 %3045 }
 0xb16   : > { %v4368_v42 = vpop.eup %4367 }
 0xb17   : > { %v2869_v43 = vmul.f32 %v4368_v42, %v4366_v37 }
 0xb19   : > { %4245 = vmatmul.mubr.msk.f32.vlgmr.msra.gmra.mrb[24].mxu0 %vm711_vm4, %v2869_v43 }
 0xb1a   : > { %4253 = vmatpush3.xpose.msk.msra.mxu0 %vm632_vm3, %v3046_v44  ;;  %4254 = vmatprep.mubr.msk.f32.mxu0 %vm4383_vm1, %v4384_v8 }
 0xb1b   : > { %4267 = vmatprep.subr.mxu0 %v4384_v8 }
 0xb1d   : > { %4255 = vmatmul.mubr.msk.f32.vlgmr.msra.gmra.mrb[26].mxu0 %vm632_vm3, %v3044_v33 }
 0xb1e   : > { %4268 = vmatpush3.msk.msra.mxu0 %vm714_vm6, %v4564_v47  ;;  %4269 = vmatprep.mubr.msk.f32.mxu0 %vm4383_vm1, %v4384_v8 }
 0xb1f   : > { %4272 = vmatprep.subr.mxu0 %v4384_v8 }
 0xbec   : > { %v2943_v22 = vpop.f32.mrb[24].mxu0 }
 0xbed   : > { %v4246_v46 = vpop.f32.mrb[25].mxu0  ;;  %4250 = vmatmul.mubr.msk.f32.vlgmr.msra.gmra.mrb[24].mxu1 %vm632_vm3, %v2943_v22 }
 0xbee   : > { %4258 = vmatpush3.msk.msra.mxu1 %vm714_vm6, %v4553_v45  ;;  %4259 = vmatprep.mubr.msk.f32.mxu1 %vm4383_vm1, %v4384_v8 }
 0xbef   : > { %4262 = vmatprep.subr.mxu1 %v4384_v8 }
 0xbf0   : > { %v3117_v48 = vpop.f32.mrb[26].mxu0 }
 0xbf1   : > { %v3122_v49 = vrot.slane %v3117_v48, 1  ;;  %v3273_v47 = vrot.slane %v3117_v48, 2  ;;  %v4256_v51 = vpop.f32.mrb[27].mxu0  ;;  %v3498_v45 = vrot.slane %v3117_v48, 3 }
 0xbf3   : > { %4260 = vmatmul.mubr.msk.f32.vlgmr.msra.gmra.mrb[26].mxu1 %vm711_vm4, %v3122_v49  ;;  %4270 = vmatmul.mubr.msk.f32.vlgmr.msra.gmra.mrb[28].mxu0 %vm711_vm4, %v3273_v47 }
 0xbf4   : > { %4263 = vmatpush3.msk.msra.mxu1 %vm714_vm6, %v4574_v58  ;;  %4273 = vmatpush3.msk.msra.mxu0 %vm714_vm6, %v4577_v59  ;;  %v3581_v58 = vpop.permute.xlu1 %3580  ;;  %v3579_v59 = vpop.permute.xlu0 %3578 }
 0xbf5   : > { %4264 = vmatprep.mubr.msk.f32.mxu1 %vm4383_vm1, %v4384_v8  ;;  %4274 = vmatprep.mubr.msk.f32.mxu0 %vm4383_vm1, %v4384_v8 }
 0xbf6   : > { %4277 = vmatprep.subr.mxu1 %v4384_v8  ;;  %4282 = vmatprep.subr.mxu0 %v4384_v8 }
 0xbfb   : > { %4265 = vmatmul.mubr.msk.f32.vlgmr.msra.gmra.mrb[26].mxu1 %vm711_vm4, %v3117_v48  ;;  %4275 = vmatmul.mubr.msk.f32.vlgmr.msra.gmra.mrb[28].mxu0 %vm711_vm4, %v3122_v49 }
 0xbfc   : > { %4278 = vmatpush3.msk.msra.mxu1 %vm714_vm6, %v4594_v60  ;;  %4283 = vmatpush3.msk.msra.mxu0 %vm714_vm6, %v4597_v61 }
 0xbfd   : > { %4279 = vmatprep.mubr.msk.f32.mxu1 %vm4383_vm1, %v4384_v8  ;;  %4284 = vmatprep.mubr.msk.f32.mxu0 %vm4383_vm1, %v4384_v8 }
 0xbfe   : > { %4287 = vmatprep.subr.mxu1 %v4384_v8  ;;  %4292 = vmatprep.subr.mxu0 %v4384_v8 }
 0xbff   : > { %4280 = vmatmul.mubr.msk.f32.vlgmr.msra.gmra.mrb[28].mxu1 %vm711_vm4, %v3273_v47  ;;  %4285 = vmatmul.mubr.msk.f32.vlgmr.msra.gmra.mrb[30].mxu0 %vm711_vm4, %v3498_v45 }
 0xc00   : > { %4289 = vmatprep.mubr.msk.f32.mxu1 %vm4383_vm1, %v4384_v8  ;;  %4294 = vmatprep.mubr.msk.f32.mxu0 %vm4383_vm1, %v4384_v8 }
 0xc03   : > { %4288 = vmatpush3.xpose.msk.msra.mxu1 %vm632_vm3, %v3581_v58 }
 0xc04   : > { %4297 = vmatprep.subr.mxu1 %v4384_v8 }
 0xc06   : > { %4290 = vmatmul.mubr.msk.f32.vlgmr.msra.gmra.mrb[30].mxu1 %vm632_vm3, %v3579_v59 }
 0xc07   : > { %4299 = vmatprep.mubr.msk.f32.mxu1 %vm4383_vm1, %v4384_v8  ;;  %4298 = vmatpush3.msra.mxu1 %v3745_v36 }
 0xcc0   : > { %v3017_v60 = vpop.f32.mrb[24].mxu1 }
 0xcc1   : > { %v3021_v61 = vadd.f32 %v3017_v60, %v4764_v50  ;;  %v4251_v52 = vpop.f32.mrb[25].mxu1 }
 0xcce   : > { %v3263_v53 = vpop.f32.mrb[26].mxu1  ;;  %v3412_v54 = vpop.f32.mrb[28].mxu0 }
 0xccf   : > { %v3270_v55 = vrot.slane %v3263_v53, %v4635_v3  ;;  %v3419_v56 = vrot.slane %v3412_v54, %v4635_v3  ;;  %v4266_v57 = vpop.f32.mrb[27].mxu1  ;;  %v4276_v62 = vpop.f32.mrb[29].mxu0 }
 0xcd1   : > { %v3271_v63 = vsel %vm616_vm12, %v3270_v55, 0.0  ;;  %v3420_v0 = vsel %vm617_vm13, %v3419_v56, 0.0 }
 0xcd2   : > { %v3421_v1 = vadd.f32 %v3420_v0, %v3271_v63  ;;  %v3488_v8 = vpop.f32.mrb[28].mxu1  ;;  %v3567_v2 = vpop.f32.mrb[30].mxu0 }
 0xcd3   : > { %v3495_v50 = vrot.slane %v3488_v8, %v4635_v3  ;;  %v3574_v4 = vrot.slane %v3567_v2, %v4635_v3  ;;  %v4281_v5 = vpop.f32.mrb[29].mxu1  ;;  %v4286_v6 = vpop.f32.mrb[31].mxu0 }
 0xcd5   : > { %v3496_v7 = vsel %vm618_vm14, %v3495_v50, 0.0  ;;  %v3575_v10 = vsel %vm619_vm15, %v3574_v4, 0.0 }
 0xcd6   : > { %v3497_v9 = vadd.f32 %v3496_v7, %v3421_v1 }
 0xcd8   : > { %v3576_v11 = vadd.f32 %v3575_v10, %v3497_v9 }
 0xcd9   : > { %v3652_v12 = vpop.f32.mrb[30].mxu1 }
 0xcda   : > { %v3653_v13 = vadd.f32 %v3652_v12, %v3576_v11  ;;  %v4291_v14 = vpop.f32.mrb[31].mxu1 }
 0xcdc   : > { %v3656_v15 = vmul.f32 0.17677669, %v3653_v13 }
 0xcde   : > { %v3657_v16 = vsel %vm1264_vm2, %v3656_v15, -inf }
 0xcdf   : > { %3658 = vmax.xlane.f32.xlu1 %v3657_v16 }
 0xd6c   : > { %v3659_v17 = vpop.xlane.xlu1 %3658 }
 0xd6d   : > { %v3660_v18 = vsub.f32 %v3656_v15, %v3659_v17 }
 0xd6f   : > { %v3661_v3 = vmul.f32 1.442695, %v3660_v18 }
 0xd71   : > { %4369 = vpow2.f32 %v3661_v3 }
 0xd7b   : > { %v4370_v19 = vpop.eup %4369 }
 0xd7c   : > { %v3663_v20 = vsel %vm1264_vm2, %v4370_v19, 0.0 }
 0xd7d   : > { %3664 = vadd.xlane.f32.xlu0 %v3663_v20 }
 0xd93   : > { %3668 = vrot.lane.b32.xlu0 %v4544_v41, %s4398_s21 }
 0xe0a   : > { %v3665_v21 = vpop.xlane.xlu0 %3664 }
 0xe0b   : > { %4371 = vrcp.f32 %v3665_v21 }
 0xe0e   : > { %v3669_v23 = vpop.permute.xlu0 %3668 }
 0xe0f   : > { %4293 = vmatpush3.msk.msra.mxu0 %vm714_vm6, %v3669_v23 }
 0xe15   : > { %v4372_v24 = vpop.eup %4371 }
 0xe16   : > { %v3667_v25 = vmul.f32 %v4372_v24, %v4370_v19 }
 0xe18   : > { %4295 = vmatmul.mubr.msk.f32.vlgmr.msra.gmra.mrb[32].mxu0 %vm711_vm4, %v3667_v25 }
 0xeeb   : > { %v3741_v26 = vpop.f32.mrb[32].mxu0 }
 0xeec   : > { %v4296_v27 = vpop.f32.mrb[33].mxu0  ;;  %4300 = vmatmul.mubr.msk.f32.vlgmr.msra.gmra.mrb[32].mxu1 %vm632_vm3, %v3741_v26 }
 0xfbf   : > { %v3815_v41 = vpop.f32.mrb[32].mxu1 }
 0xfc0   : > { %v3819_v28 = vadd.f32 %v3815_v41, %v3021_v61  ;;  %v4301_v29 = vpop.f32.mrb[33].mxu1 }
 0xfc2   : > { %v3820_v32 = vadd.f32 %v4373_v31, %v3819_v28 }
 0xfc4   : > { %v3828_v33 = vadd.f32 %v3987_v30, %v3820_v32 }
 0xfc6   : > { %3829 = vst.msk [vmem:[%s381_s30] sm:$0xf] %vm385_vm0, %v3828_v33 }
 0xfc7 PF: > { %s21_s17 = sadd.s32 1, %s4380_s17  }
 0xfc8   : > { %p18_p4 = scmp.ge.s32.totalorder %s21_s17, 4  }
 0xfca   :  { %20 = sbr.rel (!%p18_p4) target bundleno = 1 (0x1), region = 94 }

</bundles_post_ra>
